<compile_context>
chip_gen: v7x
topology: tpu7x:2x2x1
jax: 0.10.0
libtpu: 0.0.40
codegen_flags: <defaults>
</compile_context>

<pallas_src>
import jax
import jax.numpy as jnp
import numpy as np
from jax.experimental import pallas as pl
from jax.experimental.pallas import tpu as pltpu

NEG_INF = -1e30


def _round_up(x, m):
    return (x + m - 1) // m * m


# ---------------------------------------------------------------------------
# Pallas kernel: fused embed+conv matmuls -> max/relu -> highway -> projection
# ---------------------------------------------------------------------------
def make_kernel(*, word_len, n_pos_max, v_pad, f_pad, n_highways):
    def kernel(ids_ref, a_ref, coladd_ref, thw_ref, thb_ref, pw_ref, pb_ref,
               o_ref):
        tn = ids_ref.shape[0]
        ids = ids_ref[...]                                    # (tn, W) int32
        lane_iota = jax.lax.broadcasted_iota(jnp.int32, (tn, v_pad), 1)

        # --- embedding gather + all char CNNs, one K=v_pad matmul per char ---
        conv = None
        for t in range(word_len):
            oh = jnp.where(ids[:, t:t + 1] == lane_iota, 1.0, 0.0)  # (tn, v_pad)
            p = jnp.dot(oh, a_ref[t], preferred_element_type=jnp.float32)
            conv = p if conv is None else conv + p            # (tn, n_pos_max*f_pad)

        # per-column add: conv bias on valid columns, -1e30 on invalid conv
        # positions, 0 on padded channels.
        conv = conv + coladd_ref[...]

        # --- max over conv positions (aligned 128-lane slabs), then relu ---
        x = conv[:, 0:f_pad]
        for t in range(1, n_pos_max):
            x = jnp.maximum(x, conv[:, t * f_pad:(t + 1) * f_pad])
        x = jax.nn.relu(x)                                    # (tn, f_pad)

        # --- highway layers: T and H fused into one (f_pad, 2*f_pad) matmul ---
        for l in range(n_highways):
            th = (jnp.dot(x, thw_ref[l], preferred_element_type=jnp.float32)
                  + thb_ref[l])                               # (tn, 2*f_pad)
            g = jax.nn.sigmoid(th[:, :f_pad])
            y = jax.nn.relu(th[:, f_pad:])
            x = g * y + (1.0 - g) * x

        # --- projection, lane-dense (tn, p_pad) output ---
        o_ref[...] = (jnp.dot(x, pw_ref[...],
                              preferred_element_type=jnp.float32)
                      + pb_ref[...])

    return kernel


# ---------------------------------------------------------------------------
# Parameter packing: fold embedding into a block-banded conv weight, fuse T/H,
# zero-pad everything to lane-friendly sizes.
# ---------------------------------------------------------------------------
def pack_params(params, conv_filters, word_len):
    emb = params["emb"]
    V, E = emb.shape
    F = sum(f for _, f in conv_filters)
    P = params["proj_w"].shape[1]
    L = len(params["t_w"])
    min_k = min(k for k, _ in conv_filters)
    n_pos_max = word_len - min_k + 1
    v_pad = max(_round_up(V, 128), 128)
    f_pad = max(_round_up(F, 128), 128)
    p_pad = max(_round_up(P, 128), 128)
    cols = n_pos_max * f_pad

    # Block-banded fused conv weight (W*E, cols); column c = t*f_pad + channel.
    wf = jnp.zeros((word_len * E, cols), jnp.float32)
    ch = 0
    for ci, (k, f) in enumerate(conv_filters):
        w = params["conv_w"][ci].reshape(k * E, f)            # (k*E, f)
        for t in range(word_len - k + 1):
            r0, c0 = t * E, t * f_pad + ch
            wf = wf.at[r0:r0 + k * E, c0:c0 + f].set(w)
        ch += f

    # Fold the embedding table into the conv weight: A[t] = emb @ Wf_t.
    emb_pad = jnp.zeros((v_pad, E), jnp.float32).at[:V].set(emb)
    A = jnp.einsum("ve,wec->wvc", emb_pad,
                   wf.reshape(word_len, E, cols))             # (W, v_pad, cols)

    # Per-column additive term (mask + conv bias).
    mask = np.zeros((n_pos_max, f_pad), np.float32)
    ch = 0
    for (k, f) in conv_filters:
        mask[word_len - k + 1:, ch:ch + f] = NEG_INF          # invalid positions
        ch += f
    bias_row = jnp.zeros((1, f_pad), jnp.float32)
    ch = 0
    for ci, (k, f) in enumerate(conv_filters):
        bias_row = bias_row.at[:, ch:ch + f].set(params["conv_b"][ci])
        ch += f
    col_add = (jnp.asarray(mask.reshape(1, cols))
               + jnp.tile(bias_row, (1, n_pos_max)))          # (1, cols)

    # Highway: fuse T and H into one (f_pad, 2*f_pad) matmul per layer.
    th_w, th_b = [], []
    for l in range(L):
        wl = jnp.zeros((f_pad, 2 * f_pad), jnp.float32)
        wl = wl.at[:F, :F].set(params["t_w"][l])
        wl = wl.at[:F, f_pad:f_pad + F].set(params["h_w"][l])
        bl = jnp.zeros((1, 2 * f_pad), jnp.float32)
        bl = bl.at[:, :F].set(params["t_b"][l])
        bl = bl.at[:, f_pad:f_pad + F].set(params["h_b"][l])
        th_w.append(wl)
        th_b.append(bl)
    th_w = jnp.stack(th_w)                                    # (L, f_pad, 2*f_pad)
    th_b = jnp.stack(th_b)                                    # (L, 1, 2*f_pad)

    proj_w = jnp.zeros((f_pad, p_pad), jnp.float32).at[:F, :P].set(
        params["proj_w"])
    proj_b = jnp.zeros((1, p_pad), jnp.float32).at[:, :P].set(params["proj_b"])

    meta = dict(word_len=word_len, n_pos_max=n_pos_max, v_pad=v_pad,
                f_pad=f_pad, p_pad=p_pad, proj_size=P, n_highways=L)
    return dict(A=A, col_add=col_add, th_w=th_w, th_b=th_b,
                proj_w=proj_w, proj_b=proj_b, meta=meta)


# ---------------------------------------------------------------------------
# Wrapper: pad tokens to the tile, call the kernel, slice real output back.
# ---------------------------------------------------------------------------
def char_embedding_forward(x_ids, packed, *, tile_n=256):
    meta = packed["meta"]
    W = meta["word_len"]
    p_pad, P = meta["p_pad"], meta["proj_size"]

    B, S, Wi = x_ids.shape
    assert Wi == W
    N = B * S

    ids = x_ids.reshape(N, W).astype(jnp.int32)
    tile = _round_up(min(tile_n, max(N, 8)), 8)
    Np = _round_up(N, tile)
    if Np != N:
        ids = jnp.pad(ids, ((0, Np - N), (0, 0)))

    kernel = make_kernel(word_len=W, n_pos_max=meta["n_pos_max"],
                         v_pad=meta["v_pad"], f_pad=meta["f_pad"],
                         n_highways=meta["n_highways"])

    weights = (packed["A"], packed["col_add"], packed["th_w"], packed["th_b"],
               packed["proj_w"], packed["proj_b"])
    in_specs = [pl.BlockSpec((tile, W), lambda i: (i, 0))]
    for w in weights:                       # whole-array, grid-resident weights
        in_specs.append(pl.BlockSpec(w.shape, lambda i, nd=w.ndim: (0,) * nd))

    out = pl.pallas_call(
        kernel,
        out_shape=jax.ShapeDtypeStruct((Np, p_pad), jnp.float32),
        grid=(Np // tile,),
        in_specs=in_specs,
        out_specs=pl.BlockSpec((tile, p_pad), lambda i: (i, 0)),
        compiler_params=pltpu.CompilerParams(
            dimension_semantics=("parallel",),
            vmem_limit_bytes=32 * 1024 * 1024),
    )(ids, *weights)

    return out[:N, :P].reshape(B, S, P)


# ---------------------------------------------------------------------------
# Deterministic parameter init (mirrors the PyTorch __init__ distributions)
# ---------------------------------------------------------------------------
def init_params(key, num_embeddings, embedding_dim, conv_filters, n_highways,
                projection_size):
    F = sum(f for _, f in conv_filters)
    n_keys = 1 + len(conv_filters) + 2 * n_highways + 1
    keys = iter(jax.random.split(key, n_keys))

    params = {}
    # nn.Embedding + uniform_(-1, 1) over the WHOLE table (padding row included,
    # matching the reference module, which re-inits after construction).
    params["emb"] = jax.random.uniform(
        next(keys), (num_embeddings, embedding_dim),
        minval=-1.0, maxval=1.0, dtype=jnp.float32)

    # Conv1d weights: torch shape (f, E, k), uniform(-0.05, 0.05); bias 0.
    # Stored for packing as (k, E, f) so each tap is an (E, f) matmul.
    conv_w, conv_b = [], []
    for (k, f) in conv_filters:
        w_torch = jax.random.uniform(
            next(keys), (f, embedding_dim, k),
            minval=-0.05, maxval=0.05, dtype=jnp.float32)
        conv_w.append(jnp.transpose(w_torch, (2, 1, 0)))      # (k, E, f)
        conv_b.append(jnp.zeros((1, f), jnp.float32))
    params["conv_w"], params["conv_b"] = conv_w, conv_b

    # Highway: T weight ~ N(0, sqrt(1/F)), T bias = -2 ; H weight same, H bias 0.
    # torch Linear weight is (out, in); stored transposed as (in, out).
    std = float(np.sqrt(1.0 / F))
    t_w, t_b, h_w, h_b = [], [], [], []
    for _ in range(n_highways):
        t_w.append(jnp.transpose(
            std * jax.random.normal(next(keys), (F, F), jnp.float32)))
        t_b.append(jnp.full((1, F), -2.0, jnp.float32))
        h_w.append(jnp.transpose(
            std * jax.random.normal(next(keys), (F, F), jnp.float32)))
        h_b.append(jnp.zeros((1, F), jnp.float32))
    params["t_w"], params["t_b"] = t_w, t_b
    params["h_w"], params["h_b"] = h_w, h_b

    # Projection: weight ~ N(0, sqrt(1/F)), bias 0. Stored as (F, P).
    params["proj_w"] = jnp.transpose(
        std * jax.random.normal(next(keys), (projection_size, F), jnp.float32))
    params["proj_b"] = jnp.zeros((1, projection_size), jnp.float32)
    return params


# ---------------------------------------------------------------------------
# Pure-JAX reference (unfused, unpadded) for a correctness check of the kernel
# ---------------------------------------------------------------------------
def reference_forward(x_ids, params, conv_filters, n_highways):
    B, S, W = x_ids.shape
    E = params["emb"].shape[1]
    e = jnp.take(params["emb"], x_ids.reshape(-1), axis=0).reshape(B * S, W, E)
    feats = []
    for ci, (k, f) in enumerate(conv_filters):
        w = params["conv_w"][ci]
        b = params["conv_b"][ci]
        pos = []
        for t in range(W - k + 1):
            s = sum(e[:, t + j, :] @ w[j] for j in range(k))
            pos.append(s)
        m = jnp.max(jnp.stack(pos, 0), axis=0) + b
        feats.append(jax.nn.relu(m))
    x = jnp.concatenate(feats, axis=-1)
    for l in range(n_highways):
        g = jax.nn.sigmoid(x @ params["t_w"][l] + params["t_b"][l])
        y = jax.nn.relu(x @ params["h_w"][l] + params["h_b"][l])
        x = g * y + (1.0 - g) * x
    out = x @ params["proj_w"] + params["proj_b"]
    return out.reshape(B, S, -1)


if __name__ == "__main__":
    # small, module-consistent shapes
    num_embeddings = 64
    embedding_dim = 16
    padding_idx = 0
    conv_filters = [(1, 8), (2, 16), (3, 32)]     # sum of filters F = 56
    n_highways = 2
    projection_size = 32

    batch_size, sentence_len, word_len = 2, 8, 8

    root = jax.random.PRNGKey(0)
    k_data, k_params = jax.random.split(root)

    x_ids = jax.random.randint(
        k_data, (batch_size, sentence_len, word_len),
        minval=0, maxval=num_embeddings, dtype=jnp.int32)

    params = init_params(k_params, num_embeddings, embedding_dim,
                         conv_filters, n_highways, projection_size)
    packed = pack_params(params, conv_filters, word_len)

    out = char_embedding_forward(x_ids, packed, tile_n=256)
    out = jax.block_until_ready(out)
    assert out.shape == (batch_size, sentence_len, projection_size)
    assert out.dtype == jnp.float32

    ref = jax.block_until_ready(
        reference_forward(x_ids, params, conv_filters, n_highways))
    np.testing.assert_allclose(np.asarray(out), np.asarray(ref),
                               rtol=2e-5, atol=2e-5)

    print("KERNEL_OK")
</pallas_src>

<mosaic_0001>
module attributes {stable_mosaic.version = 11 : i64} {
  func.func @kernel(%arg0: i32, %arg1: memref<16x8xi32, #tpu.memory_space<vmem>>, %arg2: memref<8x128x1024xf32, #tpu.memory_space<vmem>>, %arg3: memref<1x1024xf32, #tpu.memory_space<vmem>>, %arg4: memref<2x128x256xf32, #tpu.memory_space<vmem>>, %arg5: memref<2x1x256xf32, #tpu.memory_space<vmem>>, %arg6: memref<128x128xf32, #tpu.memory_space<vmem>>, %arg7: memref<1x128xf32, #tpu.memory_space<vmem>>, %arg8: memref<16x128xf32, #tpu.memory_space<vmem>>) attributes {dimension_semantics = [#tpu.dimension_semantics<parallel>], iteration_bounds = array<i64: 1>, scalar_prefetch = 0 : i64, scratch_operands = 0 : i64, tpu.core_type = #tpu.core_type<tc>, window_params = [{transform_indices = @transform_0, window_bounds = array<i64: 16, 8>}, {pipeline_mode = #tpu.pipeline_mode<synchronous>, transform_indices = @transform_1, window_bounds = array<i64: 8, 128, 1024>}, {pipeline_mode = #tpu.pipeline_mode<synchronous>, transform_indices = @transform_2, window_bounds = array<i64: 1, 1024>}, {pipeline_mode = #tpu.pipeline_mode<synchronous>, transform_indices = @transform_3, window_bounds = array<i64: 2, 128, 256>}, {pipeline_mode = #tpu.pipeline_mode<synchronous>, transform_indices = @transform_4, window_bounds = array<i64: 2, 1, 256>}, {pipeline_mode = #tpu.pipeline_mode<synchronous>, transform_indices = @transform_5, window_bounds = array<i64: 128, 128>}, {pipeline_mode = #tpu.pipeline_mode<synchronous>, transform_indices = @transform_6, window_bounds = array<i64: 1, 128>}, {transform_indices = @transform_7, window_bounds = array<i64: 16, 128>}]} {
    %c0 = arith.constant 0 : index
    %c0_0 = arith.constant 0 : index
    %0 = vector.load %arg1[%c0, %c0_0] : memref<16x8xi32, #tpu.memory_space<vmem>>, vector<16x8xi32>
    %1 = tpu.iota {dimensions = array<i32: 1>} : vector<16x128xi32>
    %2 = vector.extract_strided_slice %0 {offsets = [0, 0], sizes = [16, 1], strides = [1, 1]} : vector<16x8xi32> to vector<16x1xi32>
    %3 = vector.broadcast %2 : vector<16x1xi32> to vector<16x128xi32>
    %4 = arith.cmpi eq, %3, %1 : vector<16x128xi32>
    %cst = arith.constant 1.000000e+00 : f32
    %cst_1 = arith.constant 0.000000e+00 : f32
    %5 = vector.broadcast %cst : f32 to vector<16x128xf32>
    %6 = vector.broadcast %cst_1 : f32 to vector<16x128xf32>
    %7 = arith.select %4, %5, %6 : vector<16x128xi1>, vector<16x128xf32>
    %c0_2 = arith.constant 0 : index
    %c0_3 = arith.constant 0 : index
    %c0_4 = arith.constant 0 : index
    %8 = vector.load %arg2[%c0_2, %c0_3, %c0_4] : memref<8x128x1024xf32, #tpu.memory_space<vmem>>, vector<1x128x1024xf32>
    %9 = vector.shape_cast %8 : vector<1x128x1024xf32> to vector<128x1024xf32>
    %cst_5 = arith.constant dense<0.000000e+00> : vector<16x1024xf32>
    %10 = tpu.matmul %7, %9, %cst_5 {dimension_numbers = #tpu.dot_dimension_numbers<[1], [0], [0], [1], [0, 0, 1, 1], [], []>} : vector<16x128xf32>, vector<128x1024xf32>, vector<16x1024xf32> -> vector<16x1024xf32>
    %11 = vector.extract_strided_slice %0 {offsets = [0, 1], sizes = [16, 1], strides = [1, 1]} : vector<16x8xi32> to vector<16x1xi32>
    %12 = vector.broadcast %11 : vector<16x1xi32> to vector<16x128xi32>
    %13 = arith.cmpi eq, %12, %1 : vector<16x128xi32>
    %cst_6 = arith.constant 1.000000e+00 : f32
    %cst_7 = arith.constant 0.000000e+00 : f32
    %14 = vector.broadcast %cst_6 : f32 to vector<16x128xf32>
    %15 = vector.broadcast %cst_7 : f32 to vector<16x128xf32>
    %16 = arith.select %13, %14, %15 : vector<16x128xi1>, vector<16x128xf32>
    %c1 = arith.constant 1 : index
    %c0_8 = arith.constant 0 : index
    %c0_9 = arith.constant 0 : index
    %17 = vector.load %arg2[%c1, %c0_8, %c0_9] : memref<8x128x1024xf32, #tpu.memory_space<vmem>>, vector<1x128x1024xf32>
    %18 = vector.shape_cast %17 : vector<1x128x1024xf32> to vector<128x1024xf32>
    %cst_10 = arith.constant dense<0.000000e+00> : vector<16x1024xf32>
    %19 = tpu.matmul %16, %18, %cst_10 {dimension_numbers = #tpu.dot_dimension_numbers<[1], [0], [0], [1], [0, 0, 1, 1], [], []>} : vector<16x128xf32>, vector<128x1024xf32>, vector<16x1024xf32> -> vector<16x1024xf32>
    %20 = arith.addf %10, %19 : vector<16x1024xf32>
    %21 = vector.extract_strided_slice %0 {offsets = [0, 2], sizes = [16, 1], strides = [1, 1]} : vector<16x8xi32> to vector<16x1xi32>
    %22 = vector.broadcast %21 : vector<16x1xi32> to vector<16x128xi32>
    %23 = arith.cmpi eq, %22, %1 : vector<16x128xi32>
    %cst_11 = arith.constant 1.000000e+00 : f32
    %cst_12 = arith.constant 0.000000e+00 : f32
    %24 = vector.broadcast %cst_11 : f32 to vector<16x128xf32>
    %25 = vector.broadcast %cst_12 : f32 to vector<16x128xf32>
    %26 = arith.select %23, %24, %25 : vector<16x128xi1>, vector<16x128xf32>
    %c2 = arith.constant 2 : index
    %c0_13 = arith.constant 0 : index
    %c0_14 = arith.constant 0 : index
    %27 = vector.load %arg2[%c2, %c0_13, %c0_14] : memref<8x128x1024xf32, #tpu.memory_space<vmem>>, vector<1x128x1024xf32>
    %28 = vector.shape_cast %27 : vector<1x128x1024xf32> to vector<128x1024xf32>
    %cst_15 = arith.constant dense<0.000000e+00> : vector<16x1024xf32>
    %29 = tpu.matmul %26, %28, %cst_15 {dimension_numbers = #tpu.dot_dimension_numbers<[1], [0], [0], [1], [0, 0, 1, 1], [], []>} : vector<16x128xf32>, vector<128x1024xf32>, vector<16x1024xf32> -> vector<16x1024xf32>
    %30 = arith.addf %20, %29 : vector<16x1024xf32>
    %31 = vector.extract_strided_slice %0 {offsets = [0, 3], sizes = [16, 1], strides = [1, 1]} : vector<16x8xi32> to vector<16x1xi32>
    %32 = vector.broadcast %31 : vector<16x1xi32> to vector<16x128xi32>
    %33 = arith.cmpi eq, %32, %1 : vector<16x128xi32>
    %cst_16 = arith.constant 1.000000e+00 : f32
    %cst_17 = arith.constant 0.000000e+00 : f32
    %34 = vector.broadcast %cst_16 : f32 to vector<16x128xf32>
    %35 = vector.broadcast %cst_17 : f32 to vector<16x128xf32>
    %36 = arith.select %33, %34, %35 : vector<16x128xi1>, vector<16x128xf32>
    %c3 = arith.constant 3 : index
    %c0_18 = arith.constant 0 : index
    %c0_19 = arith.constant 0 : index
    %37 = vector.load %arg2[%c3, %c0_18, %c0_19] : memref<8x128x1024xf32, #tpu.memory_space<vmem>>, vector<1x128x1024xf32>
    %38 = vector.shape_cast %37 : vector<1x128x1024xf32> to vector<128x1024xf32>
    %cst_20 = arith.constant dense<0.000000e+00> : vector<16x1024xf32>
    %39 = tpu.matmul %36, %38, %cst_20 {dimension_numbers = #tpu.dot_dimension_numbers<[1], [0], [0], [1], [0, 0, 1, 1], [], []>} : vector<16x128xf32>, vector<128x1024xf32>, vector<16x1024xf32> -> vector<16x1024xf32>
    %40 = arith.addf %30, %39 : vector<16x1024xf32>
    %41 = vector.extract_strided_slice %0 {offsets = [0, 4], sizes = [16, 1], strides = [1, 1]} : vector<16x8xi32> to vector<16x1xi32>
    %42 = vector.broadcast %41 : vector<16x1xi32> to vector<16x128xi32>
    %43 = arith.cmpi eq, %42, %1 : vector<16x128xi32>
    %cst_21 = arith.constant 1.000000e+00 : f32
    %cst_22 = arith.constant 0.000000e+00 : f32
    %44 = vector.broadcast %cst_21 : f32 to vector<16x128xf32>
    %45 = vector.broadcast %cst_22 : f32 to vector<16x128xf32>
    %46 = arith.select %43, %44, %45 : vector<16x128xi1>, vector<16x128xf32>
    %c4 = arith.constant 4 : index
    %c0_23 = arith.constant 0 : index
    %c0_24 = arith.constant 0 : index
    %47 = vector.load %arg2[%c4, %c0_23, %c0_24] : memref<8x128x1024xf32, #tpu.memory_space<vmem>>, vector<1x128x1024xf32>
    %48 = vector.shape_cast %47 : vector<1x128x1024xf32> to vector<128x1024xf32>
    %cst_25 = arith.constant dense<0.000000e+00> : vector<16x1024xf32>
    %49 = tpu.matmul %46, %48, %cst_25 {dimension_numbers = #tpu.dot_dimension_numbers<[1], [0], [0], [1], [0, 0, 1, 1], [], []>} : vector<16x128xf32>, vector<128x1024xf32>, vector<16x1024xf32> -> vector<16x1024xf32>
    %50 = arith.addf %40, %49 : vector<16x1024xf32>
    %51 = vector.extract_strided_slice %0 {offsets = [0, 5], sizes = [16, 1], strides = [1, 1]} : vector<16x8xi32> to vector<16x1xi32>
    %52 = vector.broadcast %51 : vector<16x1xi32> to vector<16x128xi32>
    %53 = arith.cmpi eq, %52, %1 : vector<16x128xi32>
    %cst_26 = arith.constant 1.000000e+00 : f32
    %cst_27 = arith.constant 0.000000e+00 : f32
    %54 = vector.broadcast %cst_26 : f32 to vector<16x128xf32>
    %55 = vector.broadcast %cst_27 : f32 to vector<16x128xf32>
    %56 = arith.select %53, %54, %55 : vector<16x128xi1>, vector<16x128xf32>
    %c5 = arith.constant 5 : index
    %c0_28 = arith.constant 0 : index
    %c0_29 = arith.constant 0 : index
    %57 = vector.load %arg2[%c5, %c0_28, %c0_29] : memref<8x128x1024xf32, #tpu.memory_space<vmem>>, vector<1x128x1024xf32>
    %58 = vector.shape_cast %57 : vector<1x128x1024xf32> to vector<128x1024xf32>
    %cst_30 = arith.constant dense<0.000000e+00> : vector<16x1024xf32>
    %59 = tpu.matmul %56, %58, %cst_30 {dimension_numbers = #tpu.dot_dimension_numbers<[1], [0], [0], [1], [0, 0, 1, 1], [], []>} : vector<16x128xf32>, vector<128x1024xf32>, vector<16x1024xf32> -> vector<16x1024xf32>
    %60 = arith.addf %50, %59 : vector<16x1024xf32>
    %61 = vector.extract_strided_slice %0 {offsets = [0, 6], sizes = [16, 1], strides = [1, 1]} : vector<16x8xi32> to vector<16x1xi32>
    %62 = vector.broadcast %61 : vector<16x1xi32> to vector<16x128xi32>
    %63 = arith.cmpi eq, %62, %1 : vector<16x128xi32>
    %cst_31 = arith.constant 1.000000e+00 : f32
    %cst_32 = arith.constant 0.000000e+00 : f32
    %64 = vector.broadcast %cst_31 : f32 to vector<16x128xf32>
    %65 = vector.broadcast %cst_32 : f32 to vector<16x128xf32>
    %66 = arith.select %63, %64, %65 : vector<16x128xi1>, vector<16x128xf32>
    %c6 = arith.constant 6 : index
    %c0_33 = arith.constant 0 : index
    %c0_34 = arith.constant 0 : index
    %67 = vector.load %arg2[%c6, %c0_33, %c0_34] : memref<8x128x1024xf32, #tpu.memory_space<vmem>>, vector<1x128x1024xf32>
    %68 = vector.shape_cast %67 : vector<1x128x1024xf32> to vector<128x1024xf32>
    %cst_35 = arith.constant dense<0.000000e+00> : vector<16x1024xf32>
    %69 = tpu.matmul %66, %68, %cst_35 {dimension_numbers = #tpu.dot_dimension_numbers<[1], [0], [0], [1], [0, 0, 1, 1], [], []>} : vector<16x128xf32>, vector<128x1024xf32>, vector<16x1024xf32> -> vector<16x1024xf32>
    %70 = arith.addf %60, %69 : vector<16x1024xf32>
    %71 = vector.extract_strided_slice %0 {offsets = [0, 7], sizes = [16, 1], strides = [1, 1]} : vector<16x8xi32> to vector<16x1xi32>
    %72 = vector.broadcast %71 : vector<16x1xi32> to vector<16x128xi32>
    %73 = arith.cmpi eq, %72, %1 : vector<16x128xi32>
    %cst_36 = arith.constant 1.000000e+00 : f32
    %cst_37 = arith.constant 0.000000e+00 : f32
    %74 = vector.broadcast %cst_36 : f32 to vector<16x128xf32>
    %75 = vector.broadcast %cst_37 : f32 to vector<16x128xf32>
    %76 = arith.select %73, %74, %75 : vector<16x128xi1>, vector<16x128xf32>
    %c7 = arith.constant 7 : index
    %c0_38 = arith.constant 0 : index
    %c0_39 = arith.constant 0 : index
    %77 = vector.load %arg2[%c7, %c0_38, %c0_39] : memref<8x128x1024xf32, #tpu.memory_space<vmem>>, vector<1x128x1024xf32>
    %78 = vector.shape_cast %77 : vector<1x128x1024xf32> to vector<128x1024xf32>
    %cst_40 = arith.constant dense<0.000000e+00> : vector<16x1024xf32>
    %79 = tpu.matmul %76, %78, %cst_40 {dimension_numbers = #tpu.dot_dimension_numbers<[1], [0], [0], [1], [0, 0, 1, 1], [], []>} : vector<16x128xf32>, vector<128x1024xf32>, vector<16x1024xf32> -> vector<16x1024xf32>
    %80 = arith.addf %70, %79 : vector<16x1024xf32>
    %c0_41 = arith.constant 0 : index
    %c0_42 = arith.constant 0 : index
    %81 = vector.load %arg3[%c0_41, %c0_42] : memref<1x1024xf32, #tpu.memory_space<vmem>>, vector<1x1024xf32>
    %82 = vector.broadcast %81 : vector<1x1024xf32> to vector<16x1024xf32>
    %83 = arith.addf %80, %82 : vector<16x1024xf32>
    %84 = vector.extract_strided_slice %83 {offsets = [0, 0], sizes = [16, 128], strides = [1, 1]} : vector<16x1024xf32> to vector<16x128xf32>
    %85 = vector.extract_strided_slice %83 {offsets = [0, 128], sizes = [16, 128], strides = [1, 1]} : vector<16x1024xf32> to vector<16x128xf32>
    %86 = arith.maximumf %84, %85 : vector<16x128xf32>
    %87 = vector.extract_strided_slice %83 {offsets = [0, 256], sizes = [16, 128], strides = [1, 1]} : vector<16x1024xf32> to vector<16x128xf32>
    %88 = arith.maximumf %86, %87 : vector<16x128xf32>
    %89 = vector.extract_strided_slice %83 {offsets = [0, 384], sizes = [16, 128], strides = [1, 1]} : vector<16x1024xf32> to vector<16x128xf32>
    %90 = arith.maximumf %88, %89 : vector<16x128xf32>
    %91 = vector.extract_strided_slice %83 {offsets = [0, 512], sizes = [16, 128], strides = [1, 1]} : vector<16x1024xf32> to vector<16x128xf32>
    %92 = arith.maximumf %90, %91 : vector<16x128xf32>
    %93 = vector.extract_strided_slice %83 {offsets = [0, 640], sizes = [16, 128], strides = [1, 1]} : vector<16x1024xf32> to vector<16x128xf32>
    %94 = arith.maximumf %92, %93 : vector<16x128xf32>
    %95 = vector.extract_strided_slice %83 {offsets = [0, 768], sizes = [16, 128], strides = [1, 1]} : vector<16x1024xf32> to vector<16x128xf32>
    %96 = arith.maximumf %94, %95 : vector<16x128xf32>
    %97 = vector.extract_strided_slice %83 {offsets = [0, 896], sizes = [16, 128], strides = [1, 1]} : vector<16x1024xf32> to vector<16x128xf32>
    %98 = arith.maximumf %96, %97 : vector<16x128xf32>
    %cst_43 = arith.constant 0.000000e+00 : f32
    %99 = vector.broadcast %cst_43 : f32 to vector<16x128xf32>
    %100 = arith.maximumf %98, %99 : vector<16x128xf32>
    %c0_44 = arith.constant 0 : index
    %c0_45 = arith.constant 0 : index
    %c0_46 = arith.constant 0 : index
    %101 = vector.load %arg4[%c0_44, %c0_45, %c0_46] : memref<2x128x256xf32, #tpu.memory_space<vmem>>, vector<1x128x256xf32>
    %102 = vector.shape_cast %101 : vector<1x128x256xf32> to vector<128x256xf32>
    %cst_47 = arith.constant dense<0.000000e+00> : vector<16x256xf32>
    %103 = tpu.matmul %100, %102, %cst_47 {dimension_numbers = #tpu.dot_dimension_numbers<[1], [0], [0], [1], [0, 0, 1, 1], [], []>} : vector<16x128xf32>, vector<128x256xf32>, vector<16x256xf32> -> vector<16x256xf32>
    %c0_48 = arith.constant 0 : index
    %c0_49 = arith.constant 0 : index
    %c0_50 = arith.constant 0 : index
    %104 = vector.load %arg5[%c0_48, %c0_49, %c0_50] : memref<2x1x256xf32, #tpu.memory_space<vmem>>, vector<1x1x256xf32>
    %105 = vector.shape_cast %104 : vector<1x1x256xf32> to vector<1x256xf32>
    %106 = vector.broadcast %105 : vector<1x256xf32> to vector<16x256xf32>
    %107 = arith.addf %103, %106 : vector<16x256xf32>
    %108 = vector.extract_strided_slice %107 {offsets = [0, 0], sizes = [16, 128], strides = [1, 1]} : vector<16x256xf32> to vector<16x128xf32>
    %109 = arith.negf %108 : vector<16x128xf32>
    %110 = math.exp %109 : vector<16x128xf32>
    %cst_51 = arith.constant 1.000000e+00 : f32
    %111 = vector.broadcast %cst_51 : f32 to vector<16x128xf32>
    %112 = arith.addf %111, %110 : vector<16x128xf32>
    %113 = arith.divf %111, %112 : vector<16x128xf32>
    %114 = vector.extract_strided_slice %107 {offsets = [0, 128], sizes = [16, 128], strides = [1, 1]} : vector<16x256xf32> to vector<16x128xf32>
    %cst_52 = arith.constant 0.000000e+00 : f32
    %115 = vector.broadcast %cst_52 : f32 to vector<16x128xf32>
    %116 = arith.maximumf %114, %115 : vector<16x128xf32>
    %117 = arith.mulf %113, %116 : vector<16x128xf32>
    %cst_53 = arith.constant 1.000000e+00 : f32
    %118 = vector.broadcast %cst_53 : f32 to vector<16x128xf32>
    %119 = arith.subf %118, %113 : vector<16x128xf32>
    %120 = arith.mulf %119, %100 : vector<16x128xf32>
    %121 = arith.addf %117, %120 : vector<16x128xf32>
    %c1_54 = arith.constant 1 : index
    %c0_55 = arith.constant 0 : index
    %c0_56 = arith.constant 0 : index
    %122 = vector.load %arg4[%c1_54, %c0_55, %c0_56] : memref<2x128x256xf32, #tpu.memory_space<vmem>>, vector<1x128x256xf32>
    %123 = vector.shape_cast %122 : vector<1x128x256xf32> to vector<128x256xf32>
    %cst_57 = arith.constant dense<0.000000e+00> : vector<16x256xf32>
    %124 = tpu.matmul %121, %123, %cst_57 {dimension_numbers = #tpu.dot_dimension_numbers<[1], [0], [0], [1], [0, 0, 1, 1], [], []>} : vector<16x128xf32>, vector<128x256xf32>, vector<16x256xf32> -> vector<16x256xf32>
    %c1_58 = arith.constant 1 : index
    %c0_59 = arith.constant 0 : index
    %c0_60 = arith.constant 0 : index
    %125 = vector.load %arg5[%c1_58, %c0_59, %c0_60] : memref<2x1x256xf32, #tpu.memory_space<vmem>>, vector<1x1x256xf32>
    %126 = vector.shape_cast %125 : vector<1x1x256xf32> to vector<1x256xf32>
    %127 = vector.broadcast %126 : vector<1x256xf32> to vector<16x256xf32>
    %128 = arith.addf %124, %127 : vector<16x256xf32>
    %129 = vector.extract_strided_slice %128 {offsets = [0, 0], sizes = [16, 128], strides = [1, 1]} : vector<16x256xf32> to vector<16x128xf32>
    %130 = arith.negf %129 : vector<16x128xf32>
    %131 = math.exp %130 : vector<16x128xf32>
    %cst_61 = arith.constant 1.000000e+00 : f32
    %132 = vector.broadcast %cst_61 : f32 to vector<16x128xf32>
    %133 = arith.addf %132, %131 : vector<16x128xf32>
    %134 = arith.divf %132, %133 : vector<16x128xf32>
    %135 = vector.extract_strided_slice %128 {offsets = [0, 128], sizes = [16, 128], strides = [1, 1]} : vector<16x256xf32> to vector<16x128xf32>
    %cst_62 = arith.constant 0.000000e+00 : f32
    %136 = vector.broadcast %cst_62 : f32 to vector<16x128xf32>
    %137 = arith.maximumf %135, %136 : vector<16x128xf32>
    %138 = arith.mulf %134, %137 : vector<16x128xf32>
    %cst_63 = arith.constant 1.000000e+00 : f32
    %139 = vector.broadcast %cst_63 : f32 to vector<16x128xf32>
    %140 = arith.subf %139, %134 : vector<16x128xf32>
    %141 = arith.mulf %140, %121 : vector<16x128xf32>
    %142 = arith.addf %138, %141 : vector<16x128xf32>
    %c0_64 = arith.constant 0 : index
    %c0_65 = arith.constant 0 : index
    %143 = vector.load %arg6[%c0_64, %c0_65] : memref<128x128xf32, #tpu.memory_space<vmem>>, vector<128x128xf32>
    %cst_66 = arith.constant dense<0.000000e+00> : vector<16x128xf32>
    %144 = tpu.matmul %142, %143, %cst_66 {dimension_numbers = #tpu.dot_dimension_numbers<[1], [0], [0], [1], [0, 0, 1, 1], [], []>} : vector<16x128xf32>, vector<128x128xf32>, vector<16x128xf32> -> vector<16x128xf32>
    %c0_67 = arith.constant 0 : index
    %c0_68 = arith.constant 0 : index
    %145 = vector.load %arg7[%c0_67, %c0_68] : memref<1x128xf32, #tpu.memory_space<vmem>>, vector<1x128xf32>
    %146 = vector.broadcast %145 : vector<1x128xf32> to vector<16x128xf32>
    %147 = arith.addf %144, %146 : vector<16x128xf32>
    %c0_69 = arith.constant 0 : index
    %c0_70 = arith.constant 0 : index
    %148 = vector.load %arg8[%c0_69, %c0_70] : memref<16x128xf32, #tpu.memory_space<vmem>>, vector<16x128xf32>
    tpu.vector_store %arg8[%c0_69, %c0_70], %147 {strides = array<i32>} : memref<16x128xf32, #tpu.memory_space<vmem>>, vector<16x128xf32>,
    return
  }
  func.func @transform_0(%arg0: i32) -> (i32, i32) {
    %c0_i32 = arith.constant 0 : i32
    %c0_i32_0 = arith.constant 0 : i32
    return %arg0, %c0_i32 : i32, i32
  }
  func.func @transform_1(%arg0: i32) -> (i32, i32, i32) {
    %c0_i32 = arith.constant 0 : i32
    %c0_i32_0 = arith.constant 0 : i32
    %c0_i32_1 = arith.constant 0 : i32
    %c0_i32_2 = arith.constant 0 : i32
    return %c0_i32, %c0_i32_0, %c0_i32_1 : i32, i32, i32
  }
  func.func @transform_2(%arg0: i32) -> (i32, i32) {
    %c0_i32 = arith.constant 0 : i32
    %c0_i32_0 = arith.constant 0 : i32
    %c0_i32_1 = arith.constant 0 : i32
    return %c0_i32, %c0_i32_0 : i32, i32
  }
  func.func @transform_3(%arg0: i32) -> (i32, i32, i32) {
    %c0_i32 = arith.constant 0 : i32
    %c0_i32_0 = arith.constant 0 : i32
    %c0_i32_1 = arith.constant 0 : i32
    %c0_i32_2 = arith.constant 0 : i32
    return %c0_i32, %c0_i32_0, %c0_i32_1 : i32, i32, i32
  }
  func.func @transform_4(%arg0: i32) -> (i32, i32, i32) {
    %c0_i32 = arith.constant 0 : i32
    %c0_i32_0 = arith.constant 0 : i32
    %c0_i32_1 = arith.constant 0 : i32
    %c0_i32_2 = arith.constant 0 : i32
    return %c0_i32, %c0_i32_0, %c0_i32_1 : i32, i32, i32
  }
  func.func @transform_5(%arg0: i32) -> (i32, i32) {
    %c0_i32 = arith.constant 0 : i32
    %c0_i32_0 = arith.constant 0 : i32
    %c0_i32_1 = arith.constant 0 : i32
    return %c0_i32, %c0_i32_0 : i32, i32
  }
  func.func @transform_6(%arg0: i32) -> (i32, i32) {
    %c0_i32 = arith.constant 0 : i32
    %c0_i32_0 = arith.constant 0 : i32
    %c0_i32_1 = arith.constant 0 : i32
    return %c0_i32, %c0_i32_0 : i32, i32
  }
  func.func @transform_7(%arg0: i32) -> (i32, i32) {
    %c0_i32 = arith.constant 0 : i32
    %c0_i32_0 = arith.constant 0 : i32
    return %arg0, %c0_i32 : i32, i32
  }
}

</mosaic_0001>

<bundles_post_ra>
// kernel: tpu_custom_call.1
= control target key start
LH: loop header
LB: loop body
LE: loop exit
PB: predicated region body
PF: predicated region fallthrough
CT: control target
= control target key end

     0   :  { %12 = vsyncpa [#allocation3], 0  ;;  %s6452_s0 = inlined_call_operand.vmem [shape: s32[16,8], index: 0, kind: input, shape index: {}]   ;;  %s6453_s1 = inlined_call_operand.hbm [shape: f32[8,128,1024], index: 1, kind: input, shape index: {}]   ;;  %s6454_s2 = inlined_call_operand.hbm [shape: f32[1,1024], index: 2, kind: input, shape index: {}]   ;;  %s6455_s3 = inlined_call_operand.hbm [shape: f32[2,128,256], index: 3, kind: input, shape index: {}]   ;;  %s6456_s4 = inlined_call_operand.hbm [shape: f32[2,1,256], index: 4, kind: input, shape index: {}]   ;;  %s6457_s5 = inlined_call_operand.hbm [shape: f32[128,128], index: 5, kind: input, shape index: {}]   ;;  %s6458_s6 = inlined_call_operand.hbm [shape: f32[1,128], index: 6, kind: input, shape index: {}]   ;;  %s6459_s7 = inlined_call_operand.hbm [shape: f32[16,128], index: 7, kind: output, shape index: {}]  }
   0x1   :  { %13 = vsyncpa [#allocation6], 0 }
   0x2   :  { %14 = vsyncpa [#allocation9], 0 }
   0x3   :  { %15 = vsyncpa [#allocation12], 0 }
   0x4   :  { %16 = vsyncpa [#allocation4], 0  ;;  %s5836_s24 = smov [#allocation5]   ;;  %s5837_s26 = smov [#allocation8]  }
   0x5   :  { %s37_s25 = sshll.u32 %s5836_s24, 4  ;;  %s58_s27 = sshll.u32 %s5837_s26, 4  ;;  %s38_s25 = int_to_ptr.vmem [resolvable:$true] %s37_s25  ;;  %s5901_s27 = int_to_ptr.vmem [resolvable:$true] %s58_s27 }
   0x6   :  { %s5672_s30 = scalar_lea.hbm %s6454_s2, 128 }
   0x7   :  { %p5673_p0 = scmp.ne.s32.totalorder %s6454_s2, %s5672_s30  ;;  %p5676_p1 = scmp.lt.u32.totalorder %s5672_s30, %s6454_s2 }
   0x9   :  { %p5678_p2 = pnand %p5676_p1, %p5673_p0 }
   0xb   :  { %5681 = shalt.err (!%p5678_p2)
}
   0xc   :  { %s5682_s12 = scalar_lea.vmem %s38_s25, 128  ;;  %p5687_p4 = scmp.lt.s32.totalorder %s38_s25, %s38_s25 }
   0xd   :  { %p5683_p3 = scmp.ne.s32.totalorder %s38_s25, %s5682_s12  ;;  %p5688_p5 = scmp.lt.s32.totalorder %s5682_s12, %s5682_s12 }
   0xf   :  { %p5689_p6 = por %p5688_p5, %p5687_p4 }
  0x11   :  { %p5690_p7 = pnand %p5689_p6, %p5683_p3 }
  0x13   :  { %5693 = shalt.err (!%p5690_p7)
}
  0x14   :  { %40 = dma.hbm_to_vmem [thread:$0]  %s6454_s2, 128, %s38_s25, [#allocation6]  }
  0x15   :  { %s5694_s17 = scalar_lea.hbm %s6456_s4, 64 }
  0x16   :  { %p5695_p8 = scmp.ne.s32.totalorder %s6456_s4, %s5694_s17  ;;  %p5698_p9 = scmp.lt.u32.totalorder %s5694_s17, %s6456_s4 }
  0x18   :  { %p5700_p10 = pnand %p5698_p9, %p5695_p8 }
  0x1a   :  { %5703 = shalt.err (!%p5700_p10)
}
  0x1b   :  { %s5704_s22 = scalar_lea.vmem %s5901_s27, 64  ;;  %p5709_p12 = scmp.lt.s32.totalorder %s5901_s27, %s5901_s27 }
  0x1c   :  { %p5705_p11 = scmp.ne.s32.totalorder %s5901_s27, %s5704_s22  ;;  %p5710_p13 = scmp.lt.s32.totalorder %s5704_s22, %s5704_s22 }
  0x1e   :  { %p5711_p0 = por %p5710_p13, %p5709_p12 }
  0x20   :  { %p5712_p1 = pnand %p5711_p0, %p5705_p11 }
  0x22   :  { %5715 = shalt.err (!%p5712_p1)
}
  0x23   :  { %s5838_s2 = smov 32   ;;  %s5839_s23 = smov 2  }
  0x24   :  { %64 = dma.hbm_to_vmem [thread:$0]  %s6456_s4, 64, %s5901_s27, [#allocation9], %s5838_s2, %s5838_s2, %s5839_s23  }
  0x25   :  { %s5840_s26 = smov [#allocation2]   ;;  %s5716_s8 = scalar_lea.hbm %s6453_s1, 131072 }
  0x26   :  { %s24_s28 = sshll.u32 %s5840_s26, 4  ;;  %p5717_p2 = scmp.ne.s32.totalorder %s6453_s1, %s5716_s8  ;;  %s25_s28 = int_to_ptr.vmem [resolvable:$true] %s24_s28 }
  0x27   :  { %p5720_p3 = scmp.lt.u32.totalorder %s5716_s8, %s6453_s1 }
  0x29   :  { %p5722_p4 = pnand %p5720_p3, %p5717_p2 }
  0x2b   :  { %5725 = shalt.err (!%p5722_p4)
}
  0x2c   :  { %s5726_s13 = scalar_lea.vmem %s25_s28, 131072  ;;  %p5731_p6 = scmp.lt.s32.totalorder %s25_s28, %s25_s28 }
  0x2d   :  { %p5727_p5 = scmp.ne.s32.totalorder %s25_s28, %s5726_s13  ;;  %p5732_p7 = scmp.lt.s32.totalorder %s5726_s13, %s5726_s13 }
  0x2f   :  { %p5733_p8 = por %p5732_p7, %p5731_p6 }
  0x31   :  { %p5734_p9 = pnand %p5733_p8, %p5727_p5 }
  0x33   :  { %5737 = shalt.err (!%p5734_p9)
}
  0x34   :  { %s5841_s4 = smov 1024   ;;  %s5842_s27 = smov 64  }
  0x35   :  { %30 = dma.hbm_to_vmem [thread:$0]  %s6453_s1, 131072, %s25_s28, [#allocation3], %s5841_s4, %s5841_s4, %s5842_s27  }
  0x36   :  { %s5843_s16 = smov [#allocation7]   ;;  %s5738_s20 = scalar_lea.hbm %s6455_s3, 8192 }
  0x37   :  { %s46_s17 = sshll.u32 %s5843_s16, 4  ;;  %p5739_p10 = scmp.ne.s32.totalorder %s6455_s3, %s5738_s20  ;;  %s47_s17 = int_to_ptr.vmem [resolvable:$true] %s46_s17 }
  0x38   :  { %p5742_p11 = scmp.lt.u32.totalorder %s5738_s20, %s6455_s3 }
  0x3a   :  { %p5744_p12 = pnand %p5742_p11, %p5739_p10 }
  0x3c   :  { %5747 = shalt.err (!%p5744_p12)
}
  0x3d   :  { %s5748_s24 = scalar_lea.vmem %s47_s17, 8192  ;;  %p5753_p0 = scmp.lt.s32.totalorder %s47_s17, %s47_s17 }
  0x3e   :  { %p5749_p13 = scmp.ne.s32.totalorder %s47_s17, %s5748_s24  ;;  %p5754_p1 = scmp.lt.s32.totalorder %s5748_s24, %s5748_s24 }
  0x40   :  { %p5755_p2 = por %p5754_p1, %p5753_p0 }
  0x42   :  { %p5756_p3 = pnand %p5755_p2, %p5749_p13 }
  0x44   :  { %5759 = shalt.err (!%p5756_p3)
}
  0x45   :  { %s5844_s1 = smov 256   ;;  %s5845_s25 = smov 16  }
  0x46   :  { %52 = dma.hbm_to_vmem [thread:$0]  %s6455_s3, 8192, %s47_s17, [#allocation6], %s5844_s1, %s5844_s1, %s5845_s25  }
  0x47   :  { %s5846_s29 = smov [#allocation10]   ;;  %s5760_s10 = scalar_lea.hbm %s6457_s5, 2048 }
  0x48   :  { %s70_s30 = sshll.u32 %s5846_s29, 4  ;;  %p5761_p4 = scmp.ne.s32.totalorder %s6457_s5, %s5760_s10  ;;  %s71_s30 = int_to_ptr.vmem [resolvable:$true] %s70_s30 }
  0x49   :  { %p5764_p5 = scmp.lt.u32.totalorder %s5760_s10, %s6457_s5 }
  0x4b   :  { %p5766_p6 = pnand %p5764_p5, %p5761_p4 }
  0x4d   :  { %5769 = shalt.err (!%p5766_p6)
}
  0x4e   :  { %s5770_s27 = scalar_lea.vmem %s71_s30, 2048  ;;  %p5775_p8 = scmp.lt.s32.totalorder %s71_s30, %s71_s30 }
  0x4f   :  { %p5771_p7 = scmp.ne.s32.totalorder %s71_s30, %s5770_s27  ;;  %p5776_p9 = scmp.lt.s32.totalorder %s5770_s27, %s5770_s27 }
  0x51   :  { %p5777_p10 = por %p5776_p9, %p5775_p8 }
  0x53   :  { %p5778_p11 = pnand %p5777_p10, %p5771_p7 }
  0x55   :  { %5781 = shalt.err (!%p5778_p11)
}
  0x56   :  { %s5847_s3 = smov 128   ;;  %s5848_s14 = smov 8  }
  0x57   :  { %76 = dma.hbm_to_vmem [thread:$0]  %s6457_s5, 2048, %s71_s30, [#allocation9], %s5847_s3, %s5847_s3, %s5848_s14  }
  0x58   :  { %s5849_s17 = smov [#allocation11]   ;;  %s5782_s21 = scalar_lea.hbm %s6458_s6, 16 }
  0x59   :  { %s83_s18 = sshll.u32 %s5849_s17, 4  ;;  %p5783_p12 = scmp.ne.s32.totalorder %s6458_s6, %s5782_s21  ;;  %s84_s18 = int_to_ptr.vmem [resolvable:$true] %s83_s18 }
  0x5a   :  { %p5786_p13 = scmp.lt.u32.totalorder %s5782_s21, %s6458_s6 }
  0x5c   :  { %p5788_p0 = pnand %p5786_p13, %p5783_p12 }
  0x5e   :  { %5791 = shalt.err (!%p5788_p0)
}
  0x5f   :  { %s5792_s1 = scalar_lea.vmem %s84_s18, 16  ;;  %s5796_s5 = scalar_lea.vmem %s84_s18, 32 }
  0x60   :  { %p5793_p1 = scmp.ne.s32.totalorder %s84_s18, %s5792_s1  ;;  %p5797_p2 = scmp.lt.s32.totalorder %s84_s18, %s84_s18 }
  0x61   :  { %p5798_p3 = scmp.lt.s32.totalorder %s5796_s5, %s5792_s1 }
  0x63   :  { %p5799_p4 = por %p5798_p3, %p5797_p2 }
  0x65   :  { %p5800_p5 = pnand %p5799_p4, %p5793_p1 }
  0x67   :  { %5803 = shalt.err (!%p5800_p5)
}
  0x68   :  { %86 = dma.hbm_to_vmem [thread:$0]  %s6458_s6, 16, %s84_s18, [#allocation12]  }
  0x69   :  { %5826 = dma.done.wait [#allocation3], 131072  }
  0x6a   :  { %5827 = vsyncadd [#allocation3], 4294836224 }
  0x6b   :  { %5828 = dma.done.wait [#allocation6], 8320  }
  0x6c   :  { %5829 = vsyncadd [#allocation6], 4294958976 }
  0x6d   :  { %5830 = dma.done.wait [#allocation9], 2112  }
  0x6e   :  { %5831 = vsyncadd [#allocation9], 4294965184 }
  0x6f   :  { %5832 = dma.done.wait [#allocation12], 16  }
  0x70   :  { %5833 = vsyncadd [#allocation12], 4294967280  ;;  %v5850_v0 = vmov 1   ;;  %v5851_v1 = vmov 0   ;;  %v5986_v2 = vld [vmem:[%s6452_s0] sm:$0xff]  ;;  %v5991_v3 = vld [vmem:[%s6452_s0 + $0x8] sm:$0xff] }
  0x71   :  { %5641 = vset.pattern.permute.xlu0 %v5850_v0  ;;  %5642 = vset.pattern.permute.xlu1 %v5851_v1  ;;  %v259_v4 = vld [vmem:[#allocation2 + $0x408] sm:$0xff]  ;;  %v261_v6 = vld [vmem:[#allocation2 + $0x418] sm:$0xff]  ;;  %v258_v10 = vld [vmem:[#allocation2 + $0x400] sm:$0xff]  ;;  %v5852_v13 = vmov 0.0   ;;  %v5853_v43 = vmov 2  }
  0x72   :  { %248 = vperm.xlu0 %5641, %v5986_v2   ;;  %110 = vperm.xlu1 %5642, %v5986_v2   ;;  %v267_v5 = vld [vmem:[#allocation2 + $0x448] sm:$0xff]  ;;  %v269_v7 = vld [vmem:[#allocation2 + $0x458] sm:$0xff]  ;;  %v266_v11 = vld [vmem:[#allocation2 + $0x440] sm:$0xff] }
  0x73   :  { %v4384_v8 = vpack.c.bf16 %v267_v5, %v259_v4  ;;  %v4416_v9 = vpack.c.bf16 %v269_v7, %v261_v6  ;;  %v260_v12 = vld [vmem:[#allocation2 + $0x410] sm:$0xff]  ;;  %450 = vmatprep.mubr.f32.mxu0 %v5852_v13  ;;  %527 = vmatprep.mubr.f32.mxu1 %v5852_v13  ;;  %v4386_v14 = vpack.c.bf16 %v266_v11, %v258_v10  ;;  %v275_v16 = vld [vmem:[#allocation2 + $0x488] sm:$0xff]  ;;  %v277_v20 = vld [vmem:[#allocation2 + $0x498] sm:$0xff] }
  0x74   :  { %v268_v15 = vld [vmem:[#allocation2 + $0x450] sm:$0xff]  ;;  %v283_v17 = vld [vmem:[#allocation2 + $0x4c8] sm:$0xff]  ;;  %v285_v21 = vld [vmem:[#allocation2 + $0x4d8] sm:$0xff] }
  0x75   :  { %4385 = vmatprep.subr.bf16.mxu0 %v4384_v8  ;;  %4417 = vmatprep.subr.bf16.mxu1 %v4416_v9  ;;  %v4418_v18 = vpack.c.bf16 %v268_v15, %v260_v12  ;;  %v4388_v19 = vpack.c.bf16 %v283_v17, %v275_v16  ;;  %v274_v22 = vld [vmem:[#allocation2 + $0x480] sm:$0xff]  ;;  %v4420_v23 = vpack.c.bf16 %v285_v21, %v277_v20  ;;  %v276_v25 = vld [vmem:[#allocation2 + $0x490] sm:$0xff]  ;;  %v291_v29 = vld [vmem:[#allocation2 + $0x508] sm:$0xff] }
  0x76   :  { %251 = vperm.xlu0 %5641, %v5991_v3   ;;  %113 = vperm.xlu1 %5642, %v5991_v3   ;;  %v282_v24 = vld [vmem:[#allocation2 + $0x4c0] sm:$0xff]  ;;  %v284_v26 = vld [vmem:[#allocation2 + $0x4d0] sm:$0xff]  ;;  %v299_v30 = vld [vmem:[#allocation2 + $0x548] sm:$0xff] }
  0x77   :  { %4387 = vmatpush1.bf16.msra.mxu0 %v4386_v14  ;;  %4419 = vmatpush1.bf16.msra.mxu1 %v4418_v18  ;;  %v4390_v27 = vpack.c.bf16 %v282_v24, %v274_v22  ;;  %v4422_v28 = vpack.c.bf16 %v284_v26, %v276_v25  ;;  %v293_v31 = vld [vmem:[#allocation2 + $0x518] sm:$0xff]  ;;  %v4392_v32 = vpack.c.bf16 %v299_v30, %v291_v29  ;;  %v290_v34 = vld [vmem:[#allocation2 + $0x500] sm:$0xff]  ;;  %v292_v37 = vld [vmem:[#allocation2 + $0x510] sm:$0xff] }
  0x78   :  { %4389 = vmatprep.subr.bf16.mxu0 %v4388_v19  ;;  %4421 = vmatprep.subr.bf16.mxu1 %v4420_v23  ;;  %v301_v33 = vld [vmem:[#allocation2 + $0x558] sm:$0xff]  ;;  %v298_v35 = vld [vmem:[#allocation2 + $0x540] sm:$0xff]  ;;  %v300_v38 = vld [vmem:[#allocation2 + $0x550] sm:$0xff] }
  0x79   :  { %v4424_v36 = vpack.c.bf16 %v301_v33, %v293_v31  ;;  %v307_v39 = vld [vmem:[#allocation2 + $0x588] sm:$0xff]  ;;  %v309_v41 = vld [vmem:[#allocation2 + $0x598] sm:$0xff]  ;;  %v4394_v44 = vpack.c.bf16 %v298_v35, %v290_v34  ;;  %v4426_v45 = vpack.c.bf16 %v300_v38, %v292_v37  ;;  %v306_v46 = vld [vmem:[#allocation2 + $0x580] sm:$0xff] }
  0x7a   :  { %v315_v40 = vld [vmem:[#allocation2 + $0x5c8] sm:$0xff]  ;;  %v317_v42 = vld [vmem:[#allocation2 + $0x5d8] sm:$0xff]  ;;  %5643 = vset.pattern.permute.xlu0 %v5853_v43  ;;  %5644 = vset.pattern.permute.xlu1 %v5853_v43  ;;  %v314_v47 = vld [vmem:[#allocation2 + $0x5c0] sm:$0xff] }
  0x7b   :  { %4391 = vmatpush1.bf16.msra.mxu0 %v4390_v27  ;;  %4423 = vmatpush1.bf16.msra.mxu1 %v4422_v28  ;;  %v4396_v48 = vpack.c.bf16 %v315_v40, %v307_v39  ;;  %v4428_v49 = vpack.c.bf16 %v317_v42, %v309_v41  ;;  %v308_v50 = vld [vmem:[#allocation2 + $0x590] sm:$0xff]  ;;  %v323_v52 = vld [vmem:[#allocation2 + $0x608] sm:$0xff]  ;;  %v325_v54 = vld [vmem:[#allocation2 + $0x618] sm:$0xff]  ;;  %v4398_v56 = vpack.c.bf16 %v314_v47, %v306_v46  ;;  %v5854_v47 = vmov 3  }
  0x7c   :  { %4393 = vmatprep.subr.bf16.mxu0 %v4392_v32  ;;  %4425 = vmatprep.subr.bf16.mxu1 %v4424_v36  ;;  %v316_v51 = vld [vmem:[#allocation2 + $0x5d0] sm:$0xff]  ;;  %v331_v53 = vld [vmem:[#allocation2 + $0x648] sm:$0xff]  ;;  %v333_v55 = vld [vmem:[#allocation2 + $0x658] sm:$0xff] }
  0x7d   :  { %1003 = vperm.xlu0 %5643, %v5986_v2   ;;  %1006 = vperm.xlu1 %5644, %v5991_v3   ;;  %v4430_v57 = vpack.c.bf16 %v316_v51, %v308_v50  ;;  %v322_v58 = vld [vmem:[#allocation2 + $0x600] sm:$0xff]  ;;  %v4400_v60 = vpack.c.bf16 %v331_v53, %v323_v52  ;;  %v4432_v61 = vpack.c.bf16 %v333_v55, %v325_v54  ;;  %v324_v62 = vld [vmem:[#allocation2 + $0x610] sm:$0xff]  ;;  %v339_v0 = vld [vmem:[#allocation2 + $0x688] sm:$0xff]  ;;  %v5855_v53 = vmov 4  }
  0x7e   :  { %v330_v59 = vld [vmem:[#allocation2 + $0x640] sm:$0xff]  ;;  %v332_v63 = vld [vmem:[#allocation2 + $0x650] sm:$0xff]  ;;  %v347_v1 = vld [vmem:[#allocation2 + $0x6c8] sm:$0xff] }
  0x7f   :  { %4395 = vmatpush1.bf16.msra.mxu0 %v4394_v44  ;;  %4427 = vmatpush1.bf16.msra.mxu1 %v4426_v45  ;;  %v341_v4 = vld [vmem:[#allocation2 + $0x698] sm:$0xff]  ;;  %v4402_v6 = vpack.c.bf16 %v330_v59, %v322_v58  ;;  %v4434_v7 = vpack.c.bf16 %v332_v63, %v324_v62  ;;  %v338_v8 = vld [vmem:[#allocation2 + $0x680] sm:$0xff]  ;;  %v4404_v10 = vpack.c.bf16 %v347_v1, %v339_v0  ;;  %v340_v12 = vld [vmem:[#allocation2 + $0x690] sm:$0xff] }
  0x80   :  { %4397 = vmatprep.subr.bf16.mxu0 %v4396_v48  ;;  %4429 = vmatprep.subr.bf16.mxu1 %v4428_v49  ;;  %v349_v5 = vld [vmem:[#allocation2 + $0x6d8] sm:$0xff]  ;;  %v346_v9 = vld [vmem:[#allocation2 + $0x6c0] sm:$0xff]  ;;  %v348_v14 = vld [vmem:[#allocation2 + $0x6d0] sm:$0xff]  ;;  %v107_v48 = vlaneseq }
  0x81   :  { %v4436_v11 = vpack.c.bf16 %v349_v5, %v341_v4  ;;  %v355_v15 = vld [vmem:[#allocation2 + $0x708] sm:$0xff]  ;;  %v357_v17 = vld [vmem:[#allocation2 + $0x718] sm:$0xff]  ;;  %v4406_v19 = vpack.c.bf16 %v346_v9, %v338_v8  ;;  %v4438_v20 = vpack.c.bf16 %v348_v14, %v340_v12  ;;  %v354_v21 = vld [vmem:[#allocation2 + $0x700] sm:$0xff]  ;;  %5645 = vset.pattern.permute.xlu1 %v5854_v47  ;;  %5646 = vset.pattern.permute.xlu0 %v5854_v47 }
  0x82   :  { %v363_v16 = vld [vmem:[#allocation2 + $0x748] sm:$0xff]  ;;  %v365_v18 = vld [vmem:[#allocation2 + $0x758] sm:$0xff]  ;;  %v362_v22 = vld [vmem:[#allocation2 + $0x740] sm:$0xff]  ;;  %1466 = vperm.xlu1 %5645, %v5986_v2   ;;  %1469 = vperm.xlu0 %5646, %v5991_v3   ;;  %v6004_v54 = vand.u32 127, %v107_v48 }
  0x83   :  { %4399 = vmatpush1.bf16.msra.mxu0 %v4398_v56  ;;  %4431 = vmatpush1.bf16.msra.mxu1 %v4430_v57  ;;  %v4408_v23 = vpack.c.bf16 %v363_v16, %v355_v15  ;;  %v4440_v24 = vpack.c.bf16 %v365_v18, %v357_v17  ;;  %v356_v25 = vld [vmem:[#allocation2 + $0x710] sm:$0xff]  ;;  %v371_v27 = vld [vmem:[#allocation2 + $0x788] sm:$0xff]  ;;  %v373_v29 = vld [vmem:[#allocation2 + $0x798] sm:$0xff]  ;;  %v4410_v31 = vpack.c.bf16 %v362_v22, %v354_v21 }
  0x84   :  { %4401 = vmatprep.subr.bf16.mxu0 %v4400_v60  ;;  %4433 = vmatprep.subr.bf16.mxu1 %v4432_v61  ;;  %v364_v26 = vld [vmem:[#allocation2 + $0x750] sm:$0xff]  ;;  %v379_v28 = vld [vmem:[#allocation2 + $0x7c8] sm:$0xff]  ;;  %v381_v30 = vld [vmem:[#allocation2 + $0x7d8] sm:$0xff] }
  0x85   :  { %v4442_v32 = vpack.c.bf16 %v364_v26, %v356_v25  ;;  %v370_v33 = vld [vmem:[#allocation2 + $0x780] sm:$0xff]  ;;  %v4412_v35 = vpack.c.bf16 %v379_v28, %v371_v27  ;;  %v4444_v36 = vpack.c.bf16 %v381_v30, %v373_v29  ;;  %v372_v37 = vld [vmem:[#allocation2 + $0x790] sm:$0xff]  ;;  %v263_v39 = vld [vmem:[#allocation2 + $0x428] sm:$0xff] }
  0x86   :  { %v378_v34 = vld [vmem:[#allocation2 + $0x7c0] sm:$0xff]  ;;  %v380_v38 = vld [vmem:[#allocation2 + $0x7d0] sm:$0xff]  ;;  %v271_v40 = vld [vmem:[#allocation2 + $0x468] sm:$0xff]  ;;  %5647 = vset.pattern.permute.xlu1 %v5855_v53 }
  0x87   :  { %4403 = vmatpush1.bf16.msra.mxu0 %v4402_v6  ;;  %4435 = vmatpush1.bf16.msra.mxu1 %v4434_v7  ;;  %v265_v41 = vld [vmem:[#allocation2 + $0x438] sm:$0xff]  ;;  %v4414_v43 = vpack.c.bf16 %v378_v34, %v370_v33  ;;  %v4446_v44 = vpack.c.bf16 %v380_v38, %v372_v37  ;;  %v4448_v45 = vpack.c.bf16 %v271_v40, %v263_v39  ;;  %v262_v49 = vld [vmem:[#allocation2 + $0x420] sm:$0xff]  ;;  %v264_v51 = vld [vmem:[#allocation2 + $0x430] sm:$0xff] }
  0x88   :  { %4405 = vmatprep.subr.bf16.mxu0 %v4404_v10  ;;  %4437 = vmatprep.subr.bf16.mxu1 %v4436_v11  ;;  %v273_v42 = vld [vmem:[#allocation2 + $0x478] sm:$0xff]  ;;  %v270_v50 = vld [vmem:[#allocation2 + $0x460] sm:$0xff]  ;;  %v272_v52 = vld [vmem:[#allocation2 + $0x470] sm:$0xff]  ;;  %v5856_v10 = vmov 1.0  }
  0x89   :  { %v4480_v46 = vpack.c.bf16 %v273_v42, %v265_v41  ;;  %v279_v55 = vld [vmem:[#allocation2 + $0x4a8] sm:$0xff]  ;;  %1929 = vperm.xlu1 %5647, %v5986_v2   ;;  %v281_v57 = vld [vmem:[#allocation2 + $0x4b8] sm:$0xff]  ;;  %v4450_v59 = vpack.c.bf16 %v270_v50, %v262_v49  ;;  %v4482_v60 = vpack.c.bf16 %v272_v52, %v264_v51  ;;  %v278_v61 = vld [vmem:[#allocation2 + $0x4a0] sm:$0xff] }
  0x8a   :  { %v287_v56 = vld [vmem:[#allocation2 + $0x4e8] sm:$0xff]  ;;  %v289_v58 = vld [vmem:[#allocation2 + $0x4f8] sm:$0xff]  ;;  %v286_v62 = vld [vmem:[#allocation2 + $0x4e0] sm:$0xff] }
  0x8b   :  { %4407 = vmatpush1.bf16.msra.mxu0 %v4406_v19  ;;  %4439 = vmatpush1.bf16.msra.mxu1 %v4438_v20  ;;  %v280_v0 = vld [vmem:[#allocation2 + $0x4b0] sm:$0xff]  ;;  %v295_v4 = vld [vmem:[#allocation2 + $0x528] sm:$0xff]  ;;  %v4452_v5 = vpack.c.bf16 %v287_v56, %v279_v55  ;;  %v4484_v6 = vpack.c.bf16 %v289_v58, %v281_v57  ;;  %v297_v8 = vld [vmem:[#allocation2 + $0x538] sm:$0xff]  ;;  %v4454_v11 = vpack.c.bf16 %v286_v62, %v278_v61 }
  0x8c   :  { %4409 = vmatprep.subr.bf16.mxu0 %v4408_v23  ;;  %4441 = vmatprep.subr.bf16.mxu1 %v4440_v24  ;;  %v288_v1 = vld [vmem:[#allocation2 + $0x4f0] sm:$0xff]  ;;  %v303_v7 = vld [vmem:[#allocation2 + $0x568] sm:$0xff]  ;;  %v305_v9 = vld [vmem:[#allocation2 + $0x578] sm:$0xff] }
  0x8d   :  { %1932 = vperm.xlu1 %5647, %v5991_v3   ;;  %v4486_v12 = vpack.c.bf16 %v288_v1, %v280_v0  ;;  %v294_v14 = vld [vmem:[#allocation2 + $0x520] sm:$0xff]  ;;  %v4456_v17 = vpack.c.bf16 %v303_v7, %v295_v4  ;;  %v4488_v18 = vpack.c.bf16 %v305_v9, %v297_v8  ;;  %v296_v19 = vld [vmem:[#allocation2 + $0x530] sm:$0xff]  ;;  %v311_v21 = vld [vmem:[#allocation2 + $0x5a8] sm:$0xff] }
  0x8e   :  { %v302_v15 = vld [vmem:[#allocation2 + $0x560] sm:$0xff]  ;;  %v304_v20 = vld [vmem:[#allocation2 + $0x570] sm:$0xff]  ;;  %v319_v22 = vld [vmem:[#allocation2 + $0x5e8] sm:$0xff] }
  0x8f   :  { %4411 = vmatpush1.bf16.msra.mxu0 %v4410_v31  ;;  %4443 = vmatpush1.bf16.msra.mxu1 %v4442_v32  ;;  %v313_v23 = vld [vmem:[#allocation2 + $0x5b8] sm:$0xff]  ;;  %v4458_v25 = vpack.c.bf16 %v302_v15, %v294_v14  ;;  %v4490_v26 = vpack.c.bf16 %v304_v20, %v296_v19  ;;  %v310_v27 = vld [vmem:[#allocation2 + $0x5a0] sm:$0xff]  ;;  %v4460_v29 = vpack.c.bf16 %v319_v22, %v311_v21  ;;  %v312_v31 = vld [vmem:[#allocation2 + $0x5b0] sm:$0xff] }
  0x90   :  { %4413 = vmatprep.subr.bf16.mxu0 %v4412_v35  ;;  %4445 = vmatprep.subr.bf16.mxu1 %v4444_v36  ;;  %v321_v24 = vld [vmem:[#allocation2 + $0x5f8] sm:$0xff]  ;;  %v318_v28 = vld [vmem:[#allocation2 + $0x5e0] sm:$0xff]  ;;  %v320_v32 = vld [vmem:[#allocation2 + $0x5f0] sm:$0xff] }
  0x91   :  { %v4492_v30 = vpack.c.bf16 %v321_v24, %v313_v23  ;;  %v327_v33 = vld [vmem:[#allocation2 + $0x628] sm:$0xff]  ;;  %v329_v35 = vld [vmem:[#allocation2 + $0x638] sm:$0xff]  ;;  %v4462_v37 = vpack.c.bf16 %v318_v28, %v310_v27  ;;  %v4494_v38 = vpack.c.bf16 %v320_v32, %v312_v31  ;;  %v326_v39 = vld [vmem:[#allocation2 + $0x620] sm:$0xff] }
  0x92   :  { %v335_v34 = vld [vmem:[#allocation2 + $0x668] sm:$0xff]  ;;  %v337_v36 = vld [vmem:[#allocation2 + $0x678] sm:$0xff]  ;;  %v334_v40 = vld [vmem:[#allocation2 + $0x660] sm:$0xff] }
  0x93   :  { %4415 = vmatpush1.bf16.msra.mxu0 %v4414_v43  ;;  %4447 = vmatpush1.bf16.msra.mxu1 %v4446_v44  ;;  %v4464_v41 = vpack.c.bf16 %v335_v34, %v327_v33  ;;  %v4496_v42 = vpack.c.bf16 %v337_v36, %v329_v35  ;;  %v328_v43 = vld [vmem:[#allocation2 + $0x630] sm:$0xff]  ;;  %v345_v47 = vld [vmem:[#allocation2 + $0x6b8] sm:$0xff]  ;;  %v4466_v50 = vpack.c.bf16 %v334_v40, %v326_v39  ;;  %v342_v52 = vld [vmem:[#allocation2 + $0x6a0] sm:$0xff] }
  0x94   :  { %4449 = vmatprep.subr.bf16.mxu0 %v4448_v45  ;;  %4481 = vmatprep.subr.bf16.mxu1 %v4480_v46  ;;  %v336_v44 = vld [vmem:[#allocation2 + $0x670] sm:$0xff]  ;;  %v343_v45 = vld [vmem:[#allocation2 + $0x6a8] sm:$0xff]  ;;  %v353_v49 = vld [vmem:[#allocation2 + $0x6f8] sm:$0xff] }
  0x95   :  { %v351_v46 = vld [vmem:[#allocation2 + $0x6e8] sm:$0xff]  ;;  %v4498_v51 = vpack.c.bf16 %v336_v44, %v328_v43  ;;  %v350_v53 = vld [vmem:[#allocation2 + $0x6e0] sm:$0xff]  ;;  %v4500_v56 = vpack.c.bf16 %v353_v49, %v345_v47  ;;  %v344_v57 = vld [vmem:[#allocation2 + $0x6b0] sm:$0xff] }
  0x96   :  { %v4468_v55 = vpack.c.bf16 %v351_v46, %v343_v45  ;;  %v352_v58 = vld [vmem:[#allocation2 + $0x6f0] sm:$0xff]  ;;  %v361_v61 = vld [vmem:[#allocation2 + $0x738] sm:$0xff]  ;;  %v4470_v0 = vpack.c.bf16 %v350_v53, %v342_v52  ;;  %v358_v4 = vld [vmem:[#allocation2 + $0x720] sm:$0xff] }
  0x97   :  { %v369_v62 = vld [vmem:[#allocation2 + $0x778] sm:$0xff]  ;;  %v4502_v1 = vpack.c.bf16 %v352_v58, %v344_v57  ;;  %v360_v8 = vld [vmem:[#allocation2 + $0x730] sm:$0xff]  ;;  %v374_v19 = vld [vmem:[#allocation2 + $0x7a0] sm:$0xff] }
  0x98   :  { %v4504_v7 = vpack.c.bf16 %v369_v62, %v361_v61  ;;  %v368_v9 = vld [vmem:[#allocation2 + $0x770] sm:$0xff]  ;;  %v377_v14 = vld [vmem:[#allocation2 + $0x7b8] sm:$0xff]  ;;  %v382_v20 = vld [vmem:[#allocation2 + $0x7e0] sm:$0xff] }
  0x99   :  { %v385_v15 = vld [vmem:[#allocation2 + $0x7f8] sm:$0xff]  ;;  %v376_v23 = vld [vmem:[#allocation2 + $0x7b0] sm:$0xff]  ;;  %v119_v31 = vld [vmem:[#allocation2] sm:$0xff] }
  0x9a   :  { %v4508_v22 = vpack.c.bf16 %v385_v15, %v377_v14  ;;  %v384_v24 = vld [vmem:[#allocation2 + $0x7f0] sm:$0xff]  ;;  %v122_v27 = vld [vmem:[#allocation2 + $0x18] sm:$0xff]  ;;  %v127_v34 = vld [vmem:[#allocation2 + $0x40] sm:$0xff] }
  0x9b   :  { %v130_v28 = vld [vmem:[#allocation2 + $0x58] sm:$0xff]  ;;  %v121_v35 = vld [vmem:[#allocation2 + $0x10] sm:$0xff]  ;;  %v135_v43 = vld [vmem:[#allocation2 + $0x80] sm:$0xff] }
  0x9c   :  { %v4544_v33 = vpack.c.bf16 %v130_v28, %v122_v27  ;;  %v129_v36 = vld [vmem:[#allocation2 + $0x50] sm:$0xff]  ;;  %v138_v39 = vld [vmem:[#allocation2 + $0x98] sm:$0xff]  ;;  %v143_v44 = vld [vmem:[#allocation2 + $0xc0] sm:$0xff] }
  0x9d   :  { %v146_v40 = vld [vmem:[#allocation2 + $0xd8] sm:$0xff]  ;;  %v137_v45 = vld [vmem:[#allocation2 + $0x90] sm:$0xff]  ;;  %v152_v47 = vld [vmem:[#allocation2 + $0x108] sm:$0xff] }
  0x9e   :  { %v145_v46 = vld [vmem:[#allocation2 + $0xd0] sm:$0xff]  ;;  %v154_v52 = vld [vmem:[#allocation2 + $0x118] sm:$0xff]  ;;  %v151_v57 = vld [vmem:[#allocation2 + $0x100] sm:$0xff] }
  0x9f   :  { %v162_v53 = vld [vmem:[#allocation2 + $0x158] sm:$0xff]  ;;  %v159_v58 = vld [vmem:[#allocation2 + $0x140] sm:$0xff]  ;;  %v153_v61 = vld [vmem:[#allocation2 + $0x110] sm:$0xff] }
  0xa0   :  { %v161_v62 = vld [vmem:[#allocation2 + $0x150] sm:$0xff]  ;;  %v184_v15 = vld [vmem:[#allocation2 + $0x208] sm:$0xff] }
  0xa1   :  { %v177_v14 = vld [vmem:[#allocation2 + $0x1d0] sm:$0xff]  ;;  %v200_v27 = vld [vmem:[#allocation2 + $0x288] sm:$0xff] }
  0xa2   :  { %v208_v28 = vld [vmem:[#allocation2 + $0x2c8] sm:$0xff] }
  0xf1   :  { %v6007_v63 = vpop.permute.xlu0 %248 }
  0xf2   :  { %vm253_vm0 = vcmp.eq.s32.totalorder %v6007_v63, %v6004_v54  ;;  %v170_v63 = vld [vmem:[#allocation2 + $0x198] sm:$0xff] }
  0xf3   :  { %4262 = vmatmul.mubr.msk.f32.vlgmr.msra.gmra.mrb[0].mxu0 %vm253_vm0, %v5856_v10  ;;  %4264 = vmatmul.mubr.msk.f32.vlgmr.msra.gmra.mrb[0].mxu1 %vm253_vm0, %v5856_v10 }
  0xf4   :  { %4451 = vmatpush1.bf16.msra.mxu0 %v4450_v59  ;;  %4483 = vmatpush1.bf16.msra.mxu1 %v4482_v60  ;;  %v359_v59 = vld [vmem:[#allocation2 + $0x728] sm:$0xff] }
  0xf5   :  { %v6020_v16 = vpop.permute.xlu0 %251  ;;  %456 = vmatprep.mubr.f32.mxu0 %v5852_v13  ;;  %533 = vmatprep.mubr.f32.mxu1 %v5852_v13  ;;  %v367_v60 = vld [vmem:[#allocation2 + $0x768] sm:$0xff] }
  0xf6   :  { %vm254_vm1 = vcmp.eq.s32.totalorder %v6020_v16, %v6004_v54  ;;  %4453 = vmatprep.subr.bf16.mxu0 %v4452_v5  ;;  %4485 = vmatprep.subr.bf16.mxu1 %v4484_v6  ;;  %v366_v5 = vld [vmem:[#allocation2 + $0x760] sm:$0xff]  ;;  %v4472_v6 = vpack.c.bf16 %v367_v60, %v359_v59  ;;  %v4552_v60 = vpack.c.bf16 %v162_v53, %v154_v52  ;;  %v232_v52 = vld [vmem:[#allocation2 + $0x388] sm:$0xff] }
  0xf7   :  { %4263 = vmatmul.mubr.msk.f32.gmra.mrb[2].mxu0 %vm254_vm1, %v5856_v10  ;;  %4265 = vmatmul.mubr.msk.f32.gmra.mrb[2].mxu1 %vm254_vm1, %v5856_v10  ;;  %v240_v53 = vld [vmem:[#allocation2 + $0x3c8] sm:$0xff] }
  0xf8   :  { %4455 = vmatpush1.bf16.msra.mxu0 %v4454_v11  ;;  %4487 = vmatpush1.bf16.msra.mxu1 %v4486_v12  ;;  %v375_v11 = vld [vmem:[#allocation2 + $0x7a8] sm:$0xff] }
  0xf9   :  { %4457 = vmatprep.subr.bf16.mxu0 %v4456_v17  ;;  %4489 = vmatprep.subr.bf16.mxu1 %v4488_v18  ;;  %v383_v12 = vld [vmem:[#allocation2 + $0x7e8] sm:$0xff]  ;;  %v4474_v17 = vpack.c.bf16 %v366_v5, %v358_v4  ;;  %v4506_v18 = vpack.c.bf16 %v368_v9, %v360_v8  ;;  %v178_v4 = vld [vmem:[#allocation2 + $0x1d8] sm:$0xff]  ;;  %v4522_v5 = vpack.c.bf16 %v159_v58, %v151_v57  ;;  %v175_v8 = vld [vmem:[#allocation2 + $0x1c0] sm:$0xff] }
  0xfa   :  { %604 = vmatprep.mubr.f32.mxu0 %v5852_v13  ;;  %681 = vmatprep.mubr.f32.mxu1 %v5852_v13  ;;  %v4476_v21 = vpack.c.bf16 %v383_v12, %v375_v11  ;;  %v4556_v11 = vpack.c.bf16 %v178_v4, %v170_v63  ;;  %v169_v12 = vld [vmem:[#allocation2 + $0x190] sm:$0xff]  ;;  %v124_v63 = vld [vmem:[#allocation2 + $0x28] sm:$0xff] }
  0xfb   :  { %v132_v4 = vld [vmem:[#allocation2 + $0x68] sm:$0xff] }
  0xfc   :  { %4459 = vmatpush1.bf16.msra.mxu0 %v4458_v25  ;;  %4491 = vmatpush1.bf16.msra.mxu1 %v4490_v26  ;;  %v120_v25 = vld [vmem:[#allocation2 + $0x8] sm:$0xff] }
  0xfd   :  { %4461 = vmatprep.subr.bf16.mxu0 %v4460_v29  ;;  %4493 = vmatprep.subr.bf16.mxu1 %v4492_v30  ;;  %v128_v26 = vld [vmem:[#allocation2 + $0x48] sm:$0xff]  ;;  %v4478_v29 = vpack.c.bf16 %v382_v20, %v374_v19  ;;  %v4510_v30 = vpack.c.bf16 %v384_v24, %v376_v23  ;;  %v194_v19 = vld [vmem:[#allocation2 + $0x258] sm:$0xff]  ;;  %v4558_v20 = vpack.c.bf16 %v177_v14, %v169_v12 }
  0xfe   :  { %v4512_v32 = vpack.c.bf16 %v128_v26, %v120_v25  ;;  %v185_v25 = vld [vmem:[#allocation2 + $0x210] sm:$0xff]  ;;  %v4576_v12 = vpack.c.bf16 %v132_v4, %v124_v63  ;;  %v195_v63 = vld [vmem:[#allocation2 + $0x260] sm:$0xff] }
  0xff   :  { %v193_v26 = vld [vmem:[#allocation2 + $0x250] sm:$0xff] }
 0x100   :  { %4463 = vmatpush1.bf16.msra.mxu0 %v4462_v37  ;;  %4495 = vmatpush1.bf16.msra.mxu1 %v4494_v38  ;;  %v136_v37 = vld [vmem:[#allocation2 + $0x88] sm:$0xff] }
 0x101   :  { %4465 = vmatprep.subr.bf16.mxu0 %v4464_v41  ;;  %4497 = vmatprep.subr.bf16.mxu1 %v4496_v42  ;;  %v144_v38 = vld [vmem:[#allocation2 + $0xc8] sm:$0xff]  ;;  %v4514_v41 = vpack.c.bf16 %v127_v34, %v119_v31  ;;  %v4546_v42 = vpack.c.bf16 %v129_v36, %v121_v35  ;;  %v207_v34 = vld [vmem:[#allocation2 + $0x2c0] sm:$0xff]  ;;  %v4532_v35 = vpack.c.bf16 %v208_v28, %v200_v27  ;;  %v149_v27 = vld [vmem:[#allocation2 + $0xf0] sm:$0xff] }
 0x102   :  { %v4516_v49 = vpack.c.bf16 %v144_v38, %v136_v37  ;;  %v201_v37 = vld [vmem:[#allocation2 + $0x290] sm:$0xff]  ;;  %v156_v28 = vld [vmem:[#allocation2 + $0x128] sm:$0xff] }
 0x103   :  { %v209_v38 = vld [vmem:[#allocation2 + $0x2d0] sm:$0xff] }
 0x104   :  { %4467 = vmatpush1.bf16.msra.mxu0 %v4466_v50  ;;  %4499 = vmatpush1.bf16.msra.mxu1 %v4498_v51  ;;  %v4548_v50 = vpack.c.bf16 %v146_v40, %v138_v39  ;;  %v160_v51 = vld [vmem:[#allocation2 + $0x148] sm:$0xff] }
 0x105   :  { %4469 = vmatprep.subr.bf16.mxu0 %v4468_v55  ;;  %4501 = vmatprep.subr.bf16.mxu1 %v4500_v56  ;;  %v4518_v55 = vpack.c.bf16 %v143_v44, %v135_v43  ;;  %v4550_v56 = vpack.c.bf16 %v145_v46, %v137_v45  ;;  %v4520_v59 = vpack.c.bf16 %v160_v51, %v152_v47  ;;  %v216_v39 = vld [vmem:[#allocation2 + $0x308] sm:$0xff]  ;;  %v215_v45 = vld [vmem:[#allocation2 + $0x300] sm:$0xff]  ;;  %v225_v51 = vld [vmem:[#allocation2 + $0x350] sm:$0xff] }
 0x106   :  { %v224_v40 = vld [vmem:[#allocation2 + $0x348] sm:$0xff]  ;;  %v4566_v44 = vpack.c.bf16 %v209_v38, %v201_v37  ;;  %v223_v46 = vld [vmem:[#allocation2 + $0x340] sm:$0xff] }
 0x107   :  { %v4536_v47 = vpack.c.bf16 %v224_v40, %v216_v39  ;;  %v4538_v57 = vpack.c.bf16 %v223_v46, %v215_v45  ;;  %v155_v38 = vld [vmem:[#allocation2 + $0x120] sm:$0xff]  ;;  %v180_v45 = vld [vmem:[#allocation2 + $0x1e8] sm:$0xff]  ;;  %v174_v46 = vld [vmem:[#allocation2 + $0x1b8] sm:$0xff] }
 0x108   :  { %4471 = vmatpush1.bf16.msra.mxu0 %v4470_v0  ;;  %4503 = vmatpush1.bf16.msra.mxu1 %v4502_v1  ;;  %v168_v0 = vld [vmem:[#allocation2 + $0x188] sm:$0xff]  ;;  %v163_v39 = vld [vmem:[#allocation2 + $0x160] sm:$0xff] }
 0x109   :  { %4473 = vmatprep.subr.bf16.mxu0 %v4472_v6  ;;  %4505 = vmatprep.subr.bf16.mxu1 %v4504_v7  ;;  %v176_v1 = vld [vmem:[#allocation2 + $0x1c8] sm:$0xff]  ;;  %v4554_v6 = vpack.c.bf16 %v161_v62, %v153_v61  ;;  %v167_v7 = vld [vmem:[#allocation2 + $0x180] sm:$0xff]  ;;  %v4540_v61 = vpack.c.bf16 %v240_v53, %v232_v52 }
 0x10a   :  { %v4524_v9 = vpack.c.bf16 %v176_v1, %v168_v0  ;;  %v4526_v16 = vpack.c.bf16 %v175_v8, %v167_v7  ;;  %v233_v0 = vld [vmem:[#allocation2 + $0x390] sm:$0xff]  ;;  %v179_v52 = vld [vmem:[#allocation2 + $0x1e0] sm:$0xff] }
 0x10b   :  { %v241_v1 = vld [vmem:[#allocation2 + $0x3d0] sm:$0xff] }
 0x10c   :  { %4475 = vmatpush1.bf16.msra.mxu0 %v4474_v17  ;;  %4507 = vmatpush1.bf16.msra.mxu1 %v4506_v18  ;;  %v192_v17 = vld [vmem:[#allocation2 + $0x248] sm:$0xff]  ;;  %v186_v18 = vld [vmem:[#allocation2 + $0x218] sm:$0xff]  ;;  %v4574_v8 = vpack.c.bf16 %v241_v1, %v233_v0  ;;  %v187_v1 = vld [vmem:[#allocation2 + $0x220] sm:$0xff] }
 0x10d   :  { %4477 = vmatprep.subr.bf16.mxu0 %v4476_v21  ;;  %4509 = vmatprep.subr.bf16.mxu1 %v4508_v22  ;;  %v183_v21 = vld [vmem:[#allocation2 + $0x200] sm:$0xff]  ;;  %v4528_v23 = vpack.c.bf16 %v192_v17, %v184_v15  ;;  %v4560_v24 = vpack.c.bf16 %v194_v19, %v186_v18  ;;  %v125_v17 = vld [vmem:[#allocation2 + $0x30] sm:$0xff]  ;;  %v140_v19 = vld [vmem:[#allocation2 + $0xa8] sm:$0xff] }
 0x10e   :  { %v191_v22 = vld [vmem:[#allocation2 + $0x240] sm:$0xff]  ;;  %v133_v18 = vld [vmem:[#allocation2 + $0x70] sm:$0xff] }
 0x10f   :  { %v4530_v31 = vpack.c.bf16 %v191_v22, %v183_v21  ;;  %v131_v15 = vld [vmem:[#allocation2 + $0x60] sm:$0xff]  ;;  %v150_v21 = vld [vmem:[#allocation2 + $0xf8] sm:$0xff] }
 0x110   :  { %4479 = vmatpush1.bf16.msra.mxu0 %v4478_v29  ;;  %4511 = vmatpush1.bf16.msra.mxu1 %v4510_v30  ;;  %v202_v29 = vld [vmem:[#allocation2 + $0x298] sm:$0xff] }
 0x111   :  { %4513 = vmatprep.subr.bf16.mxu0 %v4512_v32  ;;  %4545 = vmatprep.subr.bf16.mxu1 %v4544_v33  ;;  %v210_v30 = vld [vmem:[#allocation2 + $0x2d8] sm:$0xff]  ;;  %v4562_v32 = vpack.c.bf16 %v193_v26, %v185_v25  ;;  %v199_v33 = vld [vmem:[#allocation2 + $0x280] sm:$0xff]  ;;  %v141_v26 = vld [vmem:[#allocation2 + $0xb0] sm:$0xff] }
 0x112   :  { %v4564_v36 = vpack.c.bf16 %v210_v30, %v202_v29  ;;  %v4534_v43 = vpack.c.bf16 %v207_v34, %v199_v33  ;;  %v147_v25 = vld [vmem:[#allocation2 + $0xe0] sm:$0xff]  ;;  %v166_v33 = vld [vmem:[#allocation2 + $0x178] sm:$0xff]  ;;  %v5857_v34 = vmov 5   ;;  %v4614_v37 = vpack.c.bf16 %v149_v27, %v141_v26 }
 0x113   :  { %4266 = vmatmul.mubr.msk.f32.vlgmr.msra.gmra.mrb[4].mxu0 %vm253_vm0, %v5856_v10  ;;  %4268 = vmatmul.mubr.msk.f32.vlgmr.msra.gmra.mrb[4].mxu1 %vm253_vm0, %v5856_v10  ;;  %v219_v27 = vld [vmem:[#allocation2 + $0x320] sm:$0xff] }
 0x114   :  { %4515 = vmatpush1.bf16.msra.mxu0 %v4514_v41  ;;  %4547 = vmatpush1.bf16.msra.mxu1 %v4546_v42  ;;  %v218_v41 = vld [vmem:[#allocation2 + $0x318] sm:$0xff] }
 0x115   :  { %610 = vmatprep.mubr.f32.mxu0 %v5852_v13  ;;  %687 = vmatprep.mubr.f32.mxu1 %v5852_v13  ;;  %v226_v42 = vld [vmem:[#allocation2 + $0x358] sm:$0xff] }
 0x116   :  { %4517 = vmatprep.subr.bf16.mxu0 %v4516_v49  ;;  %4549 = vmatprep.subr.bf16.mxu1 %v4548_v50  ;;  %v4568_v49 = vpack.c.bf16 %v226_v42, %v218_v41  ;;  %v217_v50 = vld [vmem:[#allocation2 + $0x310] sm:$0xff] }
 0x117   :  { %4267 = vmatmul.mubr.msk.f32.gmra.mrb[6].mxu0 %vm254_vm1, %v5856_v10  ;;  %4269 = vmatmul.mubr.msk.f32.gmra.mrb[6].mxu1 %vm254_vm1, %v5856_v10  ;;  %v4570_v58 = vpack.c.bf16 %v225_v51, %v217_v50  ;;  %v157_v42 = vld [vmem:[#allocation2 + $0x130] sm:$0xff]  ;;  %v171_v51 = vld [vmem:[#allocation2 + $0x1a0] sm:$0xff] }
 0x118   :  { %4519 = vmatpush1.bf16.msra.mxu0 %v4518_v55  ;;  %4551 = vmatpush1.bf16.msra.mxu1 %v4550_v56  ;;  %v234_v55 = vld [vmem:[#allocation2 + $0x398] sm:$0xff] }
 0x119   :  { %4521 = vmatprep.subr.bf16.mxu0 %v4520_v59  ;;  %4553 = vmatprep.subr.bf16.mxu1 %v4552_v60  ;;  %v242_v56 = vld [vmem:[#allocation2 + $0x3d8] sm:$0xff]  ;;  %v231_v59 = vld [vmem:[#allocation2 + $0x380] sm:$0xff] }
 0x11a   :  { %758 = vmatprep.mubr.f32.mxu0 %v5852_v13  ;;  %835 = vmatprep.mubr.f32.mxu1 %v5852_v13  ;;  %v239_v60 = vld [vmem:[#allocation2 + $0x3c0] sm:$0xff]  ;;  %v4572_v62 = vpack.c.bf16 %v242_v56, %v234_v55  ;;  %v173_v56 = vld [vmem:[#allocation2 + $0x1b0] sm:$0xff] }
 0x11b   :  { %v4542_v7 = vpack.c.bf16 %v239_v60, %v231_v59  ;;  %5648 = vset.pattern.permute.xlu0 %v5857_v34  ;;  %5649 = vset.pattern.permute.xlu1 %v5857_v34  ;;  %v196_v59 = vld [vmem:[#allocation2 + $0x268] sm:$0xff]  ;;  %v190_v60 = vld [vmem:[#allocation2 + $0x238] sm:$0xff] }
 0x11c   :  { %4523 = vmatpush1.bf16.msra.mxu0 %v4522_v5  ;;  %4555 = vmatpush1.bf16.msra.mxu1 %v4554_v6  ;;  %v126_v5 = vld [vmem:[#allocation2 + $0x38] sm:$0xff]  ;;  %v244_v34 = vld [vmem:[#allocation2 + $0x3e8] sm:$0xff] }
 0x11d   :  { %4525 = vmatprep.subr.bf16.mxu0 %v4524_v9  ;;  %4557 = vmatprep.subr.bf16.mxu1 %v4556_v11  ;;  %v134_v6 = vld [vmem:[#allocation2 + $0x78] sm:$0xff]  ;;  %v123_v9 = vld [vmem:[#allocation2 + $0x20] sm:$0xff]  ;;  %v6056_v11 = vpop.permute.xlu1 %110 }
 0x11e   :  { %v4608_v14 = vpack.c.bf16 %v134_v6, %v126_v5  ;;  %vm115_vm2 = vcmp.eq.s32.totalorder %v6056_v11, %v6004_v54  ;;  %v4578_v22 = vpack.c.bf16 %v131_v15, %v123_v9  ;;  %2392 = vperm.xlu0 %5648, %v5986_v2   ;;  %2395 = vperm.xlu1 %5649, %v5991_v3   ;;  %v189_v6 = vld [vmem:[#allocation2 + $0x230] sm:$0xff]  ;;  %v212_v9 = vld [vmem:[#allocation2 + $0x2e8] sm:$0xff]  ;;  %v203_v15 = vld [vmem:[#allocation2 + $0x2a0] sm:$0xff] }
 0x11f   :  { %v4594_v2 = vpack.c.bf16 %v195_v63, %v187_v1  ;;  %v1064_v11 = vld [vmem:[#allocation2 + $0x998] sm:$0xff] }
 0x120   :  { %4527 = vmatpush1.bf16.msra.mxu0 %v4526_v16  ;;  %4559 = vmatpush1.bf16.msra.mxu1 %v4558_v20  ;;  %v148_v16 = vld [vmem:[#allocation2 + $0xe8] sm:$0xff]  ;;  %v142_v20 = vld [vmem:[#allocation2 + $0xb8] sm:$0xff] }
 0x121   :  { %4529 = vmatprep.subr.bf16.mxu0 %v4528_v23  ;;  %4561 = vmatprep.subr.bf16.mxu1 %v4560_v24  ;;  %v4610_v23 = vpack.c.bf16 %v133_v18, %v125_v17  ;;  %v139_v24 = vld [vmem:[#allocation2 + $0xa0] sm:$0xff]  ;;  %v4580_v29 = vpack.c.bf16 %v148_v16, %v140_v19  ;;  %v4612_v30 = vpack.c.bf16 %v150_v21, %v142_v20  ;;  %v205_v16 = vld [vmem:[#allocation2 + $0x2b0] sm:$0xff]  ;;  %v220_v21 = vld [vmem:[#allocation2 + $0x328] sm:$0xff] }
 0x122   :  { %v211_v17 = vld [vmem:[#allocation2 + $0x2e0] sm:$0xff]  ;;  %v213_v20 = vld [vmem:[#allocation2 + $0x2f0] sm:$0xff] }
 0x123   :  { %v4630_v26 = vpack.c.bf16 %v213_v20, %v205_v16 }
 0x124   :  { %4531 = vmatpush1.bf16.msra.mxu0 %v4530_v31  ;;  %4563 = vmatpush1.bf16.msra.mxu1 %v4562_v32  ;;  %v164_v31 = vld [vmem:[#allocation2 + $0x168] sm:$0xff]  ;;  %v158_v32 = vld [vmem:[#allocation2 + $0x138] sm:$0xff] }
 0x125   :  { %4533 = vmatprep.subr.bf16.mxu0 %v4532_v35  ;;  %4565 = vmatprep.subr.bf16.mxu1 %v4564_v36  ;;  %v6060_v35 = vpop.permute.xlu1 %113  ;;  %v4582_v36 = vpack.c.bf16 %v147_v25, %v139_v24  ;;  %v4584_v40 = vpack.c.bf16 %v164_v31, %v156_v28  ;;  %v4616_v41 = vpack.c.bf16 %v166_v33, %v158_v32  ;;  %v230_v24 = vld [vmem:[#allocation2 + $0x378] sm:$0xff]  ;;  %v227_v28 = vld [vmem:[#allocation2 + $0x360] sm:$0xff]  ;;  %v221_v31 = vld [vmem:[#allocation2 + $0x330] sm:$0xff] }
 0x126   :  { %vm116_vm3 = vcmp.eq.s32.totalorder %v6060_v35, %v6004_v54  ;;  %v4598_v25 = vpack.c.bf16 %v211_v17, %v203_v15  ;;  %v229_v32 = vld [vmem:[#allocation2 + $0x370] sm:$0xff]  ;;  %v236_v33 = vld [vmem:[#allocation2 + $0x3a8] sm:$0xff] }
 0x128   :  { %4535 = vmatpush1.bf16.msra.mxu0 %v4534_v43  ;;  %4567 = vmatpush1.bf16.msra.mxu1 %v4566_v44  ;;  %v165_v43 = vld [vmem:[#allocation2 + $0x170] sm:$0xff]  ;;  %v172_v44 = vld [vmem:[#allocation2 + $0x1a8] sm:$0xff] }
 0x129   :  { %4537 = vmatprep.subr.bf16.mxu0 %v4536_v47  ;;  %4569 = vmatprep.subr.bf16.mxu1 %v4568_v49  ;;  %v182_v47 = vld [vmem:[#allocation2 + $0x1f8] sm:$0xff]  ;;  %v4586_v49 = vpack.c.bf16 %v163_v39, %v155_v38  ;;  %v4618_v50 = vpack.c.bf16 %v165_v43, %v157_v42  ;;  %v4588_v53 = vpack.c.bf16 %v180_v45, %v172_v44  ;;  %v237_v44 = vld [vmem:[#allocation2 + $0x3b0] sm:$0xff] }
 0x12a   :  { %v4620_v55 = vpack.c.bf16 %v182_v47, %v174_v46  ;;  %v4602_v38 = vpack.c.bf16 %v227_v28, %v219_v27  ;;  %v4634_v39 = vpack.c.bf16 %v229_v32, %v221_v31  ;;  %v4604_v42 = vpack.c.bf16 %v244_v34, %v236_v33  ;;  %v245_v45 = vld [vmem:[#allocation2 + $0x3f0] sm:$0xff]  ;;  %v1014_v46 = vld [vmem:[#allocation2 + $0x808] sm:$0xff]  ;;  %v1061_v28 = vld [vmem:[#allocation2 + $0x980] sm:$0xff] }
 0x12b   :  { %v1022_v47 = vld [vmem:[#allocation2 + $0x848] sm:$0xff]  ;;  %v1063_v32 = vld [vmem:[#allocation2 + $0x990] sm:$0xff] }
 0x12c   :  { %4539 = vmatpush1.bf16.msra.mxu0 %v4538_v57  ;;  %4571 = vmatpush1.bf16.msra.mxu1 %v4570_v58  ;;  %v181_v57 = vld [vmem:[#allocation2 + $0x1f0] sm:$0xff]  ;;  %v188_v58 = vld [vmem:[#allocation2 + $0x228] sm:$0xff] }
 0x12d   :  { %4541 = vmatprep.subr.bf16.mxu0 %v4540_v61  ;;  %4573 = vmatprep.subr.bf16.mxu1 %v4572_v62  ;;  %v198_v61 = vld [vmem:[#allocation2 + $0x278] sm:$0xff]  ;;  %v4590_v62 = vpack.c.bf16 %v179_v52, %v171_v51  ;;  %v4622_v0 = vpack.c.bf16 %v181_v57, %v173_v56  ;;  %v4592_v4 = vpack.c.bf16 %v196_v59, %v188_v58  ;;  %v1021_v57 = vld [vmem:[#allocation2 + $0x840] sm:$0xff]  ;;  %v1015_v58 = vld [vmem:[#allocation2 + $0x810] sm:$0xff] }
 0x12e   :  { %v4624_v5 = vpack.c.bf16 %v198_v61, %v190_v60  ;;  %v4638_v52 = vpack.c.bf16 %v245_v45, %v237_v44  ;;  %v1023_v59 = vld [vmem:[#allocation2 + $0x850] sm:$0xff]  ;;  %v1030_v60 = vld [vmem:[#allocation2 + $0x888] sm:$0xff] }
 0x12f   :  { %v1038_v61 = vld [vmem:[#allocation2 + $0x8c8] sm:$0xff]  ;;  %v4674_v63 = vpack.c.bf16 %v1023_v59, %v1015_v58  ;;  %v1071_v33 = vld [vmem:[#allocation2 + $0x9d0] sm:$0xff] }
 0x130   :  { %4543 = vmatpush1.bf16.msra.mxu0 %v4542_v7  ;;  %4575 = vmatpush1.bf16.msra.mxu1 %v4574_v8  ;;  %v197_v7 = vld [vmem:[#allocation2 + $0x270] sm:$0xff]  ;;  %v204_v8 = vld [vmem:[#allocation2 + $0x2a8] sm:$0xff] }
 0x131   :  { %4577 = vmatprep.subr.bf16.mxu0 %v4576_v12  ;;  %4609 = vmatprep.subr.bf16.mxu1 %v4608_v14  ;;  %v206_v12 = vld [vmem:[#allocation2 + $0x2b8] sm:$0xff]  ;;  %v4626_v3 = vpack.c.bf16 %v197_v7, %v189_v6  ;;  %v4596_v18 = vpack.c.bf16 %v212_v9, %v204_v8  ;;  %v1031_v6 = vld [vmem:[#allocation2 + $0x890] sm:$0xff]  ;;  %v1046_v8 = vld [vmem:[#allocation2 + $0x908] sm:$0xff]  ;;  %v4644_v9 = vpack.c.bf16 %v1038_v61, %v1030_v60 }
 0x132   :  { %v214_v14 = vld [vmem:[#allocation2 + $0x2f8] sm:$0xff]  ;;  %v1039_v7 = vld [vmem:[#allocation2 + $0x8d0] sm:$0xff]  ;;  %v1078_v34 = vld [vmem:[#allocation2 + $0xa08] sm:$0xff] }
 0x133   :  { %4270 = vmatmul.mubr.msk.f32.vlgmr.msra.gmra.mrb[0].mxu0 %vm115_vm2, %v5856_v10  ;;  %4272 = vmatmul.mubr.msk.f32.vlgmr.msra.gmra.mrb[0].mxu1 %vm115_vm2, %v5856_v10  ;;  %v4628_v19 = vpack.c.bf16 %v214_v14, %v206_v12  ;;  %v1054_v14 = vld [vmem:[#allocation2 + $0x948] sm:$0xff]  ;;  %v4678_v17 = vpack.c.bf16 %v1039_v7, %v1031_v6  ;;  %v1079_v44 = vld [vmem:[#allocation2 + $0xa10] sm:$0xff] }
 0x134   :  { %4579 = vmatpush1.bf16.msra.mxu0 %v4578_v22  ;;  %4611 = vmatpush1.bf16.msra.mxu1 %v4610_v23  ;;  %v228_v22 = vld [vmem:[#allocation2 + $0x368] sm:$0xff]  ;;  %v222_v23 = vld [vmem:[#allocation2 + $0x338] sm:$0xff]  ;;  %v4648_v16 = vpack.c.bf16 %v1054_v14, %v1046_v8  ;;  %v1087_v45 = vld [vmem:[#allocation2 + $0xa50] sm:$0xff] }
 0x135   :  { %764 = vmatprep.mubr.f32.mxu0 %v5852_v13  ;;  %841 = vmatprep.mubr.f32.mxu1 %v5852_v13  ;;  %v1095_v58 = vld [vmem:[#allocation2 + $0xa90] sm:$0xff]  ;;  %v1110_v60 = vld [vmem:[#allocation2 + $0xb08] sm:$0xff] }
 0x136   :  { %4581 = vmatprep.subr.bf16.mxu0 %v4580_v29  ;;  %4613 = vmatprep.subr.bf16.mxu1 %v4612_v30  ;;  %v4600_v29 = vpack.c.bf16 %v228_v22, %v220_v21  ;;  %v4632_v30 = vpack.c.bf16 %v230_v24, %v222_v23  ;;  %v1047_v21 = vld [vmem:[#allocation2 + $0x910] sm:$0xff]  ;;  %v1062_v23 = vld [vmem:[#allocation2 + $0x988] sm:$0xff] }
 0x137   :  { %4271 = vmatmul.mubr.msk.f32.gmra.mrb[2].mxu0 %vm116_vm3, %v5856_v10  ;;  %4273 = vmatmul.mubr.msk.f32.gmra.mrb[2].mxu1 %vm116_vm3, %v5856_v10  ;;  %v1055_v22 = vld [vmem:[#allocation2 + $0x950] sm:$0xff]  ;;  %v1070_v24 = vld [vmem:[#allocation2 + $0x9c8] sm:$0xff] }
 0x138   :  { %4583 = vmatpush1.bf16.msra.mxu0 %v4582_v36  ;;  %4615 = vmatpush1.bf16.msra.mxu1 %v4614_v37  ;;  %v238_v36 = vld [vmem:[#allocation2 + $0x3b8] sm:$0xff]  ;;  %v4682_v27 = vpack.c.bf16 %v1055_v22, %v1047_v21  ;;  %v1103_v59 = vld [vmem:[#allocation2 + $0xad0] sm:$0xff]  ;;  %v1118_v61 = vld [vmem:[#allocation2 + $0xb48] sm:$0xff] }
 0x139   :  { %4585 = vmatprep.subr.bf16.mxu0 %v4584_v40  ;;  %4617 = vmatprep.subr.bf16.mxu1 %v4616_v41  ;;  %v246_v37 = vld [vmem:[#allocation2 + $0x3f8] sm:$0xff]  ;;  %v235_v40 = vld [vmem:[#allocation2 + $0x3a0] sm:$0xff]  ;;  %v4664_v6 = vpack.c.bf16 %v1118_v61, %v1110_v60  ;;  %v1111_v8 = vld [vmem:[#allocation2 + $0xb10] sm:$0xff] }
 0x13a   :  { %912 = vmatprep.mubr.f32.mxu0 %v5852_v13  ;;  %989 = vmatprep.mubr.f32.mxu1 %v5852_v13  ;;  %v243_v41 = vld [vmem:[#allocation2 + $0x3e0] sm:$0xff]  ;;  %v4636_v43 = vpack.c.bf16 %v246_v37, %v238_v36  ;;  %v1086_v36 = vld [vmem:[#allocation2 + $0xa48] sm:$0xff]  ;;  %v1080_v37 = vld [vmem:[#allocation2 + $0xa18] sm:$0xff] }
 0x13b   :  { %v4606_v51 = vpack.c.bf16 %v243_v41, %v235_v40  ;;  %v1077_v40 = vld [vmem:[#allocation2 + $0xa00] sm:$0xff]  ;;  %v1134_v14 = vld [vmem:[#allocation2 + $0xbc8] sm:$0xff]  ;;  %v1127_v21 = vld [vmem:[#allocation2 + $0xb90] sm:$0xff] }
 0x13c   :  { %4587 = vmatpush1.bf16.msra.mxu0 %v4586_v49  ;;  %4619 = vmatpush1.bf16.msra.mxu1 %v4618_v50  ;;  %v1016_v49 = vld [vmem:[#allocation2 + $0x818] sm:$0xff]  ;;  %v1085_v41 = vld [vmem:[#allocation2 + $0xa40] sm:$0xff]  ;;  %v1135_v22 = vld [vmem:[#allocation2 + $0xbd0] sm:$0xff] }
 0x13d   :  { %4589 = vmatprep.subr.bf16.mxu0 %v4588_v53  ;;  %4621 = vmatprep.subr.bf16.mxu1 %v4620_v55  ;;  %v1024_v50 = vld [vmem:[#allocation2 + $0x858] sm:$0xff]  ;;  %v1013_v53 = vld [vmem:[#allocation2 + $0x800] sm:$0xff]  ;;  %v4640_v55 = vpack.c.bf16 %v1022_v47, %v1014_v46  ;;  %v1094_v46 = vld [vmem:[#allocation2 + $0xa88] sm:$0xff] }
 0x13e   :  { %v4672_v56 = vpack.c.bf16 %v1024_v50, %v1016_v49  ;;  %v4642_v1 = vpack.c.bf16 %v1021_v57, %v1013_v53  ;;  %v1102_v47 = vld [vmem:[#allocation2 + $0xac8] sm:$0xff]  ;;  %v1096_v49 = vld [vmem:[#allocation2 + $0xa98] sm:$0xff]  ;;  %v1093_v53 = vld [vmem:[#allocation2 + $0xa80] sm:$0xff] }
 0x13f   :  { %v1104_v50 = vld [vmem:[#allocation2 + $0xad8] sm:$0xff]  ;;  %v1051_v61 = vld [vmem:[#allocation2 + $0x930] sm:$0xff] }
 0x140   :  { %4591 = vmatpush1.bf16.msra.mxu0 %v4590_v62  ;;  %4623 = vmatpush1.bf16.msra.mxu1 %v4622_v0  ;;  %v1032_v62 = vld [vmem:[#allocation2 + $0x898] sm:$0xff]  ;;  %v4692_v57 = vpack.c.bf16 %v1104_v50, %v1096_v49  ;;  %v6110_v49 = vpop.permute.xlu1 %1006  ;;  %v1058_v50 = vld [vmem:[#allocation2 + $0x968] sm:$0xff] }
 0x141   :  { %4593 = vmatprep.subr.bf16.mxu0 %v4592_v4  ;;  %4625 = vmatprep.subr.bf16.mxu1 %v4624_v5  ;;  %v1040_v0 = vld [vmem:[#allocation2 + $0x8d8] sm:$0xff]  ;;  %v1029_v4 = vld [vmem:[#allocation2 + $0x880] sm:$0xff]  ;;  %vm1009_vm5 = vcmp.eq.s32.totalorder %v6110_v49, %v6004_v54 }
 0x142   :  { %v1037_v5 = vld [vmem:[#allocation2 + $0x8c0] sm:$0xff]  ;;  %v4676_v12 = vpack.c.bf16 %v1040_v0, %v1032_v62  ;;  %v1112_v62 = vld [vmem:[#allocation2 + $0xb18] sm:$0xff] }
 0x143   :  { %v4646_v15 = vpack.c.bf16 %v1037_v5, %v1029_v4  ;;  %v1120_v0 = vld [vmem:[#allocation2 + $0xb58] sm:$0xff]  ;;  %v1109_v4 = vld [vmem:[#allocation2 + $0xb00] sm:$0xff] }
 0x144   :  { %4595 = vmatpush1.bf16.msra.mxu0 %v4594_v2  ;;  %4627 = vmatpush1.bf16.msra.mxu1 %v4626_v3  ;;  %v1048_v2 = vld [vmem:[#allocation2 + $0x918] sm:$0xff]  ;;  %v1117_v5 = vld [vmem:[#allocation2 + $0xb40] sm:$0xff]  ;;  %v4696_v7 = vpack.c.bf16 %v1120_v0, %v1112_v62  ;;  %v1059_v62 = vld [vmem:[#allocation2 + $0x970] sm:$0xff] }
 0x145   :  { %4597 = vmatprep.subr.bf16.mxu0 %v4596_v18  ;;  %4629 = vmatprep.subr.bf16.mxu1 %v4628_v19  ;;  %v1056_v3 = vld [vmem:[#allocation2 + $0x958] sm:$0xff]  ;;  %v1045_v18 = vld [vmem:[#allocation2 + $0x900] sm:$0xff]  ;;  %v1066_v0 = vld [vmem:[#allocation2 + $0x9a8] sm:$0xff] }
 0x146   :  { %v1053_v19 = vld [vmem:[#allocation2 + $0x940] sm:$0xff]  ;;  %v4680_v20 = vpack.c.bf16 %v1056_v3, %v1048_v2  ;;  %v1128_v2 = vld [vmem:[#allocation2 + $0xb98] sm:$0xff] }
 0x147   :  { %v1136_v3 = vld [vmem:[#allocation2 + $0xbd8] sm:$0xff] }
 0x148   :  { %4599 = vmatpush1.bf16.msra.mxu0 %v4598_v25  ;;  %4631 = vmatpush1.bf16.msra.mxu1 %v4630_v26  ;;  %v1072_v25 = vld [vmem:[#allocation2 + $0x9d8] sm:$0xff]  ;;  %v4650_v26 = vpack.c.bf16 %v1053_v19, %v1045_v18  ;;  %v1125_v18 = vld [vmem:[#allocation2 + $0xb80] sm:$0xff] }
 0x149   :  { %4601 = vmatprep.subr.bf16.mxu0 %v4600_v29  ;;  %4633 = vmatprep.subr.bf16.mxu1 %v4632_v30  ;;  %v1069_v29 = vld [vmem:[#allocation2 + $0x9c0] sm:$0xff]  ;;  %v4652_v30 = vpack.c.bf16 %v1070_v24, %v1062_v23  ;;  %v4684_v31 = vpack.c.bf16 %v1072_v25, %v1064_v11  ;;  %v1018_v23 = vld [vmem:[#allocation2 + $0x828] sm:$0xff]  ;;  %v1020_v11 = vld [vmem:[#allocation2 + $0x838] sm:$0xff] }
 0x14a   :  { %v4654_v35 = vpack.c.bf16 %v1069_v29, %v1061_v28  ;;  %v1133_v19 = vld [vmem:[#allocation2 + $0xbc0] sm:$0xff]  ;;  %v1026_v24 = vld [vmem:[#allocation2 + $0x868] sm:$0xff]  ;;  %v1028_v25 = vld [vmem:[#allocation2 + $0x878] sm:$0xff] }
 0x14b   :  { %v1017_v28 = vld [vmem:[#allocation2 + $0x820] sm:$0xff] }
 0x14c   :  { %4603 = vmatpush1.bf16.msra.mxu0 %v4602_v38  ;;  %4635 = vmatpush1.bf16.msra.mxu1 %v4634_v39  ;;  %v1088_v38 = vld [vmem:[#allocation2 + $0xa58] sm:$0xff]  ;;  %v4686_v39 = vpack.c.bf16 %v1071_v33, %v1063_v32  ;;  %v1025_v29 = vld [vmem:[#allocation2 + $0x860] sm:$0xff]  ;;  %v4736_v32 = vpack.c.bf16 %v1028_v25, %v1020_v11  ;;  %v1019_v33 = vld [vmem:[#allocation2 + $0x830] sm:$0xff] }
 0x14d   :  { %4605 = vmatprep.subr.bf16.mxu0 %v4604_v42  ;;  %4637 = vmatprep.subr.bf16.mxu1 %v4636_v43  ;;  %v4656_v42 = vpack.c.bf16 %v1086_v36, %v1078_v34  ;;  %v4688_v43 = vpack.c.bf16 %v1088_v38, %v1080_v37  ;;  %v1027_v34 = vld [vmem:[#allocation2 + $0x870] sm:$0xff]  ;;  %v1034_v36 = vld [vmem:[#allocation2 + $0x8a8] sm:$0xff]  ;;  %v1036_v38 = vld [vmem:[#allocation2 + $0x8b8] sm:$0xff] }
 0x14e   :  { %v1042_v37 = vld [vmem:[#allocation2 + $0x8e8] sm:$0xff]  ;;  %v1083_v25 = vld [vmem:[#allocation2 + $0xa30] sm:$0xff] }
 0x150   :  { %4607 = vmatpush1.bf16.msra.mxu0 %v4606_v51  ;;  %4639 = vmatpush1.bf16.msra.mxu1 %v4638_v52  ;;  %v4658_v51 = vpack.c.bf16 %v1085_v41, %v1077_v40  ;;  %v4690_v52 = vpack.c.bf16 %v1087_v45, %v1079_v44  ;;  %v4738_v40 = vpack.c.bf16 %v1027_v34, %v1019_v33  ;;  %v1033_v41 = vld [vmem:[#allocation2 + $0x8a0] sm:$0xff]  ;;  %v1035_v45 = vld [vmem:[#allocation2 + $0x8b0] sm:$0xff] }
 0x151   :  { %4641 = vmatprep.subr.bf16.mxu0 %v4640_v55  ;;  %4673 = vmatprep.subr.bf16.mxu1 %v4672_v56  ;;  %v1101_v55 = vld [vmem:[#allocation2 + $0xac0] sm:$0xff]  ;;  %v4660_v56 = vpack.c.bf16 %v1102_v47, %v1094_v46  ;;  %v1043_v46 = vld [vmem:[#allocation2 + $0x8f0] sm:$0xff]  ;;  %v1050_v47 = vld [vmem:[#allocation2 + $0x928] sm:$0xff] }
 0x152   :  { %v1097_v34 = vld [vmem:[#allocation2 + $0xaa0] sm:$0xff] }
 0x153   :  { %4274 = vmatmul.mubr.msk.f32.vlgmr.msra.gmra.mrb[4].mxu0 %vm115_vm2, %v5856_v10  ;;  %4276 = vmatmul.mubr.msk.f32.vlgmr.msra.gmra.mrb[4].mxu1 %vm115_vm2, %v5856_v10 }
 0x154   :  { %4643 = vmatpush1.bf16.msra.mxu0 %v4642_v1  ;;  %4675 = vmatpush1.bf16.msra.mxu1 %v4674_v63  ;;  %v4662_v1 = vpack.c.bf16 %v1101_v55, %v1093_v53  ;;  %v4694_v63 = vpack.c.bf16 %v1103_v59, %v1095_v58  ;;  %v5858_v53 = vmov 6   ;;  %v1057_v58 = vld [vmem:[#allocation2 + $0x960] sm:$0xff]  ;;  %v4712_v59 = vpack.c.bf16 %v1058_v50, %v1050_v47 }
 0x155   :  { %918 = vmatprep.mubr.f32.mxu0 %v5852_v13  ;;  %995 = vmatprep.mubr.f32.mxu1 %v5852_v13  ;;  %v1121_v47 = vld [vmem:[#allocation2 + $0xb60] sm:$0xff] }
 0x156   :  { %4645 = vmatprep.subr.bf16.mxu0 %v4644_v9  ;;  %4677 = vmatprep.subr.bf16.mxu1 %v4676_v12  ;;  %v1119_v9 = vld [vmem:[#allocation2 + $0xb50] sm:$0xff]  ;;  %v1126_v12 = vld [vmem:[#allocation2 + $0xb88] sm:$0xff] }
 0x157   :  { %4275 = vmatmul.mubr.msk.f32.gmra.mrb[6].mxu0 %vm116_vm3, %v5856_v10  ;;  %4277 = vmatmul.mubr.msk.f32.gmra.mrb[6].mxu1 %vm116_vm3, %v5856_v10 }
 0x158   :  { %4647 = vmatpush1.bf16.msra.mxu0 %v4646_v15  ;;  %4679 = vmatpush1.bf16.msra.mxu1 %v4678_v17  ;;  %v4666_v15 = vpack.c.bf16 %v1117_v5, %v1109_v4  ;;  %v4698_v17 = vpack.c.bf16 %v1119_v9, %v1111_v8  ;;  %v1076_v4 = vld [vmem:[#allocation2 + $0x9f8] sm:$0xff]  ;;  %v1073_v8 = vld [vmem:[#allocation2 + $0x9e0] sm:$0xff] }
 0x159   :  { %4649 = vmatprep.subr.bf16.mxu0 %v4648_v16  ;;  %4681 = vmatprep.subr.bf16.mxu1 %v4680_v20  ;;  %v4668_v16 = vpack.c.bf16 %v1134_v14, %v1126_v12  ;;  %v4700_v20 = vpack.c.bf16 %v1136_v3, %v1128_v2  ;;  %v1067_v14 = vld [vmem:[#allocation2 + $0x9b0] sm:$0xff]  ;;  %v1082_v3 = vld [vmem:[#allocation2 + $0xa28] sm:$0xff] }
 0x15a   :  { %1205 = vmatprep.mubr.f32.mxu0 %v5852_v13  ;;  %1282 = vmatprep.mubr.f32.mxu1 %v5852_v13  ;;  %v1075_v2 = vld [vmem:[#allocation2 + $0x9f0] sm:$0xff] }
 0x15b   :  { %5650 = vset.pattern.permute.xlu1 %v5858_v53  ;;  %5651 = vset.pattern.permute.xlu0 %v5858_v53  ;;  %v1123_v53 = vld [vmem:[#allocation2 + $0xb70] sm:$0xff] }
 0x15c   :  { %4651 = vmatpush1.bf16.msra.mxu0 %v4650_v26  ;;  %4683 = vmatpush1.bf16.msra.mxu1 %v4682_v27  ;;  %v4670_v26 = vpack.c.bf16 %v1133_v19, %v1125_v18  ;;  %v4702_v27 = vpack.c.bf16 %v1135_v22, %v1127_v21  ;;  %v1092_v18 = vld [vmem:[#allocation2 + $0xa78] sm:$0xff]  ;;  %v6137_v19 = vld [vmem:[%s6452_s0] sm:$0xff]  ;;  %v4750_v21 = vpack.c.bf16 %v1075_v2, %v1067_v14 }
 0x15d   :  { %4653 = vmatprep.subr.bf16.mxu0 %v4652_v30  ;;  %4685 = vmatprep.subr.bf16.mxu1 %v4684_v31  ;;  %v6106_v30 = vpop.permute.xlu0 %1003  ;;  %v4704_v31 = vpack.c.bf16 %v1026_v24, %v1018_v23  ;;  %v1081_v22 = vld [vmem:[#allocation2 + $0xa20] sm:$0xff] }
 0x15e   :  { %vm1008_vm4 = vcmp.eq.s32.totalorder %v6106_v30, %v6004_v54  ;;  %2855 = vperm.xlu1 %5650, %v6137_v19   ;;  %v1089_v23 = vld [vmem:[#allocation2 + $0xa60] sm:$0xff]  ;;  %v1527_v30 = vld [vmem:[#allocation2 + $0xd98] sm:$0xff] }
 0x15f   :  { %v1476_v14 = vld [vmem:[#allocation2 + $0xc00] sm:$0xff] }
 0x160   :  { %4655 = vmatpush1.bf16.msra.mxu0 %v4654_v35  ;;  %4687 = vmatpush1.bf16.msra.mxu1 %v4686_v39  ;;  %v1044_v35 = vld [vmem:[#allocation2 + $0x8f8] sm:$0xff]  ;;  %v4706_v39 = vpack.c.bf16 %v1025_v29, %v1017_v28  ;;  %v1106_v28 = vld [vmem:[#allocation2 + $0xae8] sm:$0xff] }
 0x161   :  { %4657 = vmatprep.subr.bf16.mxu0 %v4656_v42  ;;  %4689 = vmatprep.subr.bf16.mxu1 %v4688_v43  ;;  %v1041_v42 = vld [vmem:[#allocation2 + $0x8e0] sm:$0xff]  ;;  %v4708_v43 = vpack.c.bf16 %v1042_v37, %v1034_v36  ;;  %v4740_v44 = vpack.c.bf16 %v1044_v35, %v1036_v38  ;;  %v1100_v29 = vld [vmem:[#allocation2 + $0xab8] sm:$0xff]  ;;  %v1099_v35 = vld [vmem:[#allocation2 + $0xab0] sm:$0xff] }
 0x162   :  { %v4710_v55 = vpack.c.bf16 %v1041_v42, %v1033_v41  ;;  %v1105_v36 = vld [vmem:[#allocation2 + $0xae0] sm:$0xff]  ;;  %v1122_v41 = vld [vmem:[#allocation2 + $0xb68] sm:$0xff]  ;;  %v1116_v42 = vld [vmem:[#allocation2 + $0xb38] sm:$0xff] }
 0x164   :  { %4659 = vmatpush1.bf16.msra.mxu0 %v4658_v51  ;;  %4691 = vmatpush1.bf16.msra.mxu1 %v4690_v52  ;;  %v1052_v51 = vld [vmem:[#allocation2 + $0x938] sm:$0xff] }
 0x165   :  { %4661 = vmatprep.subr.bf16.mxu0 %v4660_v56  ;;  %4693 = vmatprep.subr.bf16.mxu1 %v4692_v57  ;;  %v1060_v52 = vld [vmem:[#allocation2 + $0x978] sm:$0xff]  ;;  %v4742_v56 = vpack.c.bf16 %v1043_v46, %v1035_v45  ;;  %v1049_v57 = vld [vmem:[#allocation2 + $0x920] sm:$0xff] }
 0x166   :  { %v4744_v60 = vpack.c.bf16 %v1060_v52, %v1052_v51  ;;  %v4714_v5 = vpack.c.bf16 %v1057_v58, %v1049_v57  ;;  %v1113_v46 = vld [vmem:[#allocation2 + $0xb20] sm:$0xff]  ;;  %v1115_v52 = vld [vmem:[#allocation2 + $0xb30] sm:$0xff]  ;;  %v1132_v57 = vld [vmem:[#allocation2 + $0xbb8] sm:$0xff] }
 0x167   :  { %v1140_v58 = vld [vmem:[#allocation2 + $0xbf8] sm:$0xff] }
 0x168   :  { %4663 = vmatpush1.bf16.msra.mxu0 %v4662_v1  ;;  %4695 = vmatpush1.bf16.msra.mxu1 %v4694_v63  ;;  %v1074_v1 = vld [vmem:[#allocation2 + $0x9e8] sm:$0xff]  ;;  %v1068_v63 = vld [vmem:[#allocation2 + $0x9b8] sm:$0xff] }
 0x169   :  { %4665 = vmatprep.subr.bf16.mxu0 %v4664_v6  ;;  %4697 = vmatprep.subr.bf16.mxu1 %v4696_v7  ;;  %v4746_v6 = vpack.c.bf16 %v1059_v62, %v1051_v61  ;;  %v1065_v7 = vld [vmem:[#allocation2 + $0x9a0] sm:$0xff]  ;;  %v4716_v9 = vpack.c.bf16 %v1074_v1, %v1066_v0  ;;  %v4748_v12 = vpack.c.bf16 %v1076_v4, %v1068_v63  ;;  %v1131_v63 = vld [vmem:[#allocation2 + $0xbb0] sm:$0xff] }
 0x16a   :  { %v1129_v61 = vld [vmem:[#allocation2 + $0xba0] sm:$0xff]  ;;  %v4764_v1 = vpack.c.bf16 %v1140_v58, %v1132_v57  ;;  %v1139_v4 = vld [vmem:[#allocation2 + $0xbf0] sm:$0xff]  ;;  %v1541_v58 = vld [vmem:[#allocation2 + $0xe08] sm:$0xff] }
 0x16b   :  { %v1137_v62 = vld [vmem:[#allocation2 + $0xbe0] sm:$0xff]  ;;  %v1534_v57 = vld [vmem:[#allocation2 + $0xdd0] sm:$0xff] }
 0x16c   :  { %4667 = vmatpush1.bf16.msra.mxu0 %v4666_v15  ;;  %4699 = vmatpush1.bf16.msra.mxu1 %v4698_v17  ;;  %v1090_v15 = vld [vmem:[#allocation2 + $0xa68] sm:$0xff]  ;;  %v1084_v17 = vld [vmem:[#allocation2 + $0xa38] sm:$0xff] }
 0x16d   :  { %4669 = vmatprep.subr.bf16.mxu0 %v4668_v16  ;;  %4701 = vmatprep.subr.bf16.mxu1 %v4700_v20  ;;  %v6143_v16 = vld [vmem:[%s6452_s0 + $0x8] sm:$0xff]  ;;  %v4718_v20 = vpack.c.bf16 %v1073_v8, %v1065_v7  ;;  %v4720_v24 = vpack.c.bf16 %v1090_v15, %v1082_v3  ;;  %v4752_v11 = vpack.c.bf16 %v1092_v18, %v1084_v17  ;;  %v1479_v7 = vld [vmem:[#allocation2 + $0xc18] sm:$0xff]  ;;  %v1484_v15 = vld [vmem:[#allocation2 + $0xc40] sm:$0xff]  ;;  %s5860_s0 = smov [#allocation13]  }
 0x16e   :  { %2858 = vperm.xlu0 %5651, %v6143_v16   ;;  %v1487_v8 = vld [vmem:[#allocation2 + $0xc58] sm:$0xff]  ;;  %v1478_v17 = vld [vmem:[#allocation2 + $0xc10] sm:$0xff]  ;;  %s4247_s12 = sshll.u32 %s5860_s0, 4  ;;  %s4248_s12 = int_to_ptr.vmem [resolvable:$true] %s4247_s12 }
 0x16f   :  { %v4800_v3 = vpack.c.bf16 %v1487_v8, %v1479_v7  ;;  %v1486_v18 = vld [vmem:[#allocation2 + $0xc50] sm:$0xff]  ;;  %v1557_v7 = vld [vmem:[#allocation2 + $0xe88] sm:$0xff]  ;;  %s5804_s13 = scalar_lea.vmem %s4248_s12, 256  ;;  %p5809_p7 = scmp.lt.s32.totalorder %s4248_s12, %s4248_s12 }
 0x170   :  { %4671 = vmatpush1.bf16.msra.mxu0 %v4670_v26  ;;  %4703 = vmatpush1.bf16.msra.mxu1 %v4702_v27  ;;  %v1091_v26 = vld [vmem:[#allocation2 + $0xa70] sm:$0xff]  ;;  %v1098_v27 = vld [vmem:[#allocation2 + $0xaa8] sm:$0xff]  ;;  %p5805_p6 = scmp.ne.s32.totalorder %s4248_s12, %s5804_s13  ;;  %p5810_p8 = scmp.lt.s32.totalorder %s5804_s13, %s5804_s13 }
 0x171   :  { %4705 = vmatprep.subr.bf16.mxu0 %v4704_v31  ;;  %4737 = vmatprep.subr.bf16.mxu1 %v4736_v32  ;;  %v1108_v31 = vld [vmem:[#allocation2 + $0xaf8] sm:$0xff]  ;;  %v4722_v32 = vpack.c.bf16 %v1089_v23, %v1081_v22  ;;  %v4754_v33 = vpack.c.bf16 %v1091_v26, %v1083_v25  ;;  %v4724_v37 = vpack.c.bf16 %v1106_v28, %v1098_v27  ;;  %v1492_v25 = vld [vmem:[#allocation2 + $0xc80] sm:$0xff]  ;;  %v1494_v27 = vld [vmem:[#allocation2 + $0xc90] sm:$0xff] }
 0x172   :  { %v4756_v38 = vpack.c.bf16 %v1108_v31, %v1100_v29  ;;  %v1495_v22 = vld [vmem:[#allocation2 + $0xc98] sm:$0xff]  ;;  %v1500_v26 = vld [vmem:[#allocation2 + $0xcc0] sm:$0xff]  ;;  %v1502_v28 = vld [vmem:[#allocation2 + $0xcd0] sm:$0xff]  ;;  %p5811_p9 = por %p5810_p8, %p5809_p7 }
 0x173   :  { %4278 = vmatmul.mubr.msk.f32.vlgmr.msra.gmra.mrb[0].mxu0 %vm1008_vm4, %v5856_v10  ;;  %4280 = vmatmul.mubr.msk.f32.vlgmr.msra.gmra.mrb[0].mxu1 %vm1008_vm4, %v5856_v10  ;;  %v1503_v23 = vld [vmem:[#allocation2 + $0xcd8] sm:$0xff]  ;;  %v1509_v29 = vld [vmem:[#allocation2 + $0xd08] sm:$0xff] }
 0x174   :  { %4707 = vmatpush1.bf16.msra.mxu0 %v4706_v39  ;;  %4739 = vmatpush1.bf16.msra.mxu1 %v4738_v40  ;;  %v1107_v39 = vld [vmem:[#allocation2 + $0xaf0] sm:$0xff]  ;;  %v1114_v40 = vld [vmem:[#allocation2 + $0xb28] sm:$0xff]  ;;  %p5812_p10 = pnand %p5811_p9, %p5805_p6 }
 0x175   :  { %4709 = vmatprep.subr.bf16.mxu0 %v4708_v43  ;;  %4741 = vmatprep.subr.bf16.mxu1 %v4740_v44  ;;  %v1124_v43 = vld [vmem:[#allocation2 + $0xb78] sm:$0xff]  ;;  %v4726_v44 = vpack.c.bf16 %v1105_v36, %v1097_v34  ;;  %v4758_v45 = vpack.c.bf16 %v1107_v39, %v1099_v35  ;;  %v4728_v50 = vpack.c.bf16 %v1122_v41, %v1114_v40  ;;  %v1508_v35 = vld [vmem:[#allocation2 + $0xd00] sm:$0xff]  ;;  %v1565_v8 = vld [vmem:[#allocation2 + $0xec8] sm:$0xff] }
 0x176   :  { %1211 = vmatprep.mubr.f32.mxu0 %v5852_v13  ;;  %1288 = vmatprep.mubr.f32.mxu1 %v5852_v13  ;;  %v4760_v51 = vpack.c.bf16 %v1124_v43, %v1116_v42  ;;  %v1511_v34 = vld [vmem:[#allocation2 + $0xd18] sm:$0xff]  ;;  %v1516_v39 = vld [vmem:[#allocation2 + $0xd40] sm:$0xff]  ;;  %v1510_v42 = vld [vmem:[#allocation2 + $0xd10] sm:$0xff] }
 0x177   :  { %4279 = vmatmul.mubr.msk.f32.gmra.mrb[2].mxu0 %vm1009_vm5, %v5856_v10  ;;  %4281 = vmatmul.mubr.msk.f32.gmra.mrb[2].mxu1 %vm1009_vm5, %v5856_v10  ;;  %v1519_v36 = vld [vmem:[#allocation2 + $0xd58] sm:$0xff]  ;;  %v1518_v43 = vld [vmem:[#allocation2 + $0xd50] sm:$0xff] }
 0x178   :  { %4711 = vmatpush1.bf16.msra.mxu0 %v4710_v55  ;;  %4743 = vmatpush1.bf16.msra.mxu1 %v4742_v56  ;;  %v1130_v55 = vld [vmem:[#allocation2 + $0xba8] sm:$0xff]  ;;  %v4808_v41 = vpack.c.bf16 %v1519_v36, %v1511_v34 }
 0x179   :  { %4713 = vmatprep.subr.bf16.mxu0 %v4712_v59  ;;  %4745 = vmatprep.subr.bf16.mxu1 %v4744_v60  ;;  %v1138_v56 = vld [vmem:[#allocation2 + $0xbe8] sm:$0xff]  ;;  %v4730_v59 = vpack.c.bf16 %v1121_v47, %v1113_v46  ;;  %v4762_v60 = vpack.c.bf16 %v1123_v53, %v1115_v52  ;;  %v1535_v46 = vld [vmem:[#allocation2 + $0xdd8] sm:$0xff]  ;;  %v4778_v47 = vpack.c.bf16 %v1516_v39, %v1508_v35  ;;  %v1532_v52 = vld [vmem:[#allocation2 + $0xdc0] sm:$0xff] }
 0x17a   :  { %1359 = vmatprep.mubr.f32.mxu0 %v5852_v13  ;;  %1436 = vmatprep.mubr.f32.mxu1 %v5852_v13  ;;  %v4732_v0 = vpack.c.bf16 %v1138_v56, %v1130_v55  ;;  %v4812_v55 = vpack.c.bf16 %v1535_v46, %v1527_v30  ;;  %v1526_v56 = vld [vmem:[#allocation2 + $0xd90] sm:$0xff]  ;;  %v1589_v34 = vld [vmem:[#allocation2 + $0xf88] sm:$0xff] }
 0x17b   :  { %v1597_v36 = vld [vmem:[#allocation2 + $0xfc8] sm:$0xff] }
 0x17c   :  { %4715 = vmatpush1.bf16.msra.mxu0 %v4714_v5  ;;  %4747 = vmatpush1.bf16.msra.mxu1 %v4746_v6  ;;  %v1477_v5 = vld [vmem:[#allocation2 + $0xc08] sm:$0xff] }
 0x17d   :  { %4717 = vmatprep.subr.bf16.mxu0 %v4716_v9  ;;  %4749 = vmatprep.subr.bf16.mxu1 %v4748_v12  ;;  %v1485_v6 = vld [vmem:[#allocation2 + $0xc48] sm:$0xff]  ;;  %v4734_v9 = vpack.c.bf16 %v1137_v62, %v1129_v61  ;;  %v4766_v12 = vpack.c.bf16 %v1139_v4, %v1131_v63  ;;  %v1551_v61 = vld [vmem:[#allocation2 + $0xe58] sm:$0xff]  ;;  %v4814_v62 = vpack.c.bf16 %v1534_v57, %v1526_v56  ;;  %v6166_v56 = vpop.permute.xlu1 %1466 }
 0x17e   :  { %v4768_v2 = vpack.c.bf16 %v1485_v6, %v1477_v5  ;;  %v1542_v5 = vld [vmem:[#allocation2 + $0xe10] sm:$0xff]  ;;  %v1481_v30 = vld [vmem:[#allocation2 + $0xc28] sm:$0xff]  ;;  %vm1471_vm6 = vcmp.eq.s32.totalorder %v6166_v56, %v6004_v54  ;;  %v1990_v56 = vld [vmem:[#allocation2 + $0x1198] sm:$0xff] }
 0x17f   :  { %v1550_v6 = vld [vmem:[#allocation2 + $0xe50] sm:$0xff]  ;;  %v1489_v46 = vld [vmem:[#allocation2 + $0xc68] sm:$0xff] }
 0x180   :  { %4719 = vmatpush1.bf16.msra.mxu0 %v4718_v20  ;;  %4751 = vmatpush1.bf16.msra.mxu1 %v4750_v21  ;;  %v1493_v20 = vld [vmem:[#allocation2 + $0xc88] sm:$0xff]  ;;  %v4832_v57 = vpack.c.bf16 %v1489_v46, %v1481_v30 }
 0x181   :  { %4721 = vmatprep.subr.bf16.mxu0 %v4720_v24  ;;  %4753 = vmatprep.subr.bf16.mxu1 %v4752_v11  ;;  %v1501_v21 = vld [vmem:[#allocation2 + $0xcc8] sm:$0xff]  ;;  %v4770_v24 = vpack.c.bf16 %v1484_v15, %v1476_v14  ;;  %v4802_v11 = vpack.c.bf16 %v1486_v18, %v1478_v17  ;;  %v1564_v15 = vld [vmem:[#allocation2 + $0xec0] sm:$0xff]  ;;  %v4788_v17 = vpack.c.bf16 %v1565_v8, %v1557_v7 }
 0x182   :  { %v4772_v31 = vpack.c.bf16 %v1501_v21, %v1493_v20  ;;  %v1558_v20 = vld [vmem:[#allocation2 + $0xe90] sm:$0xff] }
 0x183   :  { %v1566_v21 = vld [vmem:[#allocation2 + $0xed0] sm:$0xff] }
 0x184   :  { %4723 = vmatpush1.bf16.msra.mxu0 %v4722_v32  ;;  %4755 = vmatpush1.bf16.msra.mxu1 %v4754_v33  ;;  %v4804_v32 = vpack.c.bf16 %v1503_v23, %v1495_v22  ;;  %v1517_v33 = vld [vmem:[#allocation2 + $0xd48] sm:$0xff] }
 0x185   :  { %4725 = vmatprep.subr.bf16.mxu0 %v4724_v37  ;;  %4757 = vmatprep.subr.bf16.mxu1 %v4756_v38  ;;  %v4774_v37 = vpack.c.bf16 %v1500_v26, %v1492_v25  ;;  %v4806_v38 = vpack.c.bf16 %v1502_v28, %v1494_v27  ;;  %v4776_v40 = vpack.c.bf16 %v1517_v33, %v1509_v29  ;;  %v1573_v22 = vld [vmem:[#allocation2 + $0xf08] sm:$0xff]  ;;  %v1572_v27 = vld [vmem:[#allocation2 + $0xf00] sm:$0xff]  ;;  %v1582_v33 = vld [vmem:[#allocation2 + $0xf50] sm:$0xff] }
 0x186   :  { %v1581_v23 = vld [vmem:[#allocation2 + $0xf48] sm:$0xff]  ;;  %v4822_v26 = vpack.c.bf16 %v1566_v21, %v1558_v20  ;;  %v1580_v28 = vld [vmem:[#allocation2 + $0xf40] sm:$0xff] }
 0x187   :  { %v4792_v29 = vpack.c.bf16 %v1581_v23, %v1573_v22  ;;  %v4794_v35 = vpack.c.bf16 %v1580_v28, %v1572_v27  ;;  %v1512_v20 = vld [vmem:[#allocation2 + $0xd20] sm:$0xff]  ;;  %v1531_v27 = vld [vmem:[#allocation2 + $0xdb8] sm:$0xff] }
 0x188   :  { %4727 = vmatpush1.bf16.msra.mxu0 %v4726_v44  ;;  %4759 = vmatpush1.bf16.msra.mxu1 %v4758_v45  ;;  %v1525_v44 = vld [vmem:[#allocation2 + $0xd88] sm:$0xff]  ;;  %v1520_v21 = vld [vmem:[#allocation2 + $0xd60] sm:$0xff]  ;;  %v1539_v28 = vld [vmem:[#allocation2 + $0xdf8] sm:$0xff] }
 0x189   :  { %4729 = vmatprep.subr.bf16.mxu0 %v4728_v50  ;;  %4761 = vmatprep.subr.bf16.mxu1 %v4760_v51  ;;  %v1533_v45 = vld [vmem:[#allocation2 + $0xdc8] sm:$0xff]  ;;  %v4810_v50 = vpack.c.bf16 %v1518_v43, %v1510_v42  ;;  %v1524_v51 = vld [vmem:[#allocation2 + $0xd80] sm:$0xff]  ;;  %v4796_v42 = vpack.c.bf16 %v1597_v36, %v1589_v34  ;;  %v4876_v36 = vpack.c.bf16 %v1539_v28, %v1531_v27 }
 0x18a   :  { %v4780_v53 = vpack.c.bf16 %v1533_v45, %v1525_v44  ;;  %v4782_v49 = vpack.c.bf16 %v1532_v52, %v1524_v51  ;;  %v1590_v44 = vld [vmem:[#allocation2 + $0xf90] sm:$0xff]  ;;  %v1940_v27 = vld [vmem:[#allocation2 + $0x1008] sm:$0xff] }
 0x18b   :  { %v1598_v45 = vld [vmem:[#allocation2 + $0xfd0] sm:$0xff]  ;;  %v1948_v28 = vld [vmem:[#allocation2 + $0x1048] sm:$0xff] }
 0x18c   :  { %4731 = vmatpush1.bf16.msra.mxu0 %v4730_v59  ;;  %4763 = vmatpush1.bf16.msra.mxu1 %v4762_v60  ;;  %v1549_v59 = vld [vmem:[#allocation2 + $0xe48] sm:$0xff]  ;;  %v1543_v60 = vld [vmem:[#allocation2 + $0xe18] sm:$0xff]  ;;  %v4830_v52 = vpack.c.bf16 %v1598_v45, %v1590_v44  ;;  %v1544_v44 = vld [vmem:[#allocation2 + $0xe20] sm:$0xff] }
 0x18d   :  { %4733 = vmatprep.subr.bf16.mxu0 %v4732_v0  ;;  %4765 = vmatprep.subr.bf16.mxu1 %v4764_v1  ;;  %v1540_v0 = vld [vmem:[#allocation2 + $0xe00] sm:$0xff]  ;;  %v4784_v63 = vpack.c.bf16 %v1549_v59, %v1541_v58  ;;  %v4816_v4 = vpack.c.bf16 %v1551_v61, %v1543_v60  ;;  %v1482_v59 = vld [vmem:[#allocation2 + $0xc30] sm:$0xff]  ;;  %v1497_v61 = vld [vmem:[#allocation2 + $0xca8] sm:$0xff] }
 0x18e   :  { %v1548_v1 = vld [vmem:[#allocation2 + $0xe40] sm:$0xff]  ;;  %v1490_v60 = vld [vmem:[#allocation2 + $0xc70] sm:$0xff] }
 0x18f   :  { %v4786_v14 = vpack.c.bf16 %v1548_v1, %v1540_v0  ;;  %v1507_v0 = vld [vmem:[#allocation2 + $0xcf8] sm:$0xff]  ;;  %v5859_v1 = vmov 7   ;;  %v1552_v45 = vld [vmem:[#allocation2 + $0xe60] sm:$0xff] }
 0x190   :  { %4735 = vmatpush1.bf16.msra.mxu0 %v4734_v9  ;;  %4767 = vmatpush1.bf16.msra.mxu1 %v4766_v12  ;;  %v1559_v9 = vld [vmem:[#allocation2 + $0xe98] sm:$0xff] }
 0x191   :  { %4769 = vmatprep.subr.bf16.mxu0 %v4768_v2  ;;  %4801 = vmatprep.subr.bf16.mxu1 %v4800_v3  ;;  %v1567_v12 = vld [vmem:[#allocation2 + $0xed8] sm:$0xff]  ;;  %v4818_v2 = vpack.c.bf16 %v1550_v6, %v1542_v5  ;;  %v1556_v3 = vld [vmem:[#allocation2 + $0xe80] sm:$0xff] }
 0x192   :  { %v4820_v18 = vpack.c.bf16 %v1567_v12, %v1559_v9  ;;  %v4790_v25 = vpack.c.bf16 %v1564_v15, %v1556_v3  ;;  %5652 = vset.pattern.permute.xlu1 %v5859_v1  ;;  %5653 = vset.pattern.permute.xlu0 %v5859_v1  ;;  %v1496_v5 = vld [vmem:[#allocation2 + $0xca0] sm:$0xff]  ;;  %v1498_v9 = vld [vmem:[#allocation2 + $0xcb0] sm:$0xff]  ;;  %v1521_v3 = vld [vmem:[#allocation2 + $0xd68] sm:$0xff] }
 0x193   :  { %4282 = vmatmul.mubr.msk.f32.vlgmr.msra.gmra.mrb[4].mxu0 %vm1008_vm4, %v5856_v10  ;;  %4284 = vmatmul.mubr.msk.f32.vlgmr.msra.gmra.mrb[4].mxu1 %vm1008_vm4, %v5856_v10  ;;  %v1504_v6 = vld [vmem:[#allocation2 + $0xce0] sm:$0xff]  ;;  %v1506_v12 = vld [vmem:[#allocation2 + $0xcf0] sm:$0xff]  ;;  %v1523_v15 = vld [vmem:[#allocation2 + $0xd78] sm:$0xff] }
 0x194   :  { %4771 = vmatpush1.bf16.msra.mxu0 %v4770_v24  ;;  %4803 = vmatpush1.bf16.msra.mxu1 %v4802_v11  ;;  %v1575_v24 = vld [vmem:[#allocation2 + $0xf18] sm:$0xff]  ;;  %v1585_v1 = vld [vmem:[#allocation2 + $0xf68] sm:$0xff] }
 0x195   :  { %1365 = vmatprep.mubr.f32.mxu0 %v5852_v13  ;;  %1442 = vmatprep.mubr.f32.mxu1 %v5852_v13  ;;  %v1583_v11 = vld [vmem:[#allocation2 + $0xf58] sm:$0xff] }
 0x196   :  { %4773 = vmatprep.subr.bf16.mxu0 %v4772_v31  ;;  %4805 = vmatprep.subr.bf16.mxu1 %v4804_v32  ;;  %v4824_v31 = vpack.c.bf16 %v1583_v11, %v1575_v24  ;;  %v1574_v32 = vld [vmem:[#allocation2 + $0xf10] sm:$0xff] }
 0x197   :  { %4283 = vmatmul.mubr.msk.f32.gmra.mrb[6].mxu0 %vm1009_vm5, %v5856_v10  ;;  %4285 = vmatmul.mubr.msk.f32.gmra.mrb[6].mxu1 %vm1009_vm5, %v5856_v10  ;;  %v4826_v39 = vpack.c.bf16 %v1582_v33, %v1574_v32  ;;  %v1514_v24 = vld [vmem:[#allocation2 + $0xd30] sm:$0xff]  ;;  %v1528_v32 = vld [vmem:[#allocation2 + $0xda0] sm:$0xff] }
 0x198   :  { %4775 = vmatpush1.bf16.msra.mxu0 %v4774_v37  ;;  %4807 = vmatpush1.bf16.msra.mxu1 %v4806_v38  ;;  %v1591_v37 = vld [vmem:[#allocation2 + $0xf98] sm:$0xff]  ;;  %v1522_v11 = vld [vmem:[#allocation2 + $0xd70] sm:$0xff]  ;;  %v1536_v33 = vld [vmem:[#allocation2 + $0xde0] sm:$0xff] }
 0x199   :  { %4777 = vmatprep.subr.bf16.mxu0 %v4776_v40  ;;  %4809 = vmatprep.subr.bf16.mxu1 %v4808_v41  ;;  %v1599_v38 = vld [vmem:[#allocation2 + $0xfd8] sm:$0xff]  ;;  %v1588_v40 = vld [vmem:[#allocation2 + $0xf80] sm:$0xff] }
 0x19a   :  { %1668 = vmatprep.mubr.f32.mxu0 %v5852_v13  ;;  %1745 = vmatprep.mubr.f32.mxu1 %v5852_v13  ;;  %v1596_v41 = vld [vmem:[#allocation2 + $0xfc0] sm:$0xff]  ;;  %v4828_v43 = vpack.c.bf16 %v1599_v38, %v1591_v37  ;;  %v1530_v37 = vld [vmem:[#allocation2 + $0xdb0] sm:$0xff] }
 0x19b   :  { %v4798_v51 = vpack.c.bf16 %v1596_v41, %v1588_v40  ;;  %3318 = vperm.xlu1 %5652, %v6137_v19   ;;  %v1515_v19 = vld [vmem:[#allocation2 + $0xd38] sm:$0xff]  ;;  %v1538_v38 = vld [vmem:[#allocation2 + $0xdf0] sm:$0xff] }
 0x19c   :  { %4779 = vmatpush1.bf16.msra.mxu0 %v4778_v47  ;;  %4811 = vmatpush1.bf16.msra.mxu1 %v4810_v50  ;;  %v1483_v47 = vld [vmem:[#allocation2 + $0xc38] sm:$0xff]  ;;  %v4872_v23 = vpack.c.bf16 %v1523_v15, %v1515_v19  ;;  %v1593_v19 = vld [vmem:[#allocation2 + $0xfa8] sm:$0xff] }
 0x19d   :  { %4781 = vmatprep.subr.bf16.mxu0 %v4780_v53  ;;  %4813 = vmatprep.subr.bf16.mxu1 %v4812_v55  ;;  %v1491_v50 = vld [vmem:[#allocation2 + $0xc78] sm:$0xff]  ;;  %v1480_v53 = vld [vmem:[#allocation2 + $0xc20] sm:$0xff]  ;;  %v1601_v15 = vld [vmem:[#allocation2 + $0xfe8] sm:$0xff] }
 0x19e   :  { %v1488_v55 = vld [vmem:[#allocation2 + $0xc60] sm:$0xff]  ;;  %v4864_v58 = vpack.c.bf16 %v1491_v50, %v1483_v47  ;;  %v1547_v40 = vld [vmem:[#allocation2 + $0xe38] sm:$0xff]  ;;  %v1546_v47 = vld [vmem:[#allocation2 + $0xe30] sm:$0xff] }
 0x19f   :  { %v1555_v41 = vld [vmem:[#allocation2 + $0xe78] sm:$0xff]  ;;  %3321 = vperm.xlu1 %5652, %v6143_v16   ;;  %v1554_v50 = vld [vmem:[#allocation2 + $0xe70] sm:$0xff] }
 0x1a0   :  { %4783 = vmatpush1.bf16.msra.mxu0 %v4782_v49  ;;  %4815 = vmatpush1.bf16.msra.mxu1 %v4814_v62  ;;  %v1505_v49 = vld [vmem:[#allocation2 + $0xce8] sm:$0xff]  ;;  %v1499_v62 = vld [vmem:[#allocation2 + $0xcb8] sm:$0xff]  ;;  %v4880_v46 = vpack.c.bf16 %v1555_v41, %v1547_v40  ;;  %v4882_v16 = vpack.c.bf16 %v1554_v50, %v1546_v47  ;;  %v1957_v47 = vld [vmem:[#allocation2 + $0x1090] sm:$0xff] }
 0x1a1   :  { %4785 = vmatprep.subr.bf16.mxu0 %v4784_v63  ;;  %4817 = vmatprep.subr.bf16.mxu1 %v4816_v4  ;;  %v4834_v63 = vpack.c.bf16 %v1488_v55, %v1480_v53  ;;  %v4866_v4 = vpack.c.bf16 %v1490_v60, %v1482_v59  ;;  %v4836_v7 = vpack.c.bf16 %v1505_v49, %v1497_v61  ;;  %v1563_v53 = vld [vmem:[#allocation2 + $0xeb8] sm:$0xff]  ;;  %v1568_v59 = vld [vmem:[#allocation2 + $0xee0] sm:$0xff]  ;;  %v1562_v49 = vld [vmem:[#allocation2 + $0xeb0] sm:$0xff] }
 0x1a2   :  { %v4868_v8 = vpack.c.bf16 %v1507_v0, %v1499_v62  ;;  %v1571_v55 = vld [vmem:[#allocation2 + $0xef8] sm:$0xff]  ;;  %v1570_v62 = vld [vmem:[#allocation2 + $0xef0] sm:$0xff]  ;;  %v1577_v0 = vld [vmem:[#allocation2 + $0xf28] sm:$0xff] }
 0x1a3   :  { %v4884_v61 = vpack.c.bf16 %v1571_v55, %v1563_v53  ;;  %v1956_v40 = vld [vmem:[#allocation2 + $0x1088] sm:$0xff]  ;;  %v1965_v50 = vld [vmem:[#allocation2 + $0x10d0] sm:$0xff] }
 0x1a4   :  { %4787 = vmatpush1.bf16.msra.mxu0 %v4786_v14  ;;  %4819 = vmatpush1.bf16.msra.mxu1 %v4818_v2  ;;  %v1513_v14 = vld [vmem:[#allocation2 + $0xd28] sm:$0xff]  ;;  %v6171_v2 = vpop.permute.xlu0 %1469 }
 0x1a5   :  { %4789 = vmatprep.subr.bf16.mxu0 %v4788_v17  ;;  %4821 = vmatprep.subr.bf16.mxu1 %v4820_v18  ;;  %v4838_v17 = vpack.c.bf16 %v1504_v6, %v1496_v5  ;;  %v4870_v18 = vpack.c.bf16 %v1506_v12, %v1498_v9  ;;  %vm1472_vm7 = vcmp.eq.s32.totalorder %v6171_v2, %v6004_v54  ;;  %v1964_v41 = vld [vmem:[#allocation2 + $0x10c8] sm:$0xff] }
 0x1a6   :  { %v4840_v22 = vpack.c.bf16 %v1521_v3, %v1513_v14  ;;  %v4886_v6 = vpack.c.bf16 %v1570_v62, %v1562_v49  ;;  %v4856_v9 = vpack.c.bf16 %v1585_v1, %v1577_v0  ;;  %v1578_v14 = vld [vmem:[#allocation2 + $0xf30] sm:$0xff]  ;;  %v1980_v55 = vld [vmem:[#allocation2 + $0x1148] sm:$0xff] }
 0x1a7   :  { %v1586_v3 = vld [vmem:[#allocation2 + $0xf70] sm:$0xff] }
 0x1a8   :  { %4791 = vmatpush1.bf16.msra.mxu0 %v4790_v25  ;;  %4823 = vmatpush1.bf16.msra.mxu1 %v4822_v26  ;;  %v1529_v25 = vld [vmem:[#allocation2 + $0xda8] sm:$0xff]  ;;  %v1973_v0 = vld [vmem:[#allocation2 + $0x1110] sm:$0xff] }
 0x1a9   :  { %4793 = vmatprep.subr.bf16.mxu0 %v4792_v29  ;;  %4825 = vmatprep.subr.bf16.mxu1 %v4824_v31  ;;  %v1537_v26 = vld [vmem:[#allocation2 + $0xde8] sm:$0xff]  ;;  %v4842_v29 = vpack.c.bf16 %v1520_v21, %v1512_v20  ;;  %v4874_v31 = vpack.c.bf16 %v1522_v11, %v1514_v24  ;;  %v4890_v21 = vpack.c.bf16 %v1586_v3, %v1578_v14  ;;  %v1981_v1 = vld [vmem:[#allocation2 + $0x1150] sm:$0xff] }
 0x1aa   :  { %v4844_v34 = vpack.c.bf16 %v1537_v26, %v1529_v25  ;;  %v4860_v24 = vpack.c.bf16 %v1601_v15, %v1593_v19  ;;  %v1594_v25 = vld [vmem:[#allocation2 + $0xfb0] sm:$0xff]  ;;  %v2004_v15 = vld [vmem:[#allocation2 + $0x1208] sm:$0xff] }
 0x1ab   :  { %v1602_v26 = vld [vmem:[#allocation2 + $0xff0] sm:$0xff] }
 0x1ac   :  { %4795 = vmatpush1.bf16.msra.mxu0 %v4794_v35  ;;  %4827 = vmatpush1.bf16.msra.mxu1 %v4826_v39  ;;  %v1545_v35 = vld [vmem:[#allocation2 + $0xe28] sm:$0xff]  ;;  %v1989_v3 = vld [vmem:[#allocation2 + $0x1190] sm:$0xff] }
 0x1ad   :  { %4797 = vmatprep.subr.bf16.mxu0 %v4796_v42  ;;  %4829 = vmatprep.subr.bf16.mxu1 %v4828_v43  ;;  %v1553_v39 = vld [vmem:[#allocation2 + $0xe68] sm:$0xff]  ;;  %v4846_v42 = vpack.c.bf16 %v1536_v33, %v1528_v32  ;;  %v4878_v43 = vpack.c.bf16 %v1538_v38, %v1530_v37  ;;  %v4894_v33 = vpack.c.bf16 %v1602_v26, %v1594_v25  ;;  %v1947_v38 = vld [vmem:[#allocation2 + $0x1040] sm:$0xff]  ;;  %v1997_v19 = vld [vmem:[#allocation2 + $0x11d0] sm:$0xff] }
 0x1ae   :  { %v4848_v30 = vpack.c.bf16 %v1553_v39, %v1545_v35  ;;  %v1941_v35 = vld [vmem:[#allocation2 + $0x1010] sm:$0xff] }
 0x1af   :  { %v1949_v39 = vld [vmem:[#allocation2 + $0x1050] sm:$0xff] }
 0x1b0   :  { %4799 = vmatpush1.bf16.msra.mxu0 %v4798_v51  ;;  %4831 = vmatpush1.bf16.msra.mxu1 %v4830_v52  ;;  %v1561_v51 = vld [vmem:[#allocation2 + $0xea8] sm:$0xff]  ;;  %v2005_v25 = vld [vmem:[#allocation2 + $0x1210] sm:$0xff] }
 0x1b1   :  { %4833 = vmatprep.subr.bf16.mxu0 %v4832_v57  ;;  %4865 = vmatprep.subr.bf16.mxu1 %v4864_v58  ;;  %v1569_v52 = vld [vmem:[#allocation2 + $0xee8] sm:$0xff]  ;;  %v4850_v57 = vpack.c.bf16 %v1552_v45, %v1544_v44  ;;  %v1560_v58 = vld [vmem:[#allocation2 + $0xea0] sm:$0xff]  ;;  %v4930_v45 = vpack.c.bf16 %v1949_v39, %v1941_v35  ;;  %v2013_v26 = vld [vmem:[#allocation2 + $0x1250] sm:$0xff] }
 0x1b2   :  { %v4852_v60 = vpack.c.bf16 %v1569_v52, %v1561_v51  ;;  %v4854_v5 = vpack.c.bf16 %v1568_v59, %v1560_v58  ;;  %v1972_v51 = vld [vmem:[#allocation2 + $0x1108] sm:$0xff]  ;;  %v4900_v52 = vpack.c.bf16 %v1964_v41, %v1956_v40  ;;  %v4934_v59 = vpack.c.bf16 %v1965_v50, %v1957_v47  ;;  %v2021_v35 = vld [vmem:[#allocation2 + $0x1290] sm:$0xff] }
 0x1b3   :  { %4286 = vmatmul.mubr.msk.f32.vlgmr.msra.gmra.mrb[0].mxu0 %vm1471_vm6, %v5856_v10  ;;  %4288 = vmatmul.mubr.msk.f32.vlgmr.msra.gmra.mrb[0].mxu1 %vm1471_vm6, %v5856_v10  ;;  %v4904_v49 = vpack.c.bf16 %v1980_v55, %v1972_v51  ;;  %v2029_v39 = vld [vmem:[#allocation2 + $0x12d0] sm:$0xff]  ;;  %v2036_v40 = vld [vmem:[#allocation2 + $0x1308] sm:$0xff] }
 0x1b4   :  { %4835 = vmatpush1.bf16.msra.mxu0 %v4834_v63  ;;  %4867 = vmatpush1.bf16.msra.mxu1 %v4866_v4  ;;  %v1579_v63 = vld [vmem:[#allocation2 + $0xf38] sm:$0xff]  ;;  %v2044_v41 = vld [vmem:[#allocation2 + $0x1348] sm:$0xff]  ;;  %v2037_v51 = vld [vmem:[#allocation2 + $0x1310] sm:$0xff] }
 0x1b5   :  { %4837 = vmatprep.subr.bf16.mxu0 %v4836_v7  ;;  %4869 = vmatprep.subr.bf16.mxu1 %v4868_v8  ;;  %v1587_v4 = vld [vmem:[#allocation2 + $0xf78] sm:$0xff]  ;;  %v1576_v7 = vld [vmem:[#allocation2 + $0xf20] sm:$0xff]  ;;  %v4920_v47 = vpack.c.bf16 %v2044_v41, %v2036_v40  ;;  %v2060_v55 = vld [vmem:[#allocation2 + $0x13c8] sm:$0xff] }
 0x1b6   :  { %1674 = vmatprep.mubr.f32.mxu0 %v5852_v13  ;;  %1751 = vmatprep.mubr.f32.mxu1 %v5852_v13  ;;  %v1584_v8 = vld [vmem:[#allocation2 + $0xf60] sm:$0xff]  ;;  %v4888_v12 = vpack.c.bf16 %v1587_v4, %v1579_v63  ;;  %v1988_v63 = vld [vmem:[#allocation2 + $0x1188] sm:$0xff]  ;;  %v1977_v40 = vld [vmem:[#allocation2 + $0x1130] sm:$0xff] }
 0x1b7   :  { %4287 = vmatmul.mubr.msk.f32.gmra.mrb[2].mxu0 %vm1472_vm7, %v5856_v10  ;;  %4289 = vmatmul.mubr.msk.f32.gmra.mrb[2].mxu1 %vm1472_vm7, %v5856_v10  ;;  %v4858_v20 = vpack.c.bf16 %v1584_v8, %v1576_v7  ;;  %v1996_v4 = vld [vmem:[#allocation2 + $0x11c8] sm:$0xff]  ;;  %v4938_v7 = vpack.c.bf16 %v1981_v1, %v1973_v0  ;;  %v1987_v8 = vld [vmem:[#allocation2 + $0x1180] sm:$0xff]  ;;  %v2053_v0 = vld [vmem:[#allocation2 + $0x1390] sm:$0xff] }
 0x1b8   :  { %4839 = vmatpush1.bf16.msra.mxu0 %v4838_v17  ;;  %4871 = vmatpush1.bf16.msra.mxu1 %v4870_v18  ;;  %v1595_v17 = vld [vmem:[#allocation2 + $0xfb8] sm:$0xff]  ;;  %v2061_v1 = vld [vmem:[#allocation2 + $0x13d0] sm:$0xff] }
 0x1b9   :  { %4841 = vmatprep.subr.bf16.mxu0 %v4840_v22  ;;  %4873 = vmatprep.subr.bf16.mxu1 %v4872_v23  ;;  %v1603_v18 = vld [vmem:[#allocation2 + $0xff8] sm:$0xff]  ;;  %v1592_v22 = vld [vmem:[#allocation2 + $0xfa0] sm:$0xff]  ;;  %v1985_v41 = vld [vmem:[#allocation2 + $0x1170] sm:$0xff] }
 0x1ba   :  { %1822 = vmatprep.mubr.f32.mxu0 %v5852_v13  ;;  %1899 = vmatprep.mubr.f32.mxu1 %v5852_v13  ;;  %v1600_v23 = vld [vmem:[#allocation2 + $0xfe0] sm:$0xff]  ;;  %v4892_v11 = vpack.c.bf16 %v1603_v18, %v1595_v17  ;;  %v2012_v17 = vld [vmem:[#allocation2 + $0x1248] sm:$0xff]  ;;  %v2006_v18 = vld [vmem:[#allocation2 + $0x1218] sm:$0xff] }
 0x1bb   :  { %v4862_v32 = vpack.c.bf16 %v1600_v23, %v1592_v22  ;;  %v2003_v22 = vld [vmem:[#allocation2 + $0x1200] sm:$0xff] }
 0x1bc   :  { %4843 = vmatpush1.bf16.msra.mxu0 %v4842_v29  ;;  %4875 = vmatpush1.bf16.msra.mxu1 %v4874_v31  ;;  %v1942_v29 = vld [vmem:[#allocation2 + $0x1018] sm:$0xff]  ;;  %v2011_v23 = vld [vmem:[#allocation2 + $0x1240] sm:$0xff] }
 0x1bd   :  { %4845 = vmatprep.subr.bf16.mxu0 %v4844_v34  ;;  %4877 = vmatprep.subr.bf16.mxu1 %v4876_v36  ;;  %v1950_v31 = vld [vmem:[#allocation2 + $0x1058] sm:$0xff]  ;;  %v1939_v34 = vld [vmem:[#allocation2 + $0x1000] sm:$0xff]  ;;  %v4896_v36 = vpack.c.bf16 %v1948_v28, %v1940_v27  ;;  %v2020_v27 = vld [vmem:[#allocation2 + $0x1288] sm:$0xff] }
 0x1be   :  { %v4928_v37 = vpack.c.bf16 %v1950_v31, %v1942_v29  ;;  %v4898_v44 = vpack.c.bf16 %v1947_v38, %v1939_v34  ;;  %v2028_v28 = vld [vmem:[#allocation2 + $0x12c8] sm:$0xff]  ;;  %v2022_v29 = vld [vmem:[#allocation2 + $0x1298] sm:$0xff]  ;;  %v2019_v34 = vld [vmem:[#allocation2 + $0x1280] sm:$0xff] }
 0x1bf   :  { %v2030_v31 = vld [vmem:[#allocation2 + $0x12d8] sm:$0xff] }
 0x1c0   :  { %4847 = vmatpush1.bf16.msra.mxu0 %v4846_v42  ;;  %4879 = vmatpush1.bf16.msra.mxu1 %v4878_v43  ;;  %v1958_v42 = vld [vmem:[#allocation2 + $0x1098] sm:$0xff]  ;;  %v4948_v38 = vpack.c.bf16 %v2030_v31, %v2022_v29  ;;  %v1984_v29 = vld [vmem:[#allocation2 + $0x1168] sm:$0xff] }
 0x1c1   :  { %4849 = vmatprep.subr.bf16.mxu0 %v4848_v30  ;;  %4881 = vmatprep.subr.bf16.mxu1 %v4880_v46  ;;  %v1966_v43 = vld [vmem:[#allocation2 + $0x10d8] sm:$0xff]  ;;  %v1955_v30 = vld [vmem:[#allocation2 + $0x1080] sm:$0xff] }
 0x1c2   :  { %v1963_v46 = vld [vmem:[#allocation2 + $0x10c0] sm:$0xff]  ;;  %v4932_v53 = vpack.c.bf16 %v1966_v43, %v1958_v42  ;;  %v2038_v42 = vld [vmem:[#allocation2 + $0x1318] sm:$0xff] }
 0x1c3   :  { %v4902_v58 = vpack.c.bf16 %v1963_v46, %v1955_v30  ;;  %v2046_v43 = vld [vmem:[#allocation2 + $0x1358] sm:$0xff]  ;;  %v2035_v30 = vld [vmem:[#allocation2 + $0x1300] sm:$0xff] }
 0x1c4   :  { %4851 = vmatpush1.bf16.msra.mxu0 %v4850_v57  ;;  %4883 = vmatpush1.bf16.msra.mxu1 %v4882_v16  ;;  %v1974_v57 = vld [vmem:[#allocation2 + $0x1118] sm:$0xff]  ;;  %v2043_v46 = vld [vmem:[#allocation2 + $0x1340] sm:$0xff]  ;;  %v4952_v50 = vpack.c.bf16 %v2046_v43, %v2038_v42  ;;  %v1992_v42 = vld [vmem:[#allocation2 + $0x11a8] sm:$0xff] }
 0x1c5   :  { %4853 = vmatprep.subr.bf16.mxu0 %v4852_v60  ;;  %4885 = vmatprep.subr.bf16.mxu1 %v4884_v61  ;;  %v1982_v16 = vld [vmem:[#allocation2 + $0x1158] sm:$0xff]  ;;  %v1971_v60 = vld [vmem:[#allocation2 + $0x1100] sm:$0xff]  ;;  %v2000_v43 = vld [vmem:[#allocation2 + $0x11e8] sm:$0xff] }
 0x1c6   :  { %v1979_v61 = vld [vmem:[#allocation2 + $0x1140] sm:$0xff]  ;;  %v4936_v62 = vpack.c.bf16 %v1982_v16, %v1974_v57  ;;  %v2054_v57 = vld [vmem:[#allocation2 + $0x1398] sm:$0xff] }
 0x1c7   :  { %v2062_v16 = vld [vmem:[#allocation2 + $0x13d8] sm:$0xff] }
 0x1c8   :  { %4855 = vmatpush1.bf16.msra.mxu0 %v4854_v5  ;;  %4887 = vmatpush1.bf16.msra.mxu1 %v4886_v6  ;;  %v1998_v5 = vld [vmem:[#allocation2 + $0x11d8] sm:$0xff]  ;;  %v4906_v6 = vpack.c.bf16 %v1979_v61, %v1971_v60  ;;  %v2051_v60 = vld [vmem:[#allocation2 + $0x1380] sm:$0xff] }
 0x1c9   :  { %4857 = vmatprep.subr.bf16.mxu0 %v4856_v9  ;;  %4889 = vmatprep.subr.bf16.mxu1 %v4888_v12  ;;  %v1995_v9 = vld [vmem:[#allocation2 + $0x11c0] sm:$0xff]  ;;  %v4908_v12 = vpack.c.bf16 %v1996_v4, %v1988_v63  ;;  %v4940_v14 = vpack.c.bf16 %v1998_v5, %v1990_v56  ;;  %v1944_v63 = vld [vmem:[#allocation2 + $0x1028] sm:$0xff]  ;;  %v1946_v56 = vld [vmem:[#allocation2 + $0x1038] sm:$0xff] }
 0x1ca   :  { %v4910_v2 = vpack.c.bf16 %v1995_v9, %v1987_v8  ;;  %v2059_v61 = vld [vmem:[#allocation2 + $0x13c0] sm:$0xff]  ;;  %v1952_v4 = vld [vmem:[#allocation2 + $0x1068] sm:$0xff]  ;;  %v1954_v5 = vld [vmem:[#allocation2 + $0x1078] sm:$0xff]  ;;  %v6216_v9 = vpop.permute.xlu1 %1929 }
 0x1cb   :  { %v1943_v8 = vld [vmem:[#allocation2 + $0x1020] sm:$0xff]  ;;  %vm1934_vm8 = vcmp.eq.s32.totalorder %v6216_v9, %v6004_v54  ;;  %v1978_v31 = vld [vmem:[#allocation2 + $0x1138] sm:$0xff] }
 0x1cc   :  { %4859 = vmatpush1.bf16.msra.mxu0 %v4858_v20  ;;  %4891 = vmatpush1.bf16.msra.mxu1 %v4890_v21  ;;  %v2014_v20 = vld [vmem:[#allocation2 + $0x1258] sm:$0xff]  ;;  %v4942_v21 = vpack.c.bf16 %v1997_v19, %v1989_v3  ;;  %v1951_v3 = vld [vmem:[#allocation2 + $0x1060] sm:$0xff]  ;;  %v1945_v19 = vld [vmem:[#allocation2 + $0x1030] sm:$0xff] }
 0x1cd   :  { %4861 = vmatprep.subr.bf16.mxu0 %v4860_v24  ;;  %4893 = vmatprep.subr.bf16.mxu1 %v4892_v11  ;;  %v4912_v24 = vpack.c.bf16 %v2012_v17, %v2004_v15  ;;  %v4944_v11 = vpack.c.bf16 %v2014_v20, %v2006_v18  ;;  %v1953_v15 = vld [vmem:[#allocation2 + $0x1070] sm:$0xff]  ;;  %v1960_v17 = vld [vmem:[#allocation2 + $0x10a8] sm:$0xff]  ;;  %v1962_v20 = vld [vmem:[#allocation2 + $0x10b8] sm:$0xff] }
 0x1ce   :  { %v1968_v18 = vld [vmem:[#allocation2 + $0x10e8] sm:$0xff]  ;;  %v2453_v9 = vld [vmem:[#allocation2 + $0x1598] sm:$0xff] }
 0x1d0   :  { %4863 = vmatpush1.bf16.msra.mxu0 %v4862_v32  ;;  %4895 = vmatpush1.bf16.msra.mxu1 %v4894_v33  ;;  %v4914_v32 = vpack.c.bf16 %v2011_v23, %v2003_v22  ;;  %v4946_v33 = vpack.c.bf16 %v2013_v26, %v2005_v25  ;;  %v4994_v22 = vpack.c.bf16 %v1953_v15, %v1945_v19  ;;  %v1959_v23 = vld [vmem:[#allocation2 + $0x10a0] sm:$0xff]  ;;  %v1969_v25 = vld [vmem:[#allocation2 + $0x10f0] sm:$0xff]  ;;  %v1976_v26 = vld [vmem:[#allocation2 + $0x1128] sm:$0xff] }
 0x1d1   :  { %4897 = vmatprep.subr.bf16.mxu0 %v4896_v36  ;;  %4929 = vmatprep.subr.bf16.mxu1 %v4928_v37  ;;  %v2027_v36 = vld [vmem:[#allocation2 + $0x12c0] sm:$0xff]  ;;  %v4916_v37 = vpack.c.bf16 %v2028_v28, %v2020_v27  ;;  %v4964_v27 = vpack.c.bf16 %v1968_v18, %v1960_v17  ;;  %v2025_v17 = vld [vmem:[#allocation2 + $0x12b0] sm:$0xff] }
 0x1d2   :  { %v2033_v18 = vld [vmem:[#allocation2 + $0x12f0] sm:$0xff] }
 0x1d3   :  { %4290 = vmatmul.mubr.msk.f32.vlgmr.msra.gmra.mrb[4].mxu0 %vm1471_vm6, %v5856_v10  ;;  %4292 = vmatmul.mubr.msk.f32.vlgmr.msra.gmra.mrb[4].mxu1 %vm1471_vm6, %v5856_v10 }
 0x1d4   :  { %4899 = vmatpush1.bf16.msra.mxu0 %v4898_v44  ;;  %4931 = vmatpush1.bf16.msra.mxu1 %v4930_v45  ;;  %v4918_v44 = vpack.c.bf16 %v2027_v36, %v2019_v34  ;;  %v4950_v45 = vpack.c.bf16 %v2029_v39, %v2021_v35  ;;  %v4968_v35 = vpack.c.bf16 %v1984_v29, %v1976_v26  ;;  %v2049_v29 = vld [vmem:[#allocation2 + $0x1370] sm:$0xff] }
 0x1d5   :  { %1828 = vmatprep.mubr.f32.mxu0 %v5852_v13  ;;  %1905 = vmatprep.mubr.f32.mxu1 %v5852_v13 }
 0x1d6   :  { %4901 = vmatprep.subr.bf16.mxu0 %v4900_v52  ;;  %4933 = vmatprep.subr.bf16.mxu1 %v4932_v53  ;;  %v2045_v52 = vld [vmem:[#allocation2 + $0x1350] sm:$0xff]  ;;  %v2052_v53 = vld [vmem:[#allocation2 + $0x1388] sm:$0xff] }
 0x1d7   :  { %4291 = vmatmul.mubr.msk.f32.gmra.mrb[6].mxu0 %vm1472_vm7, %v5856_v10  ;;  %4293 = vmatmul.mubr.msk.f32.gmra.mrb[6].mxu1 %vm1472_vm7, %v5856_v10 }
 0x1d8   :  { %4903 = vmatpush1.bf16.msra.mxu0 %v4902_v58  ;;  %4935 = vmatpush1.bf16.msra.mxu1 %v4934_v59  ;;  %v4922_v58 = vpack.c.bf16 %v2043_v46, %v2035_v30  ;;  %v4954_v59 = vpack.c.bf16 %v2045_v52, %v2037_v51  ;;  %v5002_v46 = vpack.c.bf16 %v1985_v41, %v1977_v40 }
 0x1d9   :  { %4905 = vmatprep.subr.bf16.mxu0 %v4904_v49  ;;  %4937 = vmatprep.subr.bf16.mxu1 %v4936_v62  ;;  %v4924_v49 = vpack.c.bf16 %v2060_v55, %v2052_v53  ;;  %v4956_v62 = vpack.c.bf16 %v2062_v16, %v2054_v57  ;;  %v4972_v51 = vpack.c.bf16 %v2000_v43, %v1992_v42  ;;  %v1993_v53 = vld [vmem:[#allocation2 + $0x11b0] sm:$0xff]  ;;  %v2008_v57 = vld [vmem:[#allocation2 + $0x1228] sm:$0xff] }
 0x1da   :  { %2131 = vmatprep.mubr.f32.mxu0 %v5852_v13  ;;  %2208 = vmatprep.mubr.f32.mxu1 %v5852_v13  ;;  %v2001_v55 = vld [vmem:[#allocation2 + $0x11f0] sm:$0xff]  ;;  %v2016_v16 = vld [vmem:[#allocation2 + $0x1268] sm:$0xff] }
 0x1db   :  { %v2057_v42 = vld [vmem:[#allocation2 + $0x13b0] sm:$0xff] }
 0x1dc   :  { %4907 = vmatpush1.bf16.msra.mxu0 %v4906_v6  ;;  %4939 = vmatpush1.bf16.msra.mxu1 %v4938_v7  ;;  %v4926_v6 = vpack.c.bf16 %v2059_v61, %v2051_v60  ;;  %v4958_v7 = vpack.c.bf16 %v2061_v1, %v2053_v0  ;;  %v5006_v61 = vpack.c.bf16 %v2001_v55, %v1993_v53  ;;  %v2065_v43 = vld [vmem:[#allocation2 + $0x13f0] sm:$0xff]  ;;  %v2410_v55 = vld [vmem:[#allocation2 + $0x1440] sm:$0xff] }
 0x1dd   :  { %4909 = vmatprep.subr.bf16.mxu0 %v4908_v12  ;;  %4941 = vmatprep.subr.bf16.mxu1 %v4940_v14  ;;  %v4960_v12 = vpack.c.bf16 %v1952_v4, %v1944_v63  ;;  %v4992_v14 = vpack.c.bf16 %v1954_v5, %v1946_v56  ;;  %v4976_v0 = vpack.c.bf16 %v2016_v16, %v2008_v57  ;;  %v2009_v63 = vld [vmem:[#allocation2 + $0x1230] sm:$0xff]  ;;  %v2024_v56 = vld [vmem:[#allocation2 + $0x12a8] sm:$0xff] }
 0x1de   :  { %v2017_v4 = vld [vmem:[#allocation2 + $0x1270] sm:$0xff]  ;;  %v2032_v5 = vld [vmem:[#allocation2 + $0x12e8] sm:$0xff] }
 0x1df   :  { %v4980_v19 = vpack.c.bf16 %v2032_v5, %v2024_v56  ;;  %v2404_v57 = vld [vmem:[#allocation2 + $0x1410] sm:$0xff]  ;;  %v2435_v56 = vld [vmem:[#allocation2 + $0x1508] sm:$0xff] }
 0x1e0   :  { %4911 = vmatpush1.bf16.msra.mxu0 %v4910_v2  ;;  %4943 = vmatpush1.bf16.msra.mxu1 %v4942_v21  ;;  %v1970_v2 = vld [vmem:[#allocation2 + $0x10f8] sm:$0xff]  ;;  %v4962_v21 = vpack.c.bf16 %v1951_v3, %v1943_v8  ;;  %v2031_v3 = vld [vmem:[#allocation2 + $0x12e0] sm:$0xff]  ;;  %v2412_v16 = vld [vmem:[#allocation2 + $0x1450] sm:$0xff] }
 0x1e1   :  { %4913 = vmatprep.subr.bf16.mxu0 %v4912_v24  ;;  %4945 = vmatprep.subr.bf16.mxu1 %v4944_v11  ;;  %v1967_v24 = vld [vmem:[#allocation2 + $0x10e0] sm:$0xff]  ;;  %v1961_v11 = vld [vmem:[#allocation2 + $0x10b0] sm:$0xff]  ;;  %v4996_v28 = vpack.c.bf16 %v1970_v2, %v1962_v20  ;;  %v2040_v20 = vld [vmem:[#allocation2 + $0x1328] sm:$0xff] }
 0x1e2   :  { %v4966_v34 = vpack.c.bf16 %v1967_v24, %v1959_v23  ;;  %v4998_v36 = vpack.c.bf16 %v1969_v25, %v1961_v11  ;;  %v2048_v2 = vld [vmem:[#allocation2 + $0x1368] sm:$0xff]  ;;  %v5014_v24 = vpack.c.bf16 %v2033_v18, %v2025_v17  ;;  %v2039_v11 = vld [vmem:[#allocation2 + $0x1320] sm:$0xff] }
 0x1e3   :  { %v2047_v25 = vld [vmem:[#allocation2 + $0x1360] sm:$0xff]  ;;  %v4984_v26 = vpack.c.bf16 %v2048_v2, %v2040_v20  ;;  %v2436_v20 = vld [vmem:[#allocation2 + $0x1510] sm:$0xff] }
 0x1e4   :  { %4915 = vmatpush1.bf16.msra.mxu0 %v4914_v32  ;;  %4947 = vmatpush1.bf16.msra.mxu1 %v4946_v33  ;;  %v1986_v32 = vld [vmem:[#allocation2 + $0x1178] sm:$0xff]  ;;  %v6220_v33 = vpop.permute.xlu1 %1932  ;;  %v2444_v2 = vld [vmem:[#allocation2 + $0x1550] sm:$0xff] }
 0x1e5   :  { %4917 = vmatprep.subr.bf16.mxu0 %v4916_v37  ;;  %4949 = vmatprep.subr.bf16.mxu1 %v4948_v38  ;;  %v1975_v37 = vld [vmem:[#allocation2 + $0x1120] sm:$0xff]  ;;  %v5000_v39 = vpack.c.bf16 %v1986_v32, %v1978_v31  ;;  %vm1935_vm9 = vcmp.eq.s32.totalorder %v6220_v33, %v6004_v54  ;;  %v2056_v31 = vld [vmem:[#allocation2 + $0x13a8] sm:$0xff] }
 0x1e6   :  { %v1983_v38 = vld [vmem:[#allocation2 + $0x1160] sm:$0xff]  ;;  %v2064_v32 = vld [vmem:[#allocation2 + $0x13e8] sm:$0xff] }
 0x1e7   :  { %v4970_v30 = vpack.c.bf16 %v1983_v38, %v1975_v37  ;;  %v4986_v37 = vpack.c.bf16 %v2047_v25, %v2039_v11  ;;  %v4988_v40 = vpack.c.bf16 %v2064_v32, %v2056_v31  ;;  %v5066_v11 = vpack.c.bf16 %v2444_v2, %v2436_v20  ;;  %v2450_v25 = vld [vmem:[#allocation2 + $0x1580] sm:$0xff]  ;;  %v2460_v31 = vld [vmem:[#allocation2 + $0x15d0] sm:$0xff]  ;;  %v2467_v32 = vld [vmem:[#allocation2 + $0x1608] sm:$0xff] }
 0x1e8   :  { %4919 = vmatpush1.bf16.msra.mxu0 %v4918_v44  ;;  %4951 = vmatpush1.bf16.msra.mxu1 %v4950_v45  ;;  %v1994_v44 = vld [vmem:[#allocation2 + $0x11b8] sm:$0xff]  ;;  %v2516_v20 = vld [vmem:[#allocation2 + $0x1790] sm:$0xff] }
 0x1e9   :  { %4921 = vmatprep.subr.bf16.mxu0 %v4920_v47  ;;  %4953 = vmatprep.subr.bf16.mxu1 %v4952_v50  ;;  %v2002_v45 = vld [vmem:[#allocation2 + $0x11f8] sm:$0xff]  ;;  %v1991_v47 = vld [vmem:[#allocation2 + $0x11a0] sm:$0xff]  ;;  %v2524_v2 = vld [vmem:[#allocation2 + $0x17d0] sm:$0xff] }
 0x1ea   :  { %v1999_v50 = vld [vmem:[#allocation2 + $0x11e0] sm:$0xff]  ;;  %v5004_v52 = vpack.c.bf16 %v2002_v45, %v1994_v44  ;;  %v2403_v44 = vld [vmem:[#allocation2 + $0x1408] sm:$0xff] }
 0x1eb   :  { %v4974_v60 = vpack.c.bf16 %v1999_v50, %v1991_v47  ;;  %v2411_v45 = vld [vmem:[#allocation2 + $0x1448] sm:$0xff]  ;;  %v5022_v50 = vpack.c.bf16 %v2065_v43, %v2057_v42  ;;  %v2468_v42 = vld [vmem:[#allocation2 + $0x1610] sm:$0xff] }
 0x1ec   :  { %4923 = vmatpush1.bf16.msra.mxu0 %v4922_v58  ;;  %4955 = vmatpush1.bf16.msra.mxu1 %v4954_v59  ;;  %v2010_v58 = vld [vmem:[#allocation2 + $0x1238] sm:$0xff]  ;;  %v2476_v43 = vld [vmem:[#allocation2 + $0x1650] sm:$0xff] }
 0x1ed   :  { %4925 = vmatprep.subr.bf16.mxu0 %v4924_v49  ;;  %4957 = vmatprep.subr.bf16.mxu1 %v4956_v62  ;;  %v2018_v59 = vld [vmem:[#allocation2 + $0x1278] sm:$0xff]  ;;  %v2007_v49 = vld [vmem:[#allocation2 + $0x1220] sm:$0xff] }
 0x1ee   :  { %v2015_v62 = vld [vmem:[#allocation2 + $0x1260] sm:$0xff]  ;;  %v5008_v1 = vpack.c.bf16 %v2018_v59, %v2010_v58  ;;  %v2419_v58 = vld [vmem:[#allocation2 + $0x1488] sm:$0xff] }
 0x1ef   :  { %v4978_v8 = vpack.c.bf16 %v2015_v62, %v2007_v49  ;;  %v2427_v59 = vld [vmem:[#allocation2 + $0x14c8] sm:$0xff]  ;;  %v5058_v62 = vpack.c.bf16 %v2412_v16, %v2404_v57  ;;  %v2484_v57 = vld [vmem:[#allocation2 + $0x1690] sm:$0xff] }
 0x1f0   :  { %4927 = vmatpush1.bf16.msra.mxu0 %v4926_v6  ;;  %4959 = vmatpush1.bf16.msra.mxu1 %v4958_v7  ;;  %v2026_v6 = vld [vmem:[#allocation2 + $0x12b8] sm:$0xff]  ;;  %v5028_v5 = vpack.c.bf16 %v2427_v59, %v2419_v58  ;;  %v2492_v16 = vld [vmem:[#allocation2 + $0x16d0] sm:$0xff]  ;;  %v2499_v58 = vld [vmem:[#allocation2 + $0x1708] sm:$0xff] }
 0x1f1   :  { %4961 = vmatprep.subr.bf16.mxu0 %v4960_v12  ;;  %4993 = vmatprep.subr.bf16.mxu1 %v4992_v14  ;;  %v2034_v7 = vld [vmem:[#allocation2 + $0x12f8] sm:$0xff]  ;;  %v5010_v12 = vpack.c.bf16 %v2017_v4, %v2009_v63  ;;  %v2023_v14 = vld [vmem:[#allocation2 + $0x12a0] sm:$0xff]  ;;  %v2420_v63 = vld [vmem:[#allocation2 + $0x1490] sm:$0xff] }
 0x1f2   :  { %v5012_v15 = vpack.c.bf16 %v2034_v7, %v2026_v6  ;;  %v4982_v23 = vpack.c.bf16 %v2031_v3, %v2023_v14  ;;  %v2428_v4 = vld [vmem:[#allocation2 + $0x14d0] sm:$0xff]  ;;  %v2443_v7 = vld [vmem:[#allocation2 + $0x1548] sm:$0xff] }
 0x1f3   :  { %4294 = vmatmul.mubr.msk.f32.vlgmr.msra.gmra.mrb[0].mxu0 %vm1934_vm8, %v5856_v10  ;;  %4296 = vmatmul.mubr.msk.f32.vlgmr.msra.gmra.mrb[0].mxu1 %vm1934_vm8, %v5856_v10  ;;  %v5062_v3 = vpack.c.bf16 %v2428_v4, %v2420_v63  ;;  %v5032_v17 = vpack.c.bf16 %v2443_v7, %v2435_v56  ;;  %v2507_v59 = vld [vmem:[#allocation2 + $0x1748] sm:$0xff]  ;;  %v2500_v56 = vld [vmem:[#allocation2 + $0x1710] sm:$0xff] }
 0x1f4   :  { %4963 = vmatpush1.bf16.msra.mxu0 %v4962_v21  ;;  %4995 = vmatpush1.bf16.msra.mxu1 %v4994_v22  ;;  %v2042_v21 = vld [vmem:[#allocation2 + $0x1338] sm:$0xff]  ;;  %v5048_v63 = vpack.c.bf16 %v2507_v59, %v2499_v58  ;;  %v2523_v7 = vld [vmem:[#allocation2 + $0x17c8] sm:$0xff]  ;;  %v2440_v58 = vld [vmem:[#allocation2 + $0x1530] sm:$0xff] }
 0x1f5   :  { %2137 = vmatprep.mubr.f32.mxu0 %v5852_v13  ;;  %2214 = vmatprep.mubr.f32.mxu1 %v5852_v13  ;;  %v2050_v22 = vld [vmem:[#allocation2 + $0x1378] sm:$0xff]  ;;  %v2448_v59 = vld [vmem:[#allocation2 + $0x1570] sm:$0xff] }
 0x1f6   :  { %4965 = vmatprep.subr.bf16.mxu0 %v4964_v27  ;;  %4997 = vmatprep.subr.bf16.mxu1 %v4996_v28  ;;  %v5016_v27 = vpack.c.bf16 %v2050_v22, %v2042_v21  ;;  %v2041_v28 = vld [vmem:[#allocation2 + $0x1330] sm:$0xff]  ;;  %v2451_v21 = vld [vmem:[#allocation2 + $0x1588] sm:$0xff] }
 0x1f7   :  { %4295 = vmatmul.mubr.msk.f32.gmra.mrb[2].mxu0 %vm1935_vm9, %v5856_v10  ;;  %4297 = vmatmul.mubr.msk.f32.gmra.mrb[2].mxu1 %vm1935_vm9, %v5856_v10  ;;  %v5018_v38 = vpack.c.bf16 %v2049_v29, %v2041_v28  ;;  %v2459_v22 = vld [vmem:[#allocation2 + $0x15c8] sm:$0xff]  ;;  %v2452_v29 = vld [vmem:[#allocation2 + $0x1590] sm:$0xff] }
 0x1f8   :  { %4967 = vmatpush1.bf16.msra.mxu0 %v4966_v34  ;;  %4999 = vmatpush1.bf16.msra.mxu1 %v4998_v36  ;;  %v2058_v34 = vld [vmem:[#allocation2 + $0x13b8] sm:$0xff] }
 0x1f9   :  { %4969 = vmatprep.subr.bf16.mxu0 %v4968_v35  ;;  %5001 = vmatprep.subr.bf16.mxu1 %v5000_v39  ;;  %v2066_v36 = vld [vmem:[#allocation2 + $0x13f8] sm:$0xff]  ;;  %v2055_v35 = vld [vmem:[#allocation2 + $0x13a0] sm:$0xff] }
 0x1fa   :  { %2285 = vmatprep.mubr.f32.mxu0 %v5852_v13  ;;  %2362 = vmatprep.mubr.f32.mxu1 %v5852_v13  ;;  %v2063_v39 = vld [vmem:[#allocation2 + $0x13e0] sm:$0xff]  ;;  %v5020_v41 = vpack.c.bf16 %v2066_v36, %v2058_v34  ;;  %v2475_v34 = vld [vmem:[#allocation2 + $0x1648] sm:$0xff]  ;;  %v2469_v36 = vld [vmem:[#allocation2 + $0x1618] sm:$0xff] }
 0x1fb   :  { %v4990_v47 = vpack.c.bf16 %v2063_v39, %v2055_v35  ;;  %v2466_v35 = vld [vmem:[#allocation2 + $0x1600] sm:$0xff] }
 0x1fc   :  { %4971 = vmatpush1.bf16.msra.mxu0 %v4970_v30  ;;  %5003 = vmatpush1.bf16.msra.mxu1 %v5002_v46  ;;  %v2405_v30 = vld [vmem:[#allocation2 + $0x1418] sm:$0xff]  ;;  %v2474_v39 = vld [vmem:[#allocation2 + $0x1640] sm:$0xff] }
 0x1fd   :  { %4973 = vmatprep.subr.bf16.mxu0 %v4972_v51  ;;  %5005 = vmatprep.subr.bf16.mxu1 %v5004_v52  ;;  %v2413_v46 = vld [vmem:[#allocation2 + $0x1458] sm:$0xff]  ;;  %v2402_v51 = vld [vmem:[#allocation2 + $0x1400] sm:$0xff]  ;;  %v5024_v52 = vpack.c.bf16 %v2411_v45, %v2403_v44  ;;  %v2483_v44 = vld [vmem:[#allocation2 + $0x1688] sm:$0xff] }
 0x1fe   :  { %v5056_v53 = vpack.c.bf16 %v2413_v46, %v2405_v30  ;;  %v5026_v49 = vpack.c.bf16 %v2410_v55, %v2402_v51  ;;  %v2491_v45 = vld [vmem:[#allocation2 + $0x16c8] sm:$0xff]  ;;  %v2485_v30 = vld [vmem:[#allocation2 + $0x1698] sm:$0xff]  ;;  %v2482_v51 = vld [vmem:[#allocation2 + $0x1680] sm:$0xff] }
 0x1ff   :  { %v2493_v46 = vld [vmem:[#allocation2 + $0x16d8] sm:$0xff] }
 0x200   :  { %4975 = vmatpush1.bf16.msra.mxu0 %v4974_v60  ;;  %5007 = vmatpush1.bf16.msra.mxu1 %v5006_v61  ;;  %v2421_v60 = vld [vmem:[#allocation2 + $0x1498] sm:$0xff]  ;;  %v5076_v55 = vpack.c.bf16 %v2493_v46, %v2485_v30  ;;  %v6268_v30 = vpop.permute.xlu1 %2395  ;;  %v2447_v46 = vld [vmem:[#allocation2 + $0x1568] sm:$0xff] }
 0x201   :  { %4977 = vmatprep.subr.bf16.mxu0 %v4976_v0  ;;  %5009 = vmatprep.subr.bf16.mxu1 %v5008_v1  ;;  %v2429_v61 = vld [vmem:[#allocation2 + $0x14d8] sm:$0xff]  ;;  %v2418_v0 = vld [vmem:[#allocation2 + $0x1480] sm:$0xff]  ;;  %vm2398_vm11 = vcmp.eq.s32.totalorder %v6268_v30, %v6004_v54 }
 0x202   :  { %v2426_v1 = vld [vmem:[#allocation2 + $0x14c0] sm:$0xff]  ;;  %v5060_v6 = vpack.c.bf16 %v2429_v61, %v2421_v60  ;;  %v2501_v60 = vld [vmem:[#allocation2 + $0x1718] sm:$0xff] }
 0x203   :  { %v5030_v14 = vpack.c.bf16 %v2426_v1, %v2418_v0  ;;  %v2509_v61 = vld [vmem:[#allocation2 + $0x1758] sm:$0xff]  ;;  %v2498_v0 = vld [vmem:[#allocation2 + $0x1700] sm:$0xff] }
 0x204   :  { %4979 = vmatpush1.bf16.msra.mxu0 %v4978_v8  ;;  %5011 = vmatpush1.bf16.msra.mxu1 %v5010_v12  ;;  %v2437_v8 = vld [vmem:[#allocation2 + $0x1518] sm:$0xff]  ;;  %v2506_v1 = vld [vmem:[#allocation2 + $0x1740] sm:$0xff]  ;;  %v5080_v4 = vpack.c.bf16 %v2509_v61, %v2501_v60  ;;  %v2455_v60 = vld [vmem:[#allocation2 + $0x15a8] sm:$0xff] }
 0x205   :  { %4981 = vmatprep.subr.bf16.mxu0 %v4980_v19  ;;  %5013 = vmatprep.subr.bf16.mxu1 %v5012_v15  ;;  %v2445_v12 = vld [vmem:[#allocation2 + $0x1558] sm:$0xff]  ;;  %v2434_v19 = vld [vmem:[#allocation2 + $0x1500] sm:$0xff]  ;;  %v2463_v61 = vld [vmem:[#allocation2 + $0x15e8] sm:$0xff] }
 0x206   :  { %v2442_v15 = vld [vmem:[#allocation2 + $0x1540] sm:$0xff]  ;;  %v5064_v18 = vpack.c.bf16 %v2445_v12, %v2437_v8  ;;  %v2517_v8 = vld [vmem:[#allocation2 + $0x1798] sm:$0xff] }
 0x207   :  { %v2525_v12 = vld [vmem:[#allocation2 + $0x17d8] sm:$0xff] }
 0x208   :  { %4983 = vmatpush1.bf16.msra.mxu0 %v4982_v23  ;;  %5015 = vmatpush1.bf16.msra.mxu1 %v5014_v24  ;;  %v2461_v23 = vld [vmem:[#allocation2 + $0x15d8] sm:$0xff]  ;;  %v5034_v24 = vpack.c.bf16 %v2442_v15, %v2434_v19  ;;  %v2514_v19 = vld [vmem:[#allocation2 + $0x1780] sm:$0xff] }
 0x209   :  { %4985 = vmatprep.subr.bf16.mxu0 %v4984_v26  ;;  %5017 = vmatprep.subr.bf16.mxu1 %v5016_v27  ;;  %v2458_v26 = vld [vmem:[#allocation2 + $0x15c0] sm:$0xff]  ;;  %v5036_v27 = vpack.c.bf16 %v2459_v22, %v2451_v21  ;;  %v5068_v28 = vpack.c.bf16 %v2461_v23, %v2453_v9  ;;  %v2407_v21 = vld [vmem:[#allocation2 + $0x1428] sm:$0xff]  ;;  %v2409_v9 = vld [vmem:[#allocation2 + $0x1438] sm:$0xff] }
 0x20a   :  { %v5038_v33 = vpack.c.bf16 %v2458_v26, %v2450_v25  ;;  %v2522_v15 = vld [vmem:[#allocation2 + $0x17c0] sm:$0xff]  ;;  %v2415_v22 = vld [vmem:[#allocation2 + $0x1468] sm:$0xff]  ;;  %v2417_v23 = vld [vmem:[#allocation2 + $0x1478] sm:$0xff] }
 0x20b   :  { %v2406_v25 = vld [vmem:[#allocation2 + $0x1420] sm:$0xff] }
 0x20c   :  { %4987 = vmatpush1.bf16.msra.mxu0 %v4986_v37  ;;  %5019 = vmatpush1.bf16.msra.mxu1 %v5018_v38  ;;  %v2477_v37 = vld [vmem:[#allocation2 + $0x1658] sm:$0xff]  ;;  %v5070_v38 = vpack.c.bf16 %v2460_v31, %v2452_v29  ;;  %v2414_v26 = vld [vmem:[#allocation2 + $0x1460] sm:$0xff]  ;;  %v5120_v29 = vpack.c.bf16 %v2417_v23, %v2409_v9  ;;  %v2408_v31 = vld [vmem:[#allocation2 + $0x1430] sm:$0xff] }
 0x20d   :  { %4989 = vmatprep.subr.bf16.mxu0 %v4988_v40  ;;  %5021 = vmatprep.subr.bf16.mxu1 %v5020_v41  ;;  %v5040_v40 = vpack.c.bf16 %v2475_v34, %v2467_v32  ;;  %v5072_v41 = vpack.c.bf16 %v2477_v37, %v2469_v36  ;;  %v2416_v32 = vld [vmem:[#allocation2 + $0x1470] sm:$0xff]  ;;  %v2423_v34 = vld [vmem:[#allocation2 + $0x14a8] sm:$0xff]  ;;  %v2425_v37 = vld [vmem:[#allocation2 + $0x14b8] sm:$0xff] }
 0x20e   :  { %v2431_v36 = vld [vmem:[#allocation2 + $0x14e8] sm:$0xff] }
 0x20f   :  { %v2487_v9 = vld [vmem:[#allocation2 + $0x16a8] sm:$0xff] }
 0x210   :  { %4991 = vmatpush1.bf16.msra.mxu0 %v4990_v47  ;;  %5023 = vmatpush1.bf16.msra.mxu1 %v5022_v50  ;;  %v5042_v47 = vpack.c.bf16 %v2474_v39, %v2466_v35  ;;  %v5074_v50 = vpack.c.bf16 %v2476_v43, %v2468_v42  ;;  %v5122_v35 = vpack.c.bf16 %v2416_v32, %v2408_v31  ;;  %v2422_v39 = vld [vmem:[#allocation2 + $0x14a0] sm:$0xff]  ;;  %v2424_v43 = vld [vmem:[#allocation2 + $0x14b0] sm:$0xff]  ;;  %v2495_v23 = vld [vmem:[#allocation2 + $0x16e8] sm:$0xff] }
 0x211   :  { %5025 = vmatprep.subr.bf16.mxu0 %v5024_v52  ;;  %5057 = vmatprep.subr.bf16.mxu1 %v5056_v53  ;;  %v2490_v52 = vld [vmem:[#allocation2 + $0x16c0] sm:$0xff]  ;;  %v5044_v53 = vpack.c.bf16 %v2491_v45, %v2483_v44  ;;  %v2432_v44 = vld [vmem:[#allocation2 + $0x14f0] sm:$0xff]  ;;  %v2439_v45 = vld [vmem:[#allocation2 + $0x1528] sm:$0xff]  ;;  %v5108_v31 = vpack.c.bf16 %v2495_v23, %v2487_v9 }
 0x212   :  { %v2898_v9 = vld [vmem:[#allocation2 + $0x1908] sm:$0xff] }
 0x213   :  { %4298 = vmatmul.mubr.msk.f32.vlgmr.msra.gmra.mrb[4].mxu0 %vm1934_vm8, %v5856_v10  ;;  %4300 = vmatmul.mubr.msk.f32.vlgmr.msra.gmra.mrb[4].mxu1 %vm1934_vm8, %v5856_v10 }
 0x214   :  { %5027 = vmatpush1.bf16.msra.mxu0 %v5026_v49  ;;  %5059 = vmatpush1.bf16.msra.mxu1 %v5058_v62  ;;  %v5046_v49 = vpack.c.bf16 %v2490_v52, %v2482_v51  ;;  %v5078_v62 = vpack.c.bf16 %v2492_v16, %v2484_v57  ;;  %v5126_v52 = vpack.c.bf16 %v2432_v44, %v2424_v43 }
 0x215   :  { %2291 = vmatprep.mubr.f32.mxu0 %v5852_v13  ;;  %2368 = vmatprep.mubr.f32.mxu1 %v5852_v13  ;;  %v5096_v57 = vpack.c.bf16 %v2447_v46, %v2439_v45  ;;  %v2504_v45 = vld [vmem:[#allocation2 + $0x1730] sm:$0xff] }
 0x216   :  { %5029 = vmatprep.subr.bf16.mxu0 %v5028_v5  ;;  %5061 = vmatprep.subr.bf16.mxu1 %v5060_v6  ;;  %v2508_v5 = vld [vmem:[#allocation2 + $0x1750] sm:$0xff]  ;;  %v2515_v6 = vld [vmem:[#allocation2 + $0x1788] sm:$0xff] }
 0x217   :  { %4299 = vmatmul.mubr.msk.f32.gmra.mrb[6].mxu0 %vm1935_vm9, %v5856_v10  ;;  %4301 = vmatmul.mubr.msk.f32.gmra.mrb[6].mxu1 %vm1935_vm9, %v5856_v10  ;;  %v2512_v46 = vld [vmem:[#allocation2 + $0x1770] sm:$0xff] }
 0x218   :  { %5031 = vmatpush1.bf16.msra.mxu0 %v5030_v14  ;;  %5063 = vmatpush1.bf16.msra.mxu1 %v5062_v3  ;;  %v5050_v14 = vpack.c.bf16 %v2506_v1, %v2498_v0  ;;  %v5082_v3 = vpack.c.bf16 %v2508_v5, %v2500_v56  ;;  %v5130_v1 = vpack.c.bf16 %v2448_v59, %v2440_v58 }
 0x219   :  { %5033 = vmatprep.subr.bf16.mxu0 %v5032_v17  ;;  %5065 = vmatprep.subr.bf16.mxu1 %v5064_v18  ;;  %v5052_v17 = vpack.c.bf16 %v2523_v7, %v2515_v6  ;;  %v5084_v18 = vpack.c.bf16 %v2525_v12, %v2517_v8  ;;  %v5100_v56 = vpack.c.bf16 %v2463_v61, %v2455_v60  ;;  %v2456_v6 = vld [vmem:[#allocation2 + $0x15b0] sm:$0xff]  ;;  %v2471_v8 = vld [vmem:[#allocation2 + $0x1628] sm:$0xff] }
 0x21a   :  { %2594 = vmatprep.mubr.f32.mxu0 %v5852_v13  ;;  %2671 = vmatprep.mubr.f32.mxu1 %v5852_v13  ;;  %v2464_v7 = vld [vmem:[#allocation2 + $0x15f0] sm:$0xff]  ;;  %v2479_v12 = vld [vmem:[#allocation2 + $0x1668] sm:$0xff] }
 0x21b   :  { %v2520_v60 = vld [vmem:[#allocation2 + $0x17b0] sm:$0xff] }
 0x21c   :  { %5035 = vmatpush1.bf16.msra.mxu0 %v5034_v24  ;;  %5067 = vmatpush1.bf16.msra.mxu1 %v5066_v11  ;;  %v5054_v24 = vpack.c.bf16 %v2522_v15, %v2514_v19  ;;  %v5086_v11 = vpack.c.bf16 %v2524_v2, %v2516_v20  ;;  %v5134_v15 = vpack.c.bf16 %v2464_v7, %v2456_v6  ;;  %v2528_v61 = vld [vmem:[#allocation2 + $0x17f0] sm:$0xff]  ;;  %v2873_v7 = vld [vmem:[#allocation2 + $0x1840] sm:$0xff] }
 0x21d   :  { %5037 = vmatprep.subr.bf16.mxu0 %v5036_v27  ;;  %5069 = vmatprep.subr.bf16.mxu1 %v5068_v28  ;;  %v6264_v27 = vpop.permute.xlu0 %2392  ;;  %v5088_v28 = vpack.c.bf16 %v2415_v22, %v2407_v21  ;;  %v5104_v20 = vpack.c.bf16 %v2479_v12, %v2471_v8  ;;  %v2472_v21 = vld [vmem:[#allocation2 + $0x1630] sm:$0xff] }
 0x21e   :  { %vm2397_vm10 = vcmp.eq.s32.totalorder %v6264_v27, %v6004_v54  ;;  %v2480_v22 = vld [vmem:[#allocation2 + $0x1670] sm:$0xff]  ;;  %v2916_v27 = vld [vmem:[#allocation2 + $0x1998] sm:$0xff] }
 0x21f   :  { %v2867_v8 = vld [vmem:[#allocation2 + $0x1810] sm:$0xff] }
 0x220   :  { %5039 = vmatpush1.bf16.msra.mxu0 %v5038_v33  ;;  %5071 = vmatpush1.bf16.msra.mxu1 %v5070_v38  ;;  %v2433_v33 = vld [vmem:[#allocation2 + $0x14f8] sm:$0xff]  ;;  %v5090_v38 = vpack.c.bf16 %v2414_v26, %v2406_v25  ;;  %v5138_v26 = vpack.c.bf16 %v2480_v22, %v2472_v21  ;;  %v2875_v12 = vld [vmem:[#allocation2 + $0x1850] sm:$0xff] }
 0x221   :  { %5041 = vmatprep.subr.bf16.mxu0 %v5040_v40  ;;  %5073 = vmatprep.subr.bf16.mxu1 %v5072_v41  ;;  %v2430_v40 = vld [vmem:[#allocation2 + $0x14e0] sm:$0xff]  ;;  %v5092_v41 = vpack.c.bf16 %v2431_v36, %v2423_v34  ;;  %v5124_v42 = vpack.c.bf16 %v2433_v33, %v2425_v37  ;;  %v2488_v34 = vld [vmem:[#allocation2 + $0x16b0] sm:$0xff]  ;;  %v2503_v37 = vld [vmem:[#allocation2 + $0x1728] sm:$0xff] }
 0x222   :  { %v5094_v51 = vpack.c.bf16 %v2430_v40, %v2422_v39  ;;  %v2496_v36 = vld [vmem:[#allocation2 + $0x16f0] sm:$0xff]  ;;  %v2511_v33 = vld [vmem:[#allocation2 + $0x1768] sm:$0xff] }
 0x223   :  { %v5142_v40 = vpack.c.bf16 %v2496_v36, %v2488_v34  ;;  %v5112_v43 = vpack.c.bf16 %v2511_v33, %v2503_v37  ;;  %v2883_v21 = vld [vmem:[#allocation2 + $0x1890] sm:$0xff] }
 0x224   :  { %5043 = vmatpush1.bf16.msra.mxu0 %v5042_v47  ;;  %5075 = vmatpush1.bf16.msra.mxu1 %v5074_v50  ;;  %v2441_v47 = vld [vmem:[#allocation2 + $0x1538] sm:$0xff]  ;;  %v2891_v22 = vld [vmem:[#allocation2 + $0x18d0] sm:$0xff] }
 0x225   :  { %5045 = vmatprep.subr.bf16.mxu0 %v5044_v53  ;;  %5077 = vmatprep.subr.bf16.mxu1 %v5076_v55  ;;  %v2449_v50 = vld [vmem:[#allocation2 + $0x1578] sm:$0xff]  ;;  %v2438_v53 = vld [vmem:[#allocation2 + $0x1520] sm:$0xff]  ;;  %v2899_v37 = vld [vmem:[#allocation2 + $0x1910] sm:$0xff] }
 0x226   :  { %v2446_v55 = vld [vmem:[#allocation2 + $0x1560] sm:$0xff]  ;;  %v5128_v16 = vpack.c.bf16 %v2449_v50, %v2441_v47  ;;  %v2519_v47 = vld [vmem:[#allocation2 + $0x17a8] sm:$0xff]  ;;  %v2907_v33 = vld [vmem:[#allocation2 + $0x1950] sm:$0xff] }
 0x227   :  { %v5098_v0 = vpack.c.bf16 %v2446_v55, %v2438_v53  ;;  %v2527_v50 = vld [vmem:[#allocation2 + $0x17e8] sm:$0xff]  ;;  %v5146_v55 = vpack.c.bf16 %v2512_v46, %v2504_v45  ;;  %v2915_v46 = vld [vmem:[#allocation2 + $0x1990] sm:$0xff] }
 0x228   :  { %5047 = vmatpush1.bf16.msra.mxu0 %v5046_v49  ;;  %5079 = vmatpush1.bf16.msra.mxu1 %v5078_v62  ;;  %v2457_v49 = vld [vmem:[#allocation2 + $0x15b8] sm:$0xff]  ;;  %v5116_v58 = vpack.c.bf16 %v2527_v50, %v2519_v47  ;;  %v2923_v47 = vld [vmem:[#allocation2 + $0x19d0] sm:$0xff]  ;;  %v2930_v50 = vld [vmem:[#allocation2 + $0x1a08] sm:$0xff] }
 0x229   :  { %5049 = vmatprep.subr.bf16.mxu0 %v5048_v63  ;;  %5081 = vmatprep.subr.bf16.mxu1 %v5080_v4  ;;  %v2465_v62 = vld [vmem:[#allocation2 + $0x15f8] sm:$0xff]  ;;  %v2454_v63 = vld [vmem:[#allocation2 + $0x15a0] sm:$0xff] }
 0x22a   :  { %v2462_v4 = vld [vmem:[#allocation2 + $0x15e0] sm:$0xff]  ;;  %v5132_v5 = vpack.c.bf16 %v2465_v62, %v2457_v49  ;;  %v2866_v49 = vld [vmem:[#allocation2 + $0x1808] sm:$0xff] }
 0x22b   :  { %v5102_v19 = vpack.c.bf16 %v2462_v4, %v2454_v63  ;;  %v2874_v62 = vld [vmem:[#allocation2 + $0x1848] sm:$0xff]  ;;  %v5150_v4 = vpack.c.bf16 %v2528_v61, %v2520_v60  ;;  %v2931_v60 = vld [vmem:[#allocation2 + $0x1a10] sm:$0xff] }
 0x22c   :  { %5051 = vmatpush1.bf16.msra.mxu0 %v5050_v14  ;;  %5083 = vmatpush1.bf16.msra.mxu1 %v5082_v3  ;;  %v2473_v14 = vld [vmem:[#allocation2 + $0x1638] sm:$0xff]  ;;  %v2939_v61 = vld [vmem:[#allocation2 + $0x1a50] sm:$0xff] }
 0x22d   :  { %5053 = vmatprep.subr.bf16.mxu0 %v5052_v17  ;;  %5085 = vmatprep.subr.bf16.mxu1 %v5084_v18  ;;  %v2481_v3 = vld [vmem:[#allocation2 + $0x1678] sm:$0xff]  ;;  %v2470_v17 = vld [vmem:[#allocation2 + $0x1620] sm:$0xff] }
 0x22e   :  { %v2478_v18 = vld [vmem:[#allocation2 + $0x1660] sm:$0xff]  ;;  %v5136_v2 = vpack.c.bf16 %v2481_v3, %v2473_v14  ;;  %v2882_v14 = vld [vmem:[#allocation2 + $0x1888] sm:$0xff] }
 0x22f   :  { %v5106_v25 = vpack.c.bf16 %v2478_v18, %v2470_v17  ;;  %v2890_v3 = vld [vmem:[#allocation2 + $0x18c8] sm:$0xff]  ;;  %v5186_v18 = vpack.c.bf16 %v2875_v12, %v2867_v8  ;;  %v2947_v8 = vld [vmem:[#allocation2 + $0x1a90] sm:$0xff] }
 0x230   :  { %5055 = vmatpush1.bf16.msra.mxu0 %v5054_v24  ;;  %5087 = vmatpush1.bf16.msra.mxu1 %v5086_v11  ;;  %v2489_v24 = vld [vmem:[#allocation2 + $0x16b8] sm:$0xff]  ;;  %v5156_v23 = vpack.c.bf16 %v2890_v3, %v2882_v14  ;;  %v2955_v12 = vld [vmem:[#allocation2 + $0x1ad0] sm:$0xff]  ;;  %v2962_v14 = vld [vmem:[#allocation2 + $0x1b08] sm:$0xff] }
 0x231   :  { %5089 = vmatprep.subr.bf16.mxu0 %v5088_v28  ;;  %5121 = vmatprep.subr.bf16.mxu1 %v5120_v29  ;;  %v2497_v11 = vld [vmem:[#allocation2 + $0x16f8] sm:$0xff]  ;;  %v2486_v28 = vld [vmem:[#allocation2 + $0x16a0] sm:$0xff]  ;;  %v2970_v3 = vld [vmem:[#allocation2 + $0x1b48] sm:$0xff] }
 0x232   :  { %v2494_v29 = vld [vmem:[#allocation2 + $0x16e0] sm:$0xff]  ;;  %v5140_v32 = vpack.c.bf16 %v2497_v11, %v2489_v24  ;;  %v2906_v11 = vld [vmem:[#allocation2 + $0x1948] sm:$0xff] }
 0x233   :  { %4302 = vmatmul.mubr.msk.f32.vlgmr.msra.gmra.mrb[0].mxu0 %vm2397_vm10, %v5856_v10  ;;  %4304 = vmatmul.mubr.msk.f32.vlgmr.msra.gmra.mrb[0].mxu1 %vm2397_vm10, %v5856_v10  ;;  %v5110_v39 = vpack.c.bf16 %v2494_v29, %v2486_v28  ;;  %v5190_v29 = vpack.c.bf16 %v2891_v22, %v2883_v21  ;;  %v5160_v34 = vpack.c.bf16 %v2906_v11, %v2898_v9  ;;  %v2963_v9 = vld [vmem:[#allocation2 + $0x1b10] sm:$0xff]  ;;  %v2986_v11 = vld [vmem:[#allocation2 + $0x1bc8] sm:$0xff] }
 0x234   :  { %5091 = vmatpush1.bf16.msra.mxu0 %v5090_v38  ;;  %5123 = vmatpush1.bf16.msra.mxu1 %v5122_v35  ;;  %v2505_v38 = vld [vmem:[#allocation2 + $0x1738] sm:$0xff]  ;;  %v5176_v21 = vpack.c.bf16 %v2970_v3, %v2962_v14  ;;  %v2903_v14 = vld [vmem:[#allocation2 + $0x1930] sm:$0xff] }
 0x235   :  { %5093 = vmatprep.subr.bf16.mxu0 %v5092_v41  ;;  %5125 = vmatprep.subr.bf16.mxu1 %v5124_v42  ;;  %v2513_v35 = vld [vmem:[#allocation2 + $0x1778] sm:$0xff]  ;;  %v2502_v41 = vld [vmem:[#allocation2 + $0x1720] sm:$0xff]  ;;  %v2911_v3 = vld [vmem:[#allocation2 + $0x1970] sm:$0xff] }
 0x236   :  { %2600 = vmatprep.mubr.f32.mxu0 %v5852_v13  ;;  %2677 = vmatprep.mubr.f32.mxu1 %v5852_v13  ;;  %v2510_v42 = vld [vmem:[#allocation2 + $0x1760] sm:$0xff]  ;;  %v5144_v44 = vpack.c.bf16 %v2513_v35, %v2505_v38  ;;  %v2914_v38 = vld [vmem:[#allocation2 + $0x1988] sm:$0xff] }
 0x237   :  { %4303 = vmatmul.mubr.msk.f32.gmra.mrb[2].mxu0 %vm2398_vm11, %v5856_v10  ;;  %4305 = vmatmul.mubr.msk.f32.gmra.mrb[2].mxu1 %vm2398_vm11, %v5856_v10  ;;  %v5114_v53 = vpack.c.bf16 %v2510_v42, %v2502_v41  ;;  %v2922_v35 = vld [vmem:[#allocation2 + $0x19c8] sm:$0xff]  ;;  %v5194_v41 = vpack.c.bf16 %v2907_v33, %v2899_v37  ;;  %v2913_v42 = vld [vmem:[#allocation2 + $0x1980] sm:$0xff]  ;;  %v2979_v37 = vld [vmem:[#allocation2 + $0x1b90] sm:$0xff] }
 0x238   :  { %5095 = vmatpush1.bf16.msra.mxu0 %v5094_v51  ;;  %5127 = vmatpush1.bf16.msra.mxu1 %v5126_v52  ;;  %v2521_v51 = vld [vmem:[#allocation2 + $0x17b8] sm:$0xff]  ;;  %v2987_v33 = vld [vmem:[#allocation2 + $0x1bd0] sm:$0xff] }
 0x239   :  { %5097 = vmatprep.subr.bf16.mxu0 %v5096_v57  ;;  %5129 = vmatprep.subr.bf16.mxu1 %v5128_v16  ;;  %v2529_v52 = vld [vmem:[#allocation2 + $0x17f8] sm:$0xff]  ;;  %v2518_v57 = vld [vmem:[#allocation2 + $0x17a0] sm:$0xff] }
 0x23a   :  { %2748 = vmatprep.mubr.f32.mxu0 %v5852_v13  ;;  %2825 = vmatprep.mubr.f32.mxu1 %v5852_v13  ;;  %v2526_v16 = vld [vmem:[#allocation2 + $0x17e0] sm:$0xff]  ;;  %v5148_v59 = vpack.c.bf16 %v2529_v52, %v2521_v51  ;;  %v2938_v51 = vld [vmem:[#allocation2 + $0x1a48] sm:$0xff]  ;;  %v2932_v52 = vld [vmem:[#allocation2 + $0x1a18] sm:$0xff] }
 0x23b   :  { %v5118_v63 = vpack.c.bf16 %v2526_v16, %v2518_v57  ;;  %v2929_v57 = vld [vmem:[#allocation2 + $0x1a00] sm:$0xff] }
 0x23c   :  { %5099 = vmatpush1.bf16.msra.mxu0 %v5098_v0  ;;  %5131 = vmatpush1.bf16.msra.mxu1 %v5130_v1  ;;  %v2868_v0 = vld [vmem:[#allocation2 + $0x1818] sm:$0xff]  ;;  %v2937_v16 = vld [vmem:[#allocation2 + $0x1a40] sm:$0xff] }
 0x23d   :  { %5101 = vmatprep.subr.bf16.mxu0 %v5100_v56  ;;  %5133 = vmatprep.subr.bf16.mxu1 %v5132_v5  ;;  %v2876_v1 = vld [vmem:[#allocation2 + $0x1858] sm:$0xff]  ;;  %v2865_v56 = vld [vmem:[#allocation2 + $0x1800] sm:$0xff]  ;;  %v5152_v5 = vpack.c.bf16 %v2874_v62, %v2866_v49  ;;  %v2946_v49 = vld [vmem:[#allocation2 + $0x1a88] sm:$0xff] }
 0x23e   :  { %v5184_v6 = vpack.c.bf16 %v2876_v1, %v2868_v0  ;;  %v5154_v17 = vpack.c.bf16 %v2873_v7, %v2865_v56  ;;  %v2954_v62 = vld [vmem:[#allocation2 + $0x1ac8] sm:$0xff]  ;;  %v2948_v0 = vld [vmem:[#allocation2 + $0x1a98] sm:$0xff]  ;;  %v2945_v56 = vld [vmem:[#allocation2 + $0x1a80] sm:$0xff] }
 0x23f   :  { %v2956_v1 = vld [vmem:[#allocation2 + $0x1ad8] sm:$0xff] }
 0x240   :  { %5103 = vmatpush1.bf16.msra.mxu0 %v5102_v19  ;;  %5135 = vmatpush1.bf16.msra.mxu1 %v5134_v15  ;;  %v2884_v19 = vld [vmem:[#allocation2 + $0x1898] sm:$0xff]  ;;  %v5204_v7 = vpack.c.bf16 %v2956_v1, %v2948_v0  ;;  %v6316_v0 = vpop.permute.xlu0 %2858  ;;  %v2910_v1 = vld [vmem:[#allocation2 + $0x1968] sm:$0xff] }
 0x241   :  { %5105 = vmatprep.subr.bf16.mxu0 %v5104_v20  ;;  %5137 = vmatprep.subr.bf16.mxu1 %v5136_v2  ;;  %v2892_v15 = vld [vmem:[#allocation2 + $0x18d8] sm:$0xff]  ;;  %v2881_v20 = vld [vmem:[#allocation2 + $0x1880] sm:$0xff]  ;;  %vm2861_vm13 = vcmp.eq.s32.totalorder %v6316_v0, %v6004_v54 }
 0x242   :  { %v2889_v2 = vld [vmem:[#allocation2 + $0x18c0] sm:$0xff]  ;;  %v5188_v24 = vpack.c.bf16 %v2892_v15, %v2884_v19  ;;  %v2964_v19 = vld [vmem:[#allocation2 + $0x1b18] sm:$0xff] }
 0x243   :  { %v5158_v28 = vpack.c.bf16 %v2889_v2, %v2881_v20  ;;  %v2972_v15 = vld [vmem:[#allocation2 + $0x1b58] sm:$0xff]  ;;  %v2961_v20 = vld [vmem:[#allocation2 + $0x1b00] sm:$0xff] }
 0x244   :  { %5107 = vmatpush1.bf16.msra.mxu0 %v5106_v25  ;;  %5139 = vmatpush1.bf16.msra.mxu1 %v5138_v26  ;;  %v2900_v25 = vld [vmem:[#allocation2 + $0x1918] sm:$0xff]  ;;  %v2969_v2 = vld [vmem:[#allocation2 + $0x1b40] sm:$0xff]  ;;  %v5208_v22 = vpack.c.bf16 %v2972_v15, %v2964_v19  ;;  %v2918_v19 = vld [vmem:[#allocation2 + $0x19a8] sm:$0xff] }
 0x245   :  { %5109 = vmatprep.subr.bf16.mxu0 %v5108_v31  ;;  %5141 = vmatprep.subr.bf16.mxu1 %v5140_v32  ;;  %v2908_v26 = vld [vmem:[#allocation2 + $0x1958] sm:$0xff]  ;;  %v2897_v31 = vld [vmem:[#allocation2 + $0x1900] sm:$0xff]  ;;  %v2926_v15 = vld [vmem:[#allocation2 + $0x19e8] sm:$0xff] }
 0x246   :  { %v2905_v32 = vld [vmem:[#allocation2 + $0x1940] sm:$0xff]  ;;  %v5192_v36 = vpack.c.bf16 %v2908_v26, %v2900_v25  ;;  %v2980_v25 = vld [vmem:[#allocation2 + $0x1b98] sm:$0xff] }
 0x247   :  { %v2988_v26 = vld [vmem:[#allocation2 + $0x1bd8] sm:$0xff] }
 0x248   :  { %5111 = vmatpush1.bf16.msra.mxu0 %v5110_v39  ;;  %5143 = vmatpush1.bf16.msra.mxu1 %v5142_v40  ;;  %v2924_v39 = vld [vmem:[#allocation2 + $0x19d8] sm:$0xff]  ;;  %v5162_v40 = vpack.c.bf16 %v2905_v32, %v2897_v31  ;;  %v2977_v31 = vld [vmem:[#allocation2 + $0x1b80] sm:$0xff] }
 0x249   :  { %5113 = vmatprep.subr.bf16.mxu0 %v5112_v43  ;;  %5145 = vmatprep.subr.bf16.mxu1 %v5144_v44  ;;  %v2921_v43 = vld [vmem:[#allocation2 + $0x19c0] sm:$0xff]  ;;  %v5164_v44 = vpack.c.bf16 %v2922_v35, %v2914_v38  ;;  %v5196_v45 = vpack.c.bf16 %v2924_v39, %v2916_v27  ;;  %v2870_v38 = vld [vmem:[#allocation2 + $0x1828] sm:$0xff]  ;;  %v2872_v27 = vld [vmem:[#allocation2 + $0x1838] sm:$0xff] }
 0x24a   :  { %v5166_v30 = vpack.c.bf16 %v2921_v43, %v2913_v42  ;;  %v2985_v32 = vld [vmem:[#allocation2 + $0x1bc0] sm:$0xff]  ;;  %v2878_v35 = vld [vmem:[#allocation2 + $0x1868] sm:$0xff]  ;;  %v2880_v39 = vld [vmem:[#allocation2 + $0x1878] sm:$0xff] }
 0x24b   :  { %v2869_v42 = vld [vmem:[#allocation2 + $0x1820] sm:$0xff] }
 0x24c   :  { %5115 = vmatpush1.bf16.msra.mxu0 %v5114_v53  ;;  %5147 = vmatpush1.bf16.msra.mxu1 %v5146_v55  ;;  %v2940_v53 = vld [vmem:[#allocation2 + $0x1a58] sm:$0xff]  ;;  %v5198_v55 = vpack.c.bf16 %v2923_v47, %v2915_v46  ;;  %v2877_v43 = vld [vmem:[#allocation2 + $0x1860] sm:$0xff]  ;;  %v5248_v46 = vpack.c.bf16 %v2880_v39, %v2872_v27  ;;  %v2871_v47 = vld [vmem:[#allocation2 + $0x1830] sm:$0xff] }
 0x24d   :  { %5117 = vmatprep.subr.bf16.mxu0 %v5116_v58  ;;  %5149 = vmatprep.subr.bf16.mxu1 %v5148_v59  ;;  %v5168_v58 = vpack.c.bf16 %v2938_v51, %v2930_v50  ;;  %v5200_v59 = vpack.c.bf16 %v2940_v53, %v2932_v52  ;;  %v2879_v50 = vld [vmem:[#allocation2 + $0x1870] sm:$0xff]  ;;  %v2886_v51 = vld [vmem:[#allocation2 + $0x18a8] sm:$0xff]  ;;  %v2888_v53 = vld [vmem:[#allocation2 + $0x18b8] sm:$0xff] }
 0x24e   :  { %v2894_v52 = vld [vmem:[#allocation2 + $0x18e8] sm:$0xff] }
 0x24f   :  { %v2950_v27 = vld [vmem:[#allocation2 + $0x1aa8] sm:$0xff] }
 0x250   :  { %5119 = vmatpush1.bf16.msra.mxu0 %v5118_v63  ;;  %5151 = vmatpush1.bf16.msra.mxu1 %v5150_v4  ;;  %v5170_v63 = vpack.c.bf16 %v2937_v16, %v2929_v57  ;;  %v5202_v4 = vpack.c.bf16 %v2939_v61, %v2931_v60  ;;  %v5250_v57 = vpack.c.bf16 %v2879_v50, %v2871_v47  ;;  %v2885_v16 = vld [vmem:[#allocation2 + $0x18a0] sm:$0xff]  ;;  %v2887_v61 = vld [vmem:[#allocation2 + $0x18b0] sm:$0xff]  ;;  %v2958_v39 = vld [vmem:[#allocation2 + $0x1ae8] sm:$0xff] }
 0x251   :  { %5153 = vmatprep.subr.bf16.mxu0 %v5152_v5  ;;  %5185 = vmatprep.subr.bf16.mxu1 %v5184_v6  ;;  %v2953_v5 = vld [vmem:[#allocation2 + $0x1ac0] sm:$0xff]  ;;  %v5172_v6 = vpack.c.bf16 %v2954_v62, %v2946_v49  ;;  %v2895_v49 = vld [vmem:[#allocation2 + $0x18f0] sm:$0xff]  ;;  %v2902_v62 = vld [vmem:[#allocation2 + $0x1928] sm:$0xff]  ;;  %v5236_v47 = vpack.c.bf16 %v2958_v39, %v2950_v27 }
 0x252   :  { %v3361_v27 = vld [vmem:[#allocation2 + $0x1d08] sm:$0xff] }
 0x253   :  { %4306 = vmatmul.mubr.msk.f32.vlgmr.msra.gmra.mrb[4].mxu0 %vm2397_vm10, %v5856_v10  ;;  %4308 = vmatmul.mubr.msk.f32.vlgmr.msra.gmra.mrb[4].mxu1 %vm2397_vm10, %v5856_v10 }
 0x254   :  { %5155 = vmatpush1.bf16.msra.mxu0 %v5154_v17  ;;  %5187 = vmatpush1.bf16.msra.mxu1 %v5186_v18  ;;  %v5174_v17 = vpack.c.bf16 %v2953_v5, %v2945_v56  ;;  %v5206_v18 = vpack.c.bf16 %v2955_v12, %v2947_v8  ;;  %v5254_v5 = vpack.c.bf16 %v2895_v49, %v2887_v61 }
 0x255   :  { %2754 = vmatprep.mubr.f32.mxu0 %v5852_v13  ;;  %2831 = vmatprep.mubr.f32.mxu1 %v5852_v13  ;;  %v5224_v8 = vpack.c.bf16 %v2910_v1, %v2902_v62  ;;  %v2967_v62 = vld [vmem:[#allocation2 + $0x1b30] sm:$0xff] }
 0x256   :  { %5157 = vmatprep.subr.bf16.mxu0 %v5156_v23  ;;  %5189 = vmatprep.subr.bf16.mxu1 %v5188_v24  ;;  %v2971_v23 = vld [vmem:[#allocation2 + $0x1b50] sm:$0xff]  ;;  %v2978_v24 = vld [vmem:[#allocation2 + $0x1b88] sm:$0xff] }
 0x257   :  { %4307 = vmatmul.mubr.msk.f32.gmra.mrb[6].mxu0 %vm2398_vm11, %v5856_v10  ;;  %4309 = vmatmul.mubr.msk.f32.gmra.mrb[6].mxu1 %vm2398_vm11, %v5856_v10  ;;  %v2975_v1 = vld [vmem:[#allocation2 + $0x1b70] sm:$0xff] }
 0x258   :  { %5159 = vmatpush1.bf16.msra.mxu0 %v5158_v28  ;;  %5191 = vmatpush1.bf16.msra.mxu1 %v5190_v29  ;;  %v5178_v28 = vpack.c.bf16 %v2969_v2, %v2961_v20  ;;  %v5210_v29 = vpack.c.bf16 %v2971_v23, %v2963_v9  ;;  %v5258_v2 = vpack.c.bf16 %v2911_v3, %v2903_v14 }
 0x259   :  { %5161 = vmatprep.subr.bf16.mxu0 %v5160_v34  ;;  %5193 = vmatprep.subr.bf16.mxu1 %v5192_v36  ;;  %v5180_v34 = vpack.c.bf16 %v2986_v11, %v2978_v24  ;;  %v5212_v36 = vpack.c.bf16 %v2988_v26, %v2980_v25  ;;  %v5228_v9 = vpack.c.bf16 %v2926_v15, %v2918_v19  ;;  %v2919_v24 = vld [vmem:[#allocation2 + $0x19b0] sm:$0xff]  ;;  %v2934_v25 = vld [vmem:[#allocation2 + $0x1a28] sm:$0xff] }
 0x25a   :  { %3057 = vmatprep.mubr.f32.mxu0 %v5852_v13  ;;  %3134 = vmatprep.mubr.f32.mxu1 %v5852_v13  ;;  %v2927_v11 = vld [vmem:[#allocation2 + $0x19f0] sm:$0xff]  ;;  %v2942_v26 = vld [vmem:[#allocation2 + $0x1a68] sm:$0xff] }
 0x25b   :  { %v2983_v19 = vld [vmem:[#allocation2 + $0x1bb0] sm:$0xff] }
 0x25c   :  { %5163 = vmatpush1.bf16.msra.mxu0 %v5162_v40  ;;  %5195 = vmatpush1.bf16.msra.mxu1 %v5194_v41  ;;  %v5182_v40 = vpack.c.bf16 %v2985_v32, %v2977_v31  ;;  %v5214_v41 = vpack.c.bf16 %v2987_v33, %v2979_v37  ;;  %v5262_v32 = vpack.c.bf16 %v2927_v11, %v2919_v24  ;;  %v2991_v15 = vld [vmem:[#allocation2 + $0x1bf0] sm:$0xff]  ;;  %v3336_v11 = vld [vmem:[#allocation2 + $0x1c40] sm:$0xff] }
 0x25d   :  { %5165 = vmatprep.subr.bf16.mxu0 %v5164_v44  ;;  %5197 = vmatprep.subr.bf16.mxu1 %v5196_v45  ;;  %v6312_v44 = vpop.permute.xlu1 %2855  ;;  %v5216_v45 = vpack.c.bf16 %v2878_v35, %v2870_v38  ;;  %v5232_v37 = vpack.c.bf16 %v2942_v26, %v2934_v25  ;;  %v2935_v38 = vld [vmem:[#allocation2 + $0x1a30] sm:$0xff] }
 0x25e   :  { %vm2860_vm12 = vcmp.eq.s32.totalorder %v6312_v44, %v6004_v54  ;;  %v2943_v35 = vld [vmem:[#allocation2 + $0x1a70] sm:$0xff]  ;;  %v3379_v44 = vld [vmem:[#allocation2 + $0x1d98] sm:$0xff] }
 0x25f   :  { %v3330_v25 = vld [vmem:[#allocation2 + $0x1c10] sm:$0xff] }
 0x260   :  { %5167 = vmatpush1.bf16.msra.mxu0 %v5166_v30  ;;  %5199 = vmatpush1.bf16.msra.mxu1 %v5198_v55  ;;  %v2896_v30 = vld [vmem:[#allocation2 + $0x18f8] sm:$0xff]  ;;  %v5218_v55 = vpack.c.bf16 %v2877_v43, %v2869_v42  ;;  %v5266_v43 = vpack.c.bf16 %v2943_v35, %v2935_v38  ;;  %v3338_v26 = vld [vmem:[#allocation2 + $0x1c50] sm:$0xff] }
 0x261   :  { %5169 = vmatprep.subr.bf16.mxu0 %v5168_v58  ;;  %5201 = vmatprep.subr.bf16.mxu1 %v5200_v59  ;;  %v2893_v58 = vld [vmem:[#allocation2 + $0x18e0] sm:$0xff]  ;;  %v5220_v59 = vpack.c.bf16 %v2894_v52, %v2886_v51  ;;  %v5252_v60 = vpack.c.bf16 %v2896_v30, %v2888_v53  ;;  %v2951_v51 = vld [vmem:[#allocation2 + $0x1ab0] sm:$0xff]  ;;  %v2966_v53 = vld [vmem:[#allocation2 + $0x1b28] sm:$0xff] }
 0x262   :  { %v5222_v56 = vpack.c.bf16 %v2893_v58, %v2885_v16  ;;  %v2959_v52 = vld [vmem:[#allocation2 + $0x1af0] sm:$0xff]  ;;  %v2974_v30 = vld [vmem:[#allocation2 + $0x1b68] sm:$0xff] }
 0x263   :  { %v5270_v58 = vpack.c.bf16 %v2959_v52, %v2951_v51  ;;  %v5240_v61 = vpack.c.bf16 %v2974_v30, %v2966_v53  ;;  %v3346_v38 = vld [vmem:[#allocation2 + $0x1c90] sm:$0xff] }
 0x264   :  { %5171 = vmatpush1.bf16.msra.mxu0 %v5170_v63  ;;  %5203 = vmatpush1.bf16.msra.mxu1 %v5202_v4  ;;  %v2904_v63 = vld [vmem:[#allocation2 + $0x1938] sm:$0xff]  ;;  %v3354_v35 = vld [vmem:[#allocation2 + $0x1cd0] sm:$0xff] }
 0x265   :  { %5173 = vmatprep.subr.bf16.mxu0 %v5172_v6  ;;  %5205 = vmatprep.subr.bf16.mxu1 %v5204_v7  ;;  %v2912_v4 = vld [vmem:[#allocation2 + $0x1978] sm:$0xff]  ;;  %v2901_v6 = vld [vmem:[#allocation2 + $0x1920] sm:$0xff]  ;;  %v3362_v53 = vld [vmem:[#allocation2 + $0x1d10] sm:$0xff] }
 0x266   :  { %v2909_v7 = vld [vmem:[#allocation2 + $0x1960] sm:$0xff]  ;;  %v5256_v12 = vpack.c.bf16 %v2912_v4, %v2904_v63  ;;  %v2982_v63 = vld [vmem:[#allocation2 + $0x1ba8] sm:$0xff]  ;;  %v3370_v30 = vld [vmem:[#allocation2 + $0x1d50] sm:$0xff] }
 0x267   :  { %v5226_v20 = vpack.c.bf16 %v2909_v7, %v2901_v6  ;;  %v2990_v4 = vld [vmem:[#allocation2 + $0x1be8] sm:$0xff]  ;;  %v5274_v7 = vpack.c.bf16 %v2975_v1, %v2967_v62  ;;  %v3378_v1 = vld [vmem:[#allocation2 + $0x1d90] sm:$0xff] }
 0x268   :  { %5175 = vmatpush1.bf16.msra.mxu0 %v5174_v17  ;;  %5207 = vmatpush1.bf16.msra.mxu1 %v5206_v18  ;;  %v2920_v17 = vld [vmem:[#allocation2 + $0x19b8] sm:$0xff]  ;;  %v5244_v14 = vpack.c.bf16 %v2990_v4, %v2982_v63  ;;  %v3386_v63 = vld [vmem:[#allocation2 + $0x1dd0] sm:$0xff]  ;;  %v3393_v4 = vld [vmem:[#allocation2 + $0x1e08] sm:$0xff] }
 0x269   :  { %5177 = vmatprep.subr.bf16.mxu0 %v5176_v21  ;;  %5209 = vmatprep.subr.bf16.mxu1 %v5208_v22  ;;  %v2928_v18 = vld [vmem:[#allocation2 + $0x19f8] sm:$0xff]  ;;  %v2917_v21 = vld [vmem:[#allocation2 + $0x19a0] sm:$0xff] }
 0x26a   :  { %v2925_v22 = vld [vmem:[#allocation2 + $0x19e0] sm:$0xff]  ;;  %v5260_v23 = vpack.c.bf16 %v2928_v18, %v2920_v17  ;;  %v3329_v17 = vld [vmem:[#allocation2 + $0x1c08] sm:$0xff] }
 0x26b   :  { %v5230_v31 = vpack.c.bf16 %v2925_v22, %v2917_v21  ;;  %v3337_v18 = vld [vmem:[#allocation2 + $0x1c48] sm:$0xff]  ;;  %v5278_v22 = vpack.c.bf16 %v2991_v15, %v2983_v19  ;;  %v3394_v19 = vld [vmem:[#allocation2 + $0x1e10] sm:$0xff] }
 0x26c   :  { %5179 = vmatpush1.bf16.msra.mxu0 %v5178_v28  ;;  %5211 = vmatpush1.bf16.msra.mxu1 %v5210_v29  ;;  %v2936_v28 = vld [vmem:[#allocation2 + $0x1a38] sm:$0xff]  ;;  %v3402_v15 = vld [vmem:[#allocation2 + $0x1e50] sm:$0xff] }
 0x26d   :  { %5181 = vmatprep.subr.bf16.mxu0 %v5180_v34  ;;  %5213 = vmatprep.subr.bf16.mxu1 %v5212_v36  ;;  %v2944_v29 = vld [vmem:[#allocation2 + $0x1a78] sm:$0xff]  ;;  %v2933_v34 = vld [vmem:[#allocation2 + $0x1a20] sm:$0xff] }
 0x26e   :  { %v2941_v36 = vld [vmem:[#allocation2 + $0x1a60] sm:$0xff]  ;;  %v5264_v33 = vpack.c.bf16 %v2944_v29, %v2936_v28  ;;  %v3345_v28 = vld [vmem:[#allocation2 + $0x1c88] sm:$0xff] }
 0x26f   :  { %v5234_v42 = vpack.c.bf16 %v2941_v36, %v2933_v34  ;;  %v3353_v29 = vld [vmem:[#allocation2 + $0x1cc8] sm:$0xff]  ;;  %v5314_v36 = vpack.c.bf16 %v3338_v26, %v3330_v25  ;;  %v3410_v25 = vld [vmem:[#allocation2 + $0x1e90] sm:$0xff] }
 0x270   :  { %5183 = vmatpush1.bf16.msra.mxu0 %v5182_v40  ;;  %5215 = vmatpush1.bf16.msra.mxu1 %v5214_v41  ;;  %v2952_v40 = vld [vmem:[#allocation2 + $0x1ab8] sm:$0xff]  ;;  %v5284_v39 = vpack.c.bf16 %v3353_v29, %v3345_v28  ;;  %v3418_v26 = vld [vmem:[#allocation2 + $0x1ed0] sm:$0xff]  ;;  %v3425_v28 = vld [vmem:[#allocation2 + $0x1f08] sm:$0xff] }
 0x271   :  { %5217 = vmatprep.subr.bf16.mxu0 %v5216_v45  ;;  %5249 = vmatprep.subr.bf16.mxu1 %v5248_v46  ;;  %v2960_v41 = vld [vmem:[#allocation2 + $0x1af8] sm:$0xff]  ;;  %v2949_v45 = vld [vmem:[#allocation2 + $0x1aa0] sm:$0xff]  ;;  %v3433_v29 = vld [vmem:[#allocation2 + $0x1f48] sm:$0xff] }
 0x272   :  { %v2957_v46 = vld [vmem:[#allocation2 + $0x1ae0] sm:$0xff]  ;;  %v5268_v50 = vpack.c.bf16 %v2960_v41, %v2952_v40  ;;  %v3369_v41 = vld [vmem:[#allocation2 + $0x1d48] sm:$0xff] }
 0x273   :  { %4310 = vmatmul.mubr.msk.f32.vlgmr.msra.gmra.mrb[0].mxu0 %vm2860_vm12, %v5856_v10  ;;  %4312 = vmatmul.mubr.msk.f32.vlgmr.msra.gmra.mrb[0].mxu1 %vm2860_vm12, %v5856_v10  ;;  %v5238_v16 = vpack.c.bf16 %v2957_v46, %v2949_v45  ;;  %v5318_v46 = vpack.c.bf16 %v3354_v35, %v3346_v38  ;;  %v5288_v51 = vpack.c.bf16 %v3369_v41, %v3361_v27  ;;  %v3426_v27 = vld [vmem:[#allocation2 + $0x1f10] sm:$0xff]  ;;  %v3449_v41 = vld [vmem:[#allocation2 + $0x1fc8] sm:$0xff] }
 0x274   :  { %5219 = vmatpush1.bf16.msra.mxu0 %v5218_v55  ;;  %5251 = vmatpush1.bf16.msra.mxu1 %v5250_v57  ;;  %v2968_v55 = vld [vmem:[#allocation2 + $0x1b38] sm:$0xff]  ;;  %v5304_v38 = vpack.c.bf16 %v3433_v29, %v3425_v28  ;;  %v3366_v28 = vld [vmem:[#allocation2 + $0x1d30] sm:$0xff] }
 0x275   :  { %5221 = vmatprep.subr.bf16.mxu0 %v5220_v59  ;;  %5253 = vmatprep.subr.bf16.mxu1 %v5252_v60  ;;  %v2976_v57 = vld [vmem:[#allocation2 + $0x1b78] sm:$0xff]  ;;  %v2965_v59 = vld [vmem:[#allocation2 + $0x1b20] sm:$0xff]  ;;  %v3374_v29 = vld [vmem:[#allocation2 + $0x1d70] sm:$0xff] }
 0x276   :  { %3063 = vmatprep.mubr.f32.mxu0 %v5852_v13  ;;  %3140 = vmatprep.mubr.f32.mxu1 %v5852_v13  ;;  %v2973_v60 = vld [vmem:[#allocation2 + $0x1b60] sm:$0xff]  ;;  %v5272_v49 = vpack.c.bf16 %v2976_v57, %v2968_v55  ;;  %v3377_v55 = vld [vmem:[#allocation2 + $0x1d88] sm:$0xff] }
 0x277   :  { %4311 = vmatmul.mubr.msk.f32.gmra.mrb[2].mxu0 %vm2861_vm13, %v5856_v10  ;;  %4313 = vmatmul.mubr.msk.f32.gmra.mrb[2].mxu1 %vm2861_vm13, %v5856_v10  ;;  %v5242_v6 = vpack.c.bf16 %v2973_v60, %v2965_v59  ;;  %v3385_v57 = vld [vmem:[#allocation2 + $0x1dc8] sm:$0xff]  ;;  %v5322_v59 = vpack.c.bf16 %v3370_v30, %v3362_v53  ;;  %v3376_v60 = vld [vmem:[#allocation2 + $0x1d80] sm:$0xff]  ;;  %v3442_v53 = vld [vmem:[#allocation2 + $0x1f90] sm:$0xff] }
 0x278   :  { %5223 = vmatpush1.bf16.msra.mxu0 %v5222_v56  ;;  %5255 = vmatpush1.bf16.msra.mxu1 %v5254_v5  ;;  %v2984_v56 = vld [vmem:[#allocation2 + $0x1bb8] sm:$0xff]  ;;  %v3450_v30 = vld [vmem:[#allocation2 + $0x1fd0] sm:$0xff] }
 0x279   :  { %5225 = vmatprep.subr.bf16.mxu0 %v5224_v8  ;;  %5257 = vmatprep.subr.bf16.mxu1 %v5256_v12  ;;  %v2992_v5 = vld [vmem:[#allocation2 + $0x1bf8] sm:$0xff]  ;;  %v2981_v8 = vld [vmem:[#allocation2 + $0x1ba0] sm:$0xff] }
 0x27a   :  { %3211 = vmatprep.mubr.f32.mxu0 %v5852_v13  ;;  %3288 = vmatprep.mubr.f32.mxu1 %v5852_v13  ;;  %v2989_v12 = vld [vmem:[#allocation2 + $0x1be0] sm:$0xff]  ;;  %v5276_v3 = vpack.c.bf16 %v2992_v5, %v2984_v56  ;;  %v3401_v56 = vld [vmem:[#allocation2 + $0x1e48] sm:$0xff]  ;;  %v3395_v5 = vld [vmem:[#allocation2 + $0x1e18] sm:$0xff] }
 0x27b   :  { %v5246_v21 = vpack.c.bf16 %v2989_v12, %v2981_v8  ;;  %v3392_v8 = vld [vmem:[#allocation2 + $0x1e00] sm:$0xff] }
 0x27c   :  { %5227 = vmatpush1.bf16.msra.mxu0 %v5226_v20  ;;  %5259 = vmatpush1.bf16.msra.mxu1 %v5258_v2  ;;  %v3331_v20 = vld [vmem:[#allocation2 + $0x1c18] sm:$0xff]  ;;  %v3400_v12 = vld [vmem:[#allocation2 + $0x1e40] sm:$0xff] }
 0x27d   :  { %5229 = vmatprep.subr.bf16.mxu0 %v5228_v9  ;;  %5261 = vmatprep.subr.bf16.mxu1 %v5260_v23  ;;  %v3339_v2 = vld [vmem:[#allocation2 + $0x1c58] sm:$0xff]  ;;  %v3328_v9 = vld [vmem:[#allocation2 + $0x1c00] sm:$0xff]  ;;  %v5280_v23 = vpack.c.bf16 %v3337_v18, %v3329_v17  ;;  %v3409_v17 = vld [vmem:[#allocation2 + $0x1e88] sm:$0xff] }
 0x27e   :  { %v5312_v24 = vpack.c.bf16 %v3339_v2, %v3331_v20  ;;  %v5282_v34 = vpack.c.bf16 %v3336_v11, %v3328_v9  ;;  %v3417_v18 = vld [vmem:[#allocation2 + $0x1ec8] sm:$0xff]  ;;  %v3411_v20 = vld [vmem:[#allocation2 + $0x1e98] sm:$0xff]  ;;  %v3408_v9 = vld [vmem:[#allocation2 + $0x1e80] sm:$0xff] }
 0x27f   :  { %v3419_v2 = vld [vmem:[#allocation2 + $0x1ed8] sm:$0xff] }
 0x280   :  { %5231 = vmatpush1.bf16.msra.mxu0 %v5230_v31  ;;  %5263 = vmatpush1.bf16.msra.mxu1 %v5262_v32  ;;  %v3347_v31 = vld [vmem:[#allocation2 + $0x1c98] sm:$0xff]  ;;  %v5332_v11 = vpack.c.bf16 %v3419_v2, %v3411_v20  ;;  %v3373_v20 = vld [vmem:[#allocation2 + $0x1d68] sm:$0xff] }
 0x281   :  { %5233 = vmatprep.subr.bf16.mxu0 %v5232_v37  ;;  %5265 = vmatprep.subr.bf16.mxu1 %v5264_v33  ;;  %v3355_v32 = vld [vmem:[#allocation2 + $0x1cd8] sm:$0xff]  ;;  %v3344_v37 = vld [vmem:[#allocation2 + $0x1c80] sm:$0xff] }
 0x282   :  { %v3352_v33 = vld [vmem:[#allocation2 + $0x1cc0] sm:$0xff]  ;;  %v5316_v40 = vpack.c.bf16 %v3355_v32, %v3347_v31  ;;  %v3427_v31 = vld [vmem:[#allocation2 + $0x1f18] sm:$0xff] }
 0x283   :  { %v5286_v45 = vpack.c.bf16 %v3352_v33, %v3344_v37  ;;  %v3435_v32 = vld [vmem:[#allocation2 + $0x1f58] sm:$0xff]  ;;  %v3424_v37 = vld [vmem:[#allocation2 + $0x1f00] sm:$0xff] }
 0x284   :  { %5235 = vmatpush1.bf16.msra.mxu0 %v5234_v42  ;;  %5267 = vmatpush1.bf16.msra.mxu1 %v5266_v43  ;;  %v3363_v42 = vld [vmem:[#allocation2 + $0x1d18] sm:$0xff]  ;;  %v3432_v33 = vld [vmem:[#allocation2 + $0x1f40] sm:$0xff]  ;;  %v5336_v35 = vpack.c.bf16 %v3435_v32, %v3427_v31  ;;  %v3381_v31 = vld [vmem:[#allocation2 + $0x1da8] sm:$0xff] }
 0x285   :  { %5237 = vmatprep.subr.bf16.mxu0 %v5236_v47  ;;  %5269 = vmatprep.subr.bf16.mxu1 %v5268_v50  ;;  %v3371_v43 = vld [vmem:[#allocation2 + $0x1d58] sm:$0xff]  ;;  %v3360_v47 = vld [vmem:[#allocation2 + $0x1d00] sm:$0xff]  ;;  %v3389_v32 = vld [vmem:[#allocation2 + $0x1de8] sm:$0xff] }
 0x286   :  { %v3368_v50 = vld [vmem:[#allocation2 + $0x1d40] sm:$0xff]  ;;  %v5320_v52 = vpack.c.bf16 %v3371_v43, %v3363_v42  ;;  %v3443_v42 = vld [vmem:[#allocation2 + $0x1f98] sm:$0xff] }
 0x287   :  { %v3451_v43 = vld [vmem:[#allocation2 + $0x1fd8] sm:$0xff] }
 0x288   :  { %5239 = vmatpush1.bf16.msra.mxu0 %v5238_v16  ;;  %5271 = vmatpush1.bf16.msra.mxu1 %v5270_v58  ;;  %v3387_v16 = vld [vmem:[#allocation2 + $0x1dd8] sm:$0xff]  ;;  %v5290_v58 = vpack.c.bf16 %v3368_v50, %v3360_v47  ;;  %v3440_v47 = vld [vmem:[#allocation2 + $0x1f80] sm:$0xff] }
 0x289   :  { %5241 = vmatprep.subr.bf16.mxu0 %v5240_v61  ;;  %5273 = vmatprep.subr.bf16.mxu1 %v5272_v49  ;;  %v3384_v61 = vld [vmem:[#allocation2 + $0x1dc0] sm:$0xff]  ;;  %v5292_v49 = vpack.c.bf16 %v3385_v57, %v3377_v55  ;;  %v5324_v62 = vpack.c.bf16 %v3387_v16, %v3379_v44  ;;  %v3333_v55 = vld [vmem:[#allocation2 + $0x1c28] sm:$0xff]  ;;  %v3335_v44 = vld [vmem:[#allocation2 + $0x1c38] sm:$0xff] }
 0x28a   :  { %v5294_v0 = vpack.c.bf16 %v3384_v61, %v3376_v60  ;;  %v3448_v50 = vld [vmem:[#allocation2 + $0x1fc0] sm:$0xff]  ;;  %v3341_v57 = vld [vmem:[#allocation2 + $0x1c68] sm:$0xff]  ;;  %v3343_v16 = vld [vmem:[#allocation2 + $0x1c78] sm:$0xff]  ;;  %v6360_v61 = vpop.permute.xlu1 %3318 }
 0x28b   :  { %v3332_v60 = vld [vmem:[#allocation2 + $0x1c20] sm:$0xff]  ;;  %vm3323_vm14 = vcmp.eq.s32.totalorder %v6360_v61, %v6004_v54  ;;  %v3367_v2 = vld [vmem:[#allocation2 + $0x1d38] sm:$0xff]  ;;  %v3855_v61 = vld [vmem:[#allocation7 + $0x8] sm:$0xff] }
 0x28c   :  { %5243 = vmatpush1.bf16.msra.mxu0 %v5242_v6  ;;  %5275 = vmatpush1.bf16.msra.mxu1 %v5274_v7  ;;  %v3403_v6 = vld [vmem:[#allocation2 + $0x1e58] sm:$0xff]  ;;  %v5326_v7 = vpack.c.bf16 %v3386_v63, %v3378_v1  ;;  %v3340_v1 = vld [vmem:[#allocation2 + $0x1c60] sm:$0xff]  ;;  %v3334_v63 = vld [vmem:[#allocation2 + $0x1c30] sm:$0xff] }
 0x28d   :  { %5245 = vmatprep.subr.bf16.mxu0 %v5244_v14  ;;  %5277 = vmatprep.subr.bf16.mxu1 %v5276_v3  ;;  %v5296_v14 = vpack.c.bf16 %v3401_v56, %v3393_v4  ;;  %v5328_v3 = vpack.c.bf16 %v3403_v6, %v3395_v5  ;;  %v3342_v4 = vld [vmem:[#allocation2 + $0x1c70] sm:$0xff]  ;;  %v3349_v56 = vld [vmem:[#allocation2 + $0x1ca8] sm:$0xff]  ;;  %v3351_v6 = vld [vmem:[#allocation2 + $0x1cb8] sm:$0xff] }
 0x28e   :  { %v3357_v5 = vld [vmem:[#allocation2 + $0x1ce8] sm:$0xff] }
 0x290   :  { %5247 = vmatpush1.bf16.msra.mxu0 %v5246_v21  ;;  %5279 = vmatpush1.bf16.msra.mxu1 %v5278_v22  ;;  %v5298_v21 = vpack.c.bf16 %v3400_v12, %v3392_v8  ;;  %v5330_v22 = vpack.c.bf16 %v3402_v15, %v3394_v19  ;;  %v5378_v8 = vpack.c.bf16 %v3342_v4, %v3334_v63  ;;  %v3348_v12 = vld [vmem:[#allocation2 + $0x1ca0] sm:$0xff]  ;;  %v3358_v19 = vld [vmem:[#allocation2 + $0x1cf0] sm:$0xff]  ;;  %v3365_v15 = vld [vmem:[#allocation2 + $0x1d28] sm:$0xff] }
 0x291   :  { %5281 = vmatprep.subr.bf16.mxu0 %v5280_v23  ;;  %5313 = vmatprep.subr.bf16.mxu1 %v5312_v24  ;;  %v3416_v23 = vld [vmem:[#allocation2 + $0x1ec0] sm:$0xff]  ;;  %v5300_v24 = vpack.c.bf16 %v3417_v18, %v3409_v17  ;;  %v5348_v17 = vpack.c.bf16 %v3357_v5, %v3349_v56  ;;  %v3414_v56 = vld [vmem:[#allocation2 + $0x1eb0] sm:$0xff] }
 0x292   :  { %v3422_v5 = vld [vmem:[#allocation2 + $0x1ef0] sm:$0xff] }
 0x293   :  { %4314 = vmatmul.mubr.msk.f32.vlgmr.msra.gmra.mrb[4].mxu0 %vm2860_vm12, %v5856_v10  ;;  %4316 = vmatmul.mubr.msk.f32.vlgmr.msra.gmra.mrb[4].mxu1 %vm2860_vm12, %v5856_v10 }
 0x294   :  { %5283 = vmatpush1.bf16.msra.mxu0 %v5282_v34  ;;  %5315 = vmatpush1.bf16.msra.mxu1 %v5314_v36  ;;  %v5302_v34 = vpack.c.bf16 %v3416_v23, %v3408_v9  ;;  %v5334_v36 = vpack.c.bf16 %v3418_v26, %v3410_v25  ;;  %v5352_v25 = vpack.c.bf16 %v3373_v20, %v3365_v15  ;;  %v3438_v20 = vld [vmem:[#allocation2 + $0x1f70] sm:$0xff] }
 0x295   :  { %3217 = vmatprep.mubr.f32.mxu0 %v5852_v13  ;;  %3294 = vmatprep.mubr.f32.mxu1 %v5852_v13 }
 0x296   :  { %5285 = vmatprep.subr.bf16.mxu0 %v5284_v39  ;;  %5317 = vmatprep.subr.bf16.mxu1 %v5316_v40  ;;  %v3434_v39 = vld [vmem:[#allocation2 + $0x1f50] sm:$0xff]  ;;  %v3441_v40 = vld [vmem:[#allocation2 + $0x1f88] sm:$0xff] }
 0x297   :  { %4315 = vmatmul.mubr.msk.f32.gmra.mrb[6].mxu0 %vm2861_vm13, %v5856_v10  ;;  %4317 = vmatmul.mubr.msk.f32.gmra.mrb[6].mxu1 %vm2861_vm13, %v5856_v10 }
 0x298   :  { %5287 = vmatpush1.bf16.msra.mxu0 %v5286_v45  ;;  %5319 = vmatpush1.bf16.msra.mxu1 %v5318_v46  ;;  %v5306_v45 = vpack.c.bf16 %v3432_v33, %v3424_v37  ;;  %v5338_v46 = vpack.c.bf16 %v3434_v39, %v3426_v27  ;;  %v5386_v33 = vpack.c.bf16 %v3374_v29, %v3366_v28  ;;  %v3452_v29 = vld [vmem:[#allocation2 + $0x1fe0] sm:$0xff] }
 0x299   :  { %5289 = vmatprep.subr.bf16.mxu0 %v5288_v51  ;;  %5321 = vmatprep.subr.bf16.mxu1 %v5320_v52  ;;  %v5308_v51 = vpack.c.bf16 %v3449_v41, %v3441_v40  ;;  %v5340_v52 = vpack.c.bf16 %v3451_v43, %v3443_v42  ;;  %v5356_v27 = vpack.c.bf16 %v3389_v32, %v3381_v31  ;;  %v3382_v40 = vld [vmem:[#allocation2 + $0x1db0] sm:$0xff]  ;;  %v3397_v42 = vld [vmem:[#allocation2 + $0x1e28] sm:$0xff] }
 0x29a   :  { %3520 = vmatprep.mubr.f32.mxu0 %v5852_v13  ;;  %3597 = vmatprep.mubr.f32.mxu1 %v5852_v13  ;;  %v3390_v41 = vld [vmem:[#allocation2 + $0x1df0] sm:$0xff]  ;;  %v3405_v43 = vld [vmem:[#allocation2 + $0x1e68] sm:$0xff] }
 0x29b   :  { %v3446_v31 = vld [vmem:[#allocation2 + $0x1fb0] sm:$0xff] }
 0x29c   :  { %5291 = vmatpush1.bf16.msra.mxu0 %v5290_v58  ;;  %5323 = vmatpush1.bf16.msra.mxu1 %v5322_v59  ;;  %v5310_v58 = vpack.c.bf16 %v3448_v50, %v3440_v47  ;;  %v5342_v59 = vpack.c.bf16 %v3450_v30, %v3442_v53  ;;  %v5390_v50 = vpack.c.bf16 %v3390_v41, %v3382_v40  ;;  %v3454_v32 = vld [vmem:[#allocation2 + $0x1ff0] sm:$0xff]  ;;  %v3861_v40 = vld [vmem:[#allocation7 + $0x38] sm:$0xff]  ;;  %v3858_v41 = vld [vmem:[#allocation7 + $0x20] sm:$0xff] }
 0x29d   :  { %5293 = vmatprep.subr.bf16.mxu0 %v5292_v49  ;;  %5325 = vmatprep.subr.bf16.mxu1 %v5324_v62  ;;  %v5344_v49 = vpack.c.bf16 %v3341_v57, %v3333_v55  ;;  %v5376_v62 = vpack.c.bf16 %v3343_v16, %v3335_v44  ;;  %v5360_v53 = vpack.c.bf16 %v3405_v43, %v3397_v42  ;;  %v3398_v55 = vld [vmem:[#allocation2 + $0x1e30] sm:$0xff]  ;;  %v3413_v44 = vld [vmem:[#allocation2 + $0x1ea8] sm:$0xff]  ;;  %v3860_v43 = vld [vmem:[#allocation7 + $0x30] sm:$0xff] }
 0x29e   :  { %v3406_v57 = vld [vmem:[#allocation2 + $0x1e70] sm:$0xff]  ;;  %v3421_v16 = vld [vmem:[#allocation2 + $0x1ee8] sm:$0xff] }
 0x29f   :  { %v5364_v63 = vpack.c.bf16 %v3421_v16, %v3413_v44  ;;  %v3873_v44 = vld [vmem:[#allocation7 + $0x98] sm:$0xff] }
 0x2a0   :  { %5295 = vmatpush1.bf16.msra.mxu0 %v5294_v0  ;;  %5327 = vmatpush1.bf16.msra.mxu1 %v5326_v7  ;;  %v3359_v0 = vld [vmem:[#allocation2 + $0x1cf8] sm:$0xff]  ;;  %v5346_v7 = vpack.c.bf16 %v3340_v1, %v3332_v60  ;;  %v3420_v1 = vld [vmem:[#allocation2 + $0x1ee0] sm:$0xff] }
 0x2a1   :  { %5297 = vmatprep.subr.bf16.mxu0 %v5296_v14  ;;  %5329 = vmatprep.subr.bf16.mxu1 %v5328_v3  ;;  %v3356_v14 = vld [vmem:[#allocation2 + $0x1ce0] sm:$0xff]  ;;  %v3350_v3 = vld [vmem:[#allocation2 + $0x1cb0] sm:$0xff]  ;;  %v5380_v18 = vpack.c.bf16 %v3359_v0, %v3351_v6  ;;  %v3429_v6 = vld [vmem:[#allocation2 + $0x1f28] sm:$0xff] }
 0x2a2   :  { %v5350_v9 = vpack.c.bf16 %v3356_v14, %v3348_v12  ;;  %v5382_v23 = vpack.c.bf16 %v3358_v19, %v3350_v3  ;;  %v3437_v0 = vld [vmem:[#allocation2 + $0x1f68] sm:$0xff]  ;;  %v5398_v14 = vpack.c.bf16 %v3422_v5, %v3414_v56  ;;  %v3428_v3 = vld [vmem:[#allocation2 + $0x1f20] sm:$0xff]  ;;  %v3876_v56 = vld [vmem:[#allocation7 + $0xb0] sm:$0xff] }
 0x2a3   :  { %v3436_v19 = vld [vmem:[#allocation2 + $0x1f60] sm:$0xff]  ;;  %v5368_v15 = vpack.c.bf16 %v3437_v0, %v3429_v6  ;;  %v3879_v6 = vld [vmem:[#allocation7 + $0xc8] sm:$0xff] }
 0x2a4   :  { %5299 = vmatpush1.bf16.msra.mxu0 %v5298_v21  ;;  %5331 = vmatpush1.bf16.msra.mxu1 %v5330_v22  ;;  %v3375_v21 = vld [vmem:[#allocation2 + $0x1d78] sm:$0xff]  ;;  %v6364_v22 = vpop.permute.xlu1 %3321  ;;  %v3881_v0 = vld [vmem:[#allocation7 + $0xd8] sm:$0xff] }
 0x2a5   :  { %5301 = vmatprep.subr.bf16.mxu0 %v5300_v24  ;;  %5333 = vmatprep.subr.bf16.mxu1 %v5332_v11  ;;  %v3364_v24 = vld [vmem:[#allocation2 + $0x1d20] sm:$0xff]  ;;  %v5384_v26 = vpack.c.bf16 %v3375_v21, %v3367_v2  ;;  %vm3324_vm15 = vcmp.eq.s32.totalorder %v6364_v22, %v6004_v54  ;;  %v3445_v2 = vld [vmem:[#allocation2 + $0x1fa8] sm:$0xff]  ;;  %v5414_v54 = vpack.c.bf16 %v3860_v43, %v3858_v41 }
 0x2a6   :  { %v3372_v11 = vld [vmem:[#allocation2 + $0x1d60] sm:$0xff]  ;;  %v3453_v21 = vld [vmem:[#allocation2 + $0x1fe8] sm:$0xff] }
 0x2a7   :  { %v5354_v37 = vpack.c.bf16 %v3372_v11, %v3364_v24  ;;  %v5370_v24 = vpack.c.bf16 %v3436_v19, %v3428_v3  ;;  %v3862_v22 = vld [vmem:[#allocation7 + $0x40] sm:$0xff]  ;;  %v3883_v3 = vld [vmem:[#allocation7 + $0xe8] sm:$0xff]  ;;  %v3885_v19 = vld [vmem:[#allocation7 + $0xf8] sm:$0xff] }
 0x2a8   :  { %5303 = vmatpush1.bf16.msra.mxu0 %v5302_v34  ;;  %5335 = vmatpush1.bf16.msra.mxu1 %v5334_v36  ;;  %v3383_v34 = vld [vmem:[#allocation2 + $0x1db8] sm:$0xff] }
 0x2a9   :  { %5305 = vmatprep.subr.bf16.mxu0 %v5304_v38  ;;  %5337 = vmatprep.subr.bf16.mxu1 %v5336_v35  ;;  %v3391_v36 = vld [vmem:[#allocation2 + $0x1df8] sm:$0xff]  ;;  %v3380_v38 = vld [vmem:[#allocation2 + $0x1da0] sm:$0xff] }
 0x2aa   :  { %v3388_v35 = vld [vmem:[#allocation2 + $0x1de0] sm:$0xff]  ;;  %v5388_v39 = vpack.c.bf16 %v3391_v36, %v3383_v34  ;;  %v5406_v36 = vpack.c.bf16 %v3454_v32, %v3446_v31 }
 0x2ab   :  { %v5358_v47 = vpack.c.bf16 %v3388_v35, %v3380_v38  ;;  %v3854_v38 = vld [vmem:[#allocation7] sm:$0xff]  ;;  %v3856_v35 = vld [vmem:[#allocation7 + $0x10] sm:$0xff] }
 0x2ac   :  { %5307 = vmatpush1.bf16.msra.mxu0 %v5306_v45  ;;  %5339 = vmatpush1.bf16.msra.mxu1 %v5338_v46  ;;  %v3399_v45 = vld [vmem:[#allocation2 + $0x1e38] sm:$0xff] }
 0x2ad   :  { %5309 = vmatprep.subr.bf16.mxu0 %v5308_v51  ;;  %5341 = vmatprep.subr.bf16.mxu1 %v5340_v52  ;;  %v3407_v46 = vld [vmem:[#allocation2 + $0x1e78] sm:$0xff]  ;;  %v3396_v51 = vld [vmem:[#allocation2 + $0x1e20] sm:$0xff] }
 0x2ae   :  { %v3404_v52 = vld [vmem:[#allocation2 + $0x1e60] sm:$0xff]  ;;  %v5392_v30 = vpack.c.bf16 %v3407_v46, %v3399_v45  ;;  %v3863_v45 = vld [vmem:[#allocation7 + $0x48] sm:$0xff] }
 0x2af   :  { %v5362_v60 = vpack.c.bf16 %v3404_v52, %v3396_v51  ;;  %v3865_v46 = vld [vmem:[#allocation7 + $0x58] sm:$0xff] }
 0x2b0   :  { %5311 = vmatpush1.bf16.msra.mxu0 %v5310_v58  ;;  %5343 = vmatpush1.bf16.msra.mxu1 %v5342_v59  ;;  %v3415_v58 = vld [vmem:[#allocation2 + $0x1eb8] sm:$0xff]  ;;  %v3869_v51 = vld [vmem:[#allocation7 + $0x78] sm:$0xff] }
 0x2b1   :  { %5345 = vmatprep.subr.bf16.mxu0 %v5344_v49  ;;  %5377 = vmatprep.subr.bf16.mxu1 %v5376_v62  ;;  %v3423_v59 = vld [vmem:[#allocation2 + $0x1ef8] sm:$0xff]  ;;  %v5394_v49 = vpack.c.bf16 %v3406_v57, %v3398_v55  ;;  %v3412_v62 = vld [vmem:[#allocation2 + $0x1ea0] sm:$0xff]  ;;  %v3871_v57 = vld [vmem:[#allocation7 + $0x88] sm:$0xff] }
 0x2b2   :  { %v5396_v4 = vpack.c.bf16 %v3423_v59, %v3415_v58  ;;  %v5366_v12 = vpack.c.bf16 %v3420_v1, %v3412_v62  ;;  %v3868_v55 = vld [vmem:[#allocation7 + $0x70] sm:$0xff]  ;;  %v5424_v58 = vpack.c.bf16 %v3873_v44, %v3871_v57  ;;  %v3870_v59 = vld [vmem:[#allocation7 + $0x80] sm:$0xff]  ;;  %v3875_v62 = vld [vmem:[#allocation7 + $0xa8] sm:$0xff] }
 0x2b3   :  { %4318 = vmatmul.mubr.msk.f32.vlgmr.msra.gmra.mrb[0].mxu0 %vm3323_vm14, %v5856_v10  ;;  %4320 = vmatmul.mubr.msk.f32.vlgmr.msra.gmra.mrb[0].mxu1 %vm3323_vm14, %v5856_v10  ;;  %v3877_v1 = vld [vmem:[#allocation7 + $0xb8] sm:$0xff] }
 0x2b4   :  { %5347 = vmatpush1.bf16.msra.mxu0 %v5346_v7  ;;  %5379 = vmatpush1.bf16.msra.mxu1 %v5378_v8  ;;  %v3431_v7 = vld [vmem:[#allocation2 + $0x1f38] sm:$0xff] }
 0x2b5   :  { %3526 = vmatprep.mubr.f32.mxu0 %v5852_v13  ;;  %3603 = vmatprep.mubr.f32.mxu1 %v5852_v13  ;;  %v3439_v8 = vld [vmem:[#allocation2 + $0x1f78] sm:$0xff] }
 0x2b6   :  { %5349 = vmatprep.subr.bf16.mxu0 %v5348_v17  ;;  %5381 = vmatprep.subr.bf16.mxu1 %v5380_v18  ;;  %v5400_v17 = vpack.c.bf16 %v3439_v8, %v3431_v7  ;;  %v3430_v18 = vld [vmem:[#allocation2 + $0x1f30] sm:$0xff]  ;;  %v5432_v7 = vpack.c.bf16 %v3881_v0, %v3879_v6  ;;  %v3878_v8 = vld [vmem:[#allocation7 + $0xc0] sm:$0xff] }
 0x2b7   :  { %4319 = vmatmul.mubr.msk.f32.gmra.mrb[2].mxu0 %vm3324_vm15, %v5856_v10  ;;  %4321 = vmatmul.mubr.msk.f32.gmra.mrb[2].mxu1 %vm3324_vm15, %v5856_v10  ;;  %v5402_v11 = vpack.c.bf16 %v3438_v20, %v3430_v18  ;;  %v3884_v18 = vld [vmem:[#allocation7 + $0xf0] sm:$0xff] }
 0x2b8   :  { %5351 = vmatpush1.bf16.msra.mxu0 %v5350_v9  ;;  %5383 = vmatpush1.bf16.msra.mxu1 %v5382_v23  ;;  %v3447_v9 = vld [vmem:[#allocation2 + $0x1fb8] sm:$0xff] }
 0x2b9   :  { %5353 = vmatprep.subr.bf16.mxu0 %v5352_v25  ;;  %5385 = vmatprep.subr.bf16.mxu1 %v5384_v26  ;;  %v3455_v23 = vld [vmem:[#allocation2 + $0x1ff8] sm:$0xff]  ;;  %v3444_v25 = vld [vmem:[#allocation2 + $0x1fa0] sm:$0xff]  ;;  %v5372_v26 = vpack.c.bf16 %v3453_v21, %v3445_v2  ;;  %v3783_v2 = vshrl.u32 %v107_v48, 7 }
 0x2ba   :  { %3674 = vmatprep.mubr.f32.mxu0 %v5852_v13  ;;  %3751 = vmatprep.mubr.f32.mxu1 %v5852_v13  ;;  %v5404_v28 = vpack.c.bf16 %v3455_v23, %v3447_v9  ;;  %v5374_v34 = vpack.c.bf16 %v3452_v29, %v3444_v25  ;;  %v3780_v9 = vld [vmem:[#allocation5] sm:$0xff] }
 0x2bb   :  { %v6409_v21 = vsub.s32 0, %v3783_v2  ;;  %v6411_v23 = vsub.s32 1, %v3783_v2 }
 0x2bc   :  { %5355 = vmatpush1.bf16.msra.mxu0 %v5354_v37  ;;  %5387 = vmatpush1.bf16.msra.mxu1 %v5386_v33  ;;  %v3857_v37 = vld [vmem:[#allocation7 + $0x18] sm:$0xff] }
 0x2bd   :  { %5357 = vmatprep.subr.bf16.mxu0 %v5356_v27  ;;  %5389 = vmatprep.subr.bf16.mxu1 %v5388_v39  ;;  %v5408_v33 = vpack.c.bf16 %v3857_v37, %v3855_v61  ;;  %v5410_v27 = vpack.c.bf16 %v3856_v35, %v3854_v38  ;;  %v3859_v39 = vld [vmem:[#allocation7 + $0x28] sm:$0xff]  ;;  %v3789_v25 = vrot.slane %v3780_v9, %v6411_v23 }
 0x2be   :  { %v5412_v42 = vpack.c.bf16 %v3861_v40, %v3859_v39 }
 0x2c0   :  { %5359 = vmatpush1.bf16.msra.mxu0 %v5358_v47  ;;  %5391 = vmatpush1.bf16.msra.mxu1 %v5390_v50  ;;  %v3864_v47 = vld [vmem:[#allocation7 + $0x50] sm:$0xff]  ;;  %v3867_v50 = vld [vmem:[#allocation7 + $0x68] sm:$0xff] }
 0x2c1   :  { %5361 = vmatprep.subr.bf16.mxu0 %v5360_v53  ;;  %5393 = vmatprep.subr.bf16.mxu1 %v5392_v30  ;;  %v5418_v52 = vpack.c.bf16 %v3864_v47, %v3862_v22  ;;  %v5420_v53 = vpack.c.bf16 %v3869_v51, %v3867_v50  ;;  %v3866_v30 = vld [vmem:[#allocation7 + $0x60] sm:$0xff]  ;;  %v3800_v50 = vsub.s32 4, %v3783_v2  ;;  %v3804_v51 = vsub.s32 5, %v3783_v2 }
 0x2c2   :  { %v5422_v16 = vpack.c.bf16 %v3868_v55, %v3866_v30  ;;  %v3812_v55 = vsub.s32 7, %v3783_v2 }
 0x2c3   :  { %v3805_v30 = vrot.slane %v3780_v9, %v3804_v51  ;;  %v4016_v51 = vld [vmem:[#allocation7 + $0x190] sm:$0xff] }
 0x2c4   :  { %5363 = vmatpush1.bf16.msra.mxu0 %v5362_v60  ;;  %5395 = vmatpush1.bf16.msra.mxu1 %v5394_v49  ;;  %v3872_v60 = vld [vmem:[#allocation7 + $0x90] sm:$0xff] }
 0x2c5   :  { %5365 = vmatprep.subr.bf16.mxu0 %v5364_v63  ;;  %5397 = vmatprep.subr.bf16.mxu1 %v5396_v4  ;;  %v5426_v49 = vpack.c.bf16 %v3872_v60, %v3870_v59  ;;  %v5428_v63 = vpack.c.bf16 %v3877_v1, %v3875_v62  ;;  %v3874_v4 = vld [vmem:[#allocation7 + $0xa0] sm:$0xff]  ;;  %v3813_v1 = vrot.slane %v3780_v9, %v3812_v55 }
 0x2c6   :  { %v5430_v5 = vpack.c.bf16 %v3876_v56, %v3874_v4 }
 0x2c8   :  { %5367 = vmatpush1.bf16.msra.mxu0 %v5366_v12  ;;  %5399 = vmatpush1.bf16.msra.mxu1 %v5398_v14  ;;  %v3880_v12 = vld [vmem:[#allocation7 + $0xd0] sm:$0xff] }
 0x2c9   :  { %5369 = vmatprep.subr.bf16.mxu0 %v5368_v15  ;;  %5401 = vmatprep.subr.bf16.mxu1 %v5400_v17  ;;  %v5434_v14 = vpack.c.bf16 %v3880_v12, %v3878_v8  ;;  %v5436_v15 = vpack.c.bf16 %v3885_v19, %v3883_v3  ;;  %v3882_v17 = vld [vmem:[#allocation7 + $0xe0] sm:$0xff] }
 0x2ca   :  { %v5438_v20 = vpack.c.bf16 %v3884_v18, %v3882_v17 }
 0x2cc   :  { %5371 = vmatpush1.bf16.msra.mxu0 %v5370_v24  ;;  %5403 = vmatpush1.bf16.msra.mxu1 %v5402_v11  ;;  %v3792_v24 = vsub.s32 2, %v3783_v2  ;;  %v3785_v11 = vrot.slane %v3780_v9, %v6409_v21 }
 0x2cd   :  { %5373 = vmatprep.subr.bf16.mxu0 %v5372_v26  ;;  %5405 = vmatprep.subr.bf16.mxu1 %v5404_v28  ;;  %v3796_v26 = vsub.s32 3, %v3783_v2 }
 0x2ce   :  { %v3793_v31 = vrot.slane %v3780_v9, %v3792_v24 }
 0x2cf   :  { %v3797_v37 = vrot.slane %v3780_v9, %v3796_v26 }
 0x2d0   :  { %5375 = vmatpush1.bf16.msra.mxu0 %v5374_v34  ;;  %5407 = vmatpush1.bf16.msra.mxu1 %v5406_v36 }
 0x2d1   :  { %5409 = vmatprep.subr.bf16.mxu0 %v5408_v33 }
 0x2d3   :  { %4322 = vmatmul.mubr.msk.f32.vlgmr.msra.gmra.mrb[4].mxu0 %vm3323_vm14, %v5856_v10  ;;  %4324 = vmatmul.mubr.msk.f32.vlgmr.msra.gmra.mrb[4].mxu1 %vm3323_vm14, %v5856_v10 }
 0x2d4   :  { %3680 = vmatprep.mubr.f32.mxu0 %v5852_v13  ;;  %3757 = vmatprep.mubr.f32.mxu1 %v5852_v13 }
 0x2d5   :  { %5411 = vmatpush1.bf16.msra.mxu0 %v5410_v27 }
 0x2d6   :  { %5413 = vmatprep.subr.bf16.mxu0 %v5412_v42 }
 0x2d7   :  { %4323 = vmatmul.mubr.msk.f32.gmra.mrb[6].mxu0 %vm3324_vm15, %v5856_v10  ;;  %4325 = vmatmul.mubr.msk.f32.gmra.mrb[6].mxu1 %vm3324_vm15, %v5856_v10  ;;  %v5416_v10 = vpack.c.bf16 %v3865_v46, %v3863_v45 }
 0x2d8   :  { %3962 = vmatprep.mubr.f32.mxu0 %v5852_v13  ;;  %4107 = vmatprep.mubr.f32.mxu1 %v5852_v13 }
 0x2d9   :  { %5415 = vmatpush1.bf16.msra.mxu0 %v5414_v54 }
 0x2da   :  { %5417 = vmatprep.subr.bf16.mxu0 %v5416_v10 }
 0x2dd   :  { %5419 = vmatpush1.bf16.msra.mxu0 %v5418_v52  ;;  %v3801_v52 = vrot.slane %v3780_v9, %v3800_v50  ;;  %v4014_v50 = vld [vmem:[#allocation7 + $0x180] sm:$0xff] }
 0x2de   :  { %5421 = vmatprep.subr.bf16.mxu0 %v5420_v53  ;;  %v3808_v53 = vsub.s32 6, %v3783_v2 }
 0x2e1   :  { %5423 = vmatpush1.bf16.msra.mxu0 %v5422_v16 }
 0x2e2   :  { %5425 = vmatprep.subr.bf16.mxu0 %v5424_v58  ;;  %v3809_v58 = vrot.slane %v3780_v9, %v3808_v53  ;;  %v4019_v53 = vld [vmem:[#allocation7 + $0x1a8] sm:$0xff] }
 0x2e5   :  { %5427 = vmatpush1.bf16.msra.mxu0 %v5426_v49 }
 0x2e6   :  { %5429 = vmatprep.subr.bf16.mxu0 %v5428_v63 }
 0x2e9   :  { %5431 = vmatpush1.bf16.msra.mxu0 %v5430_v5 }
 0x2ea   :  { %5433 = vmatprep.subr.bf16.mxu0 %v5432_v7 }
 0x2ed   :  { %5435 = vmatpush1.bf16.msra.mxu0 %v5434_v14 }
 0x2ee   :  { %5437 = vmatprep.subr.bf16.mxu0 %v5436_v15 }
 0x2f1   :  { %5439 = vmatpush1.bf16.msra.mxu0 %v5438_v20 }
 0x386   :  { %v3522_v28 = vpop.f32.mrb[0].mxu0  ;;  %v3599_v29 = vpop.f32.mrb[0].mxu1 }
 0x387   :  { %v3822_v32 = vadd.f32 %v3785_v11, %v3522_v28  ;;  %v3524_v34 = vpop.f32.mrb[1].mxu0  ;;  %v3601_v36 = vpop.f32.mrb[1].mxu1  ;;  %v3824_v48 = vadd.f32 %v3793_v31, %v3599_v29  ;;  %v3998_v28 = vld [vmem:[#allocation7 + $0x100] sm:$0xff]  ;;  %v4000_v29 = vld [vmem:[#allocation7 + $0x110] sm:$0xff] }
 0x388   :  { %v3823_v61 = vadd.f32 %v3789_v25, %v3524_v34  ;;  %v3825_v41 = vadd.f32 %v3797_v37, %v3601_v36  ;;  %v4005_v34 = vld [vmem:[#allocation7 + $0x138] sm:$0xff] }
 0x38a   :  { %v3838_v33 = vmax.f32 %v3822_v32, %v3823_v61  ;;  %v3528_v38 = vpop.f32.mrb[2].mxu0  ;;  %v3605_v35 = vpop.f32.mrb[2].mxu1  ;;  %v4003_v32 = vld [vmem:[#allocation7 + $0x128] sm:$0xff]  ;;  %v4002_v61 = vld [vmem:[#allocation7 + $0x120] sm:$0xff] }
 0x38b   :  { %v3830_v27 = vadd.f32 %v3785_v11, %v3528_v38  ;;  %v3530_v39 = vpop.f32.mrb[3].mxu0  ;;  %v3607_v40 = vpop.f32.mrb[3].mxu1  ;;  %v3832_v46 = vadd.f32 %v3793_v31, %v3605_v35  ;;  %v3999_v11 = vld [vmem:[#allocation7 + $0x108] sm:$0xff]  ;;  %v5442_v31 = vpack.c.bf16 %v4000_v29, %v3998_v28  ;;  %v5444_v36 = vpack.c.bf16 %v4005_v34, %v4003_v32  ;;  %v4009_v38 = vld [vmem:[#allocation7 + $0x158] sm:$0xff] }
 0x38c   :  { %v3840_v42 = vmax.f32 %v3838_v33, %v3824_v48  ;;  %v3831_v43 = vadd.f32 %v3789_v25, %v3530_v39  ;;  %v3833_v10 = vadd.f32 %v3797_v37, %v3607_v40  ;;  %v4001_v25 = vld [vmem:[#allocation7 + $0x118] sm:$0xff]  ;;  %v4004_v37 = vld [vmem:[#allocation7 + $0x130] sm:$0xff]  ;;  %v4007_v33 = vld [vmem:[#allocation7 + $0x148] sm:$0xff] }
 0x38d   :  { %v5440_v26 = vpack.c.bf16 %v4001_v25, %v3999_v11  ;;  %v5446_v48 = vpack.c.bf16 %v4004_v37, %v4002_v61  ;;  %v5448_v35 = vpack.c.bf16 %v4009_v38, %v4007_v33  ;;  %v4008_v39 = vld [vmem:[#allocation7 + $0x150] sm:$0xff] }
 0x38e   :  { %v3842_v45 = vmax.f32 %v3840_v42, %v3825_v41  ;;  %v3839_v54 = vmax.f32 %v3830_v27, %v3831_v43  ;;  %v4006_v27 = vld [vmem:[#allocation7 + $0x140] sm:$0xff]  ;;  %v4011_v41 = vld [vmem:[#allocation7 + $0x168] sm:$0xff]  ;;  %v4013_v42 = vld [vmem:[#allocation7 + $0x178] sm:$0xff] }
 0x38f   :  { %5441 = vmatprep.subr.bf16.mxu1 %v5440_v26  ;;  %v5450_v40 = vpack.c.bf16 %v4008_v39, %v4006_v27  ;;  %v5452_v43 = vpack.c.bf16 %v4013_v42, %v4011_v41  ;;  %v4142_v41 = vld [vmem:[#allocation10] sm:$0xff]  ;;  %v4143_v42 = vld [vmem:[#allocation10 + $0x8] sm:$0xff] }
 0x390   :  { %v3841_v22 = vmax.f32 %v3839_v54, %v3832_v46  ;;  %5443 = vmatpush1.bf16.msra.mxu1 %v5442_v31  ;;  %v4012_v46 = vld [vmem:[#allocation7 + $0x170] sm:$0xff] }
 0x391   :  { %5445 = vmatprep.subr.bf16.mxu1 %v5444_v36 }
 0x392   :  { %v3843_v47 = vmax.f32 %v3841_v22, %v3833_v10  ;;  %v4015_v10 = vld [vmem:[#allocation7 + $0x188] sm:$0xff]  ;;  %v4017_v22 = vld [vmem:[#allocation7 + $0x198] sm:$0xff] }
 0x394   :  { %5447 = vmatpush1.bf16.msra.mxu1 %v5446_v48 }
 0x395   :  { %5449 = vmatprep.subr.bf16.mxu1 %v5448_v35 }
 0x398   :  { %5451 = vmatpush1.bf16.msra.mxu1 %v5450_v40 }
 0x399   :  { %5453 = vmatprep.subr.bf16.mxu1 %v5452_v43  ;;  %v5472_v43 = vpack.c.bf16 %v4143_v42, %v4142_v41 }
 0x39b   :  { %5473 = vmatprep.subr.bf16.mxu0 %v5472_v43 }
 0x3a6   :  { %v3676_v57 = vpop.f32.mrb[4].mxu0  ;;  %v3753_v44 = vpop.f32.mrb[4].mxu1 }
 0x3a7   :  { %v3826_v16 = vadd.f32 %v3801_v52, %v3676_v57  ;;  %v3678_v59 = vpop.f32.mrb[5].mxu0  ;;  %v3755_v60 = vpop.f32.mrb[5].mxu1  ;;  %v3828_v56 = vadd.f32 %v3809_v58, %v3753_v44  ;;  %v4018_v57 = vld [vmem:[#allocation7 + $0x1a0] sm:$0xff]  ;;  %v4020_v44 = vld [vmem:[#allocation7 + $0x1b0] sm:$0xff] }
 0x3a8   :  { %v3827_v49 = vadd.f32 %v3805_v30, %v3678_v59  ;;  %v3829_v12 = vadd.f32 %v3813_v1, %v3755_v60  ;;  %v4025_v59 = vld [vmem:[#allocation7 + $0x1d8] sm:$0xff] }
 0x3a9   :  { %v3844_v62 = vmax.f32 %v3842_v45, %v3826_v16  ;;  %v4010_v45 = vld [vmem:[#allocation7 + $0x160] sm:$0xff]  ;;  %v5462_v16 = vpack.c.bf16 %v4020_v44, %v4018_v57  ;;  %v4155_v44 = vld [vmem:[#allocation10 + $0x68] sm:$0xff] }
 0x3aa   :  { %v3682_v63 = vpop.f32.mrb[6].mxu0  ;;  %v3759_v4 = vpop.f32.mrb[6].mxu1  ;;  %v5454_v54 = vpack.c.bf16 %v4012_v46, %v4010_v45  ;;  %v4145_v45 = vld [vmem:[#allocation10 + $0x18] sm:$0xff]  ;;  %v4154_v57 = vld [vmem:[#allocation10 + $0x60] sm:$0xff] }
 0x3ab   :  { %v3846_v5 = vmax.f32 %v3844_v62, %v3827_v49  ;;  %v3834_v6 = vadd.f32 %v3801_v52, %v3682_v63  ;;  %v3684_v0 = vpop.f32.mrb[7].mxu0  ;;  %v3761_v7 = vpop.f32.mrb[7].mxu1  ;;  %v3836_v15 = vadd.f32 %v3809_v58, %v3759_v4  ;;  %v5458_v52 = vpack.c.bf16 %v4016_v51, %v4014_v50  ;;  %v4023_v58 = vld [vmem:[#allocation7 + $0x1c8] sm:$0xff]  ;;  %v4022_v49 = vld [vmem:[#allocation7 + $0x1c0] sm:$0xff]  ;;  %v4024_v62 = vld [vmem:[#allocation7 + $0x1d0] sm:$0xff] }
 0x3ac   :  { %v3835_v8 = vadd.f32 %v3805_v30, %v3684_v0  ;;  %v3837_v20 = vadd.f32 %v3813_v1, %v3761_v7  ;;  %5455 = vmatpush1.bf16.msra.mxu1 %v5454_v54  ;;  %v4021_v30 = vld [vmem:[#allocation7 + $0x1b8] sm:$0xff]  ;;  %v5464_v60 = vpack.c.bf16 %v4025_v59, %v4023_v58  ;;  %v5466_v1 = vpack.c.bf16 %v4024_v62, %v4022_v49  ;;  %v4027_v63 = vld [vmem:[#allocation7 + $0x1e8] sm:$0xff]  ;;  %v3886_v7 = vld [vmem:[#allocation8] sm:$0x3] }
 0x3ad   :  { %v3848_v14 = vmax.f32 %v3846_v5, %v3828_v56  ;;  %v3845_v3 = vmax.f32 %v3843_v47, %v3834_v6  ;;  %v5456_v47 = vpack.c.bf16 %v4017_v22, %v4015_v10  ;;  %v5460_v55 = vpack.c.bf16 %v4021_v30, %v4019_v53  ;;  %v4029_v4 = vld [vmem:[#allocation7 + $0x1f8] sm:$0xff]  ;;  %v4026_v5 = vld [vmem:[#allocation7 + $0x1e0] sm:$0xff]  ;;  %v4028_v6 = vld [vmem:[#allocation7 + $0x1f0] sm:$0xff] }
 0x3ae   :  { %v5468_v56 = vpack.c.bf16 %v4029_v4, %v4027_v63  ;;  %v5470_v0 = vpack.c.bf16 %v4028_v6, %v4026_v5  ;;  %v3895_v26 = vrot.slane %v3886_v7, %v6411_v23  ;;  %v4146_v54 = vld [vmem:[#allocation10 + $0x20] sm:$0xff]  ;;  %v4147_v10 = vld [vmem:[#allocation10 + $0x28] sm:$0xff]  ;;  %v4152_v53 = vld [vmem:[#allocation10 + $0x50] sm:$0xff] }
 0x3af   :  { %v3850_v19 = vmax.f32 %v3848_v14, %v3829_v12  ;;  %v3847_v17 = vmax.f32 %v3845_v3, %v3835_v8  ;;  %5457 = vmatprep.subr.bf16.mxu1 %v5456_v47  ;;  %v3891_v8 = vrot.slane %v3886_v7, %v6409_v21  ;;  %v5480_v22 = vpack.c.bf16 %v4147_v10, %v4146_v54  ;;  %v4150_v50 = vld [vmem:[#allocation10 + $0x40] sm:$0xff]  ;;  %v4151_v51 = vld [vmem:[#allocation10 + $0x48] sm:$0xff]  ;;  %v4153_v30 = vld [vmem:[#allocation10 + $0x58] sm:$0xff] }
 0x3b0   :  { %5459 = vmatpush1.bf16.msra.mxu1 %v5458_v52  ;;  %v5488_v52 = vpack.c.bf16 %v4151_v51, %v4150_v50  ;;  %v4156_v58 = vld [vmem:[#allocation10 + $0x70] sm:$0xff]  ;;  %v4157_v59 = vld [vmem:[#allocation10 + $0x78] sm:$0xff] }
 0x3b1   :  { %v6415_v18 = vmax.f32 %v3850_v19, 0.0  ;;  %v3849_v2 = vmax.f32 %v3847_v17, %v3836_v15  ;;  %5461 = vmatprep.subr.bf16.mxu1 %v5460_v55  ;;  %v5492_v55 = vpack.c.bf16 %v4153_v30, %v4152_v53  ;;  %v4031_v49 = vld [vmem:[#allocation8 + $0x2] sm:$0x3] }
 0x3b2   :  { %v4036_v62 = vrot.slane %v4031_v49, %v6409_v21 }
 0x3b3   :  { %v3851_v24 = vmax.f32 %v3849_v2, %v3837_v20  ;;  %3963 = vmatmul.mubr.f32.vlgmr.msra.gmra.mrb[8].mxu0 %v6415_v18 }
 0x3b4   :  { %3968 = vmatprep.mubr.f32.mxu0 %v5852_v13  ;;  %5463 = vmatpush1.bf16.msra.mxu1 %v5462_v16  ;;  %v5496_v16 = vpack.c.bf16 %v4155_v44, %v4154_v57 }
 0x3b5   :  { %v6419_v9 = vmax.f32 %v3851_v24, 0.0  ;;  %5465 = vmatprep.subr.bf16.mxu1 %v5464_v60  ;;  %5475 = vmatpush3.bf16.msra.mxu0 %v5472_v43  ;;  %v5500_v60 = vpack.c.bf16 %v4157_v59, %v4156_v58 }
 0x3b7   :  { %3969 = vmatmul.mubr.f32.gmra.mrb[10].mxu0 %v6419_v9 }
 0x3b8   :  { %5467 = vmatpush1.bf16.msra.mxu1 %v5466_v1 }
 0x3b9   :  { %5469 = vmatprep.subr.bf16.mxu1 %v5468_v56 }
 0x3bc   :  { %5471 = vmatpush1.bf16.msra.mxu1 %v5470_v0 }
 0x486   :  { %v3964_v12 = vpop.f32.mrb[8].mxu0 }
 0x487   :  { %v3965_v14 = vadd.f32 %v3964_v12, %v3891_v8  ;;  %v3966_v3 = vpop.f32.mrb[9].mxu0 }
 0x488   :  { %v3967_v29 = vadd.f32 %v3966_v3, %v3895_v26  ;;  %v4040_v3 = vrot.slane %v4031_v49, %v6411_v23  ;;  %v4330_v23 = vld [vmem:[#allocation11] ss:$0 sm:$0xff] }
 0x489   :  { %v4326_v19 = vmul.f32 -1.442695, %v3965_v14 }
 0x48a   :  { %v3970_v15 = vpop.f32.mrb[10].mxu0  ;;  %v3987_v31 = vmax.f32 %v3967_v29, 0.0 }
 0x48b   :  { %5654 = vpow2.f32 %v4326_v19  ;;  %v3971_v17 = vadd.f32 %v3970_v15, %v3891_v8  ;;  %v3972_v20 = vpop.f32.mrb[11].mxu0 }
 0x48c   :  { %v3973_v32 = vadd.f32 %v3972_v20, %v3895_v26 }
 0x48d   :  { %v4327_v2 = vmul.f32 -1.442695, %v3971_v17 }
 0x48e   :  { %v3988_v48 = vmax.f32 %v3973_v32, 0.0 }
 0x48f   :  { %5656 = vpow2.f32 %v4327_v2 }
 0x495   :  { %v5655_v24 = vpop.eup %5654 }
 0x496   :  { %v3981_v11 = vadd.f32 1.0, %v5655_v24 }
 0x498   :  { %5658 = vrcp.f32 %v3981_v11 }
 0x499   :  { %v5657_v25 = vpop.eup %5656 }
 0x49a   :  { %v3982_v28 = vadd.f32 1.0, %v5657_v25 }
 0x49c   :  { %5660 = vrcp.f32 %v3982_v28 }
 0x4a2   :  { %v5659_v34 = vpop.eup %5658 }
 0x4a3   :  { %v3989_v36 = vmul.f32 %v5659_v34, %v3987_v31  ;;  %v3991_v61 = vsub.f32 1.0, %v5659_v34 }
 0x4a5   :  { %v3993_v37 = vmul.f32 %v3991_v61, %v6415_v18  ;;  %v4144_v18 = vld [vmem:[#allocation10 + $0x10] sm:$0xff] }
 0x4a6   :  { %v5661_v33 = vpop.eup %5660  ;;  %v5476_v46 = vpack.c.bf16 %v4145_v45, %v4144_v18 }
 0x4a7   :  { %v6425_v38 = vadd.f32 %v3993_v37, %v3989_v36  ;;  %v3990_v35 = vmul.f32 %v5661_v33, %v3988_v48  ;;  %v3992_v27 = vsub.f32 1.0, %v5661_v33 }
 0x4a8   :  { %5477 = vmatprep.subr.bf16.mxu0 %v5476_v46 }
 0x4a9   :  { %4108 = vmatmul.mubr.f32.vlgmr.msra.gmra.mrb[8].mxu1 %v6425_v38  ;;  %v3994_v39 = vmul.f32 %v3992_v27, %v6419_v9  ;;  %5479 = vmatpush3.bf16.msra.mxu0 %v5476_v46  ;;  %v4149_v9 = vld [vmem:[#allocation10 + $0x38] sm:$0xff] }
 0x4aa   :  { %4113 = vmatprep.mubr.f32.mxu1 %v5852_v13  ;;  %5481 = vmatprep.subr.bf16.mxu0 %v5480_v22  ;;  %v4148_v13 = vld [vmem:[#allocation10 + $0x30] sm:$0xff] }
 0x4ab   :  { %v6430_v40 = vadd.f32 %v3994_v39, %v3990_v35  ;;  %v5484_v47 = vpack.c.bf16 %v4149_v9, %v4148_v13 }
 0x4ad   :  { %4114 = vmatmul.mubr.f32.gmra.mrb[10].mxu1 %v6430_v40  ;;  %5483 = vmatpush3.bf16.msra.mxu0 %v5480_v22 }
 0x4ae   :  { %5485 = vmatprep.subr.bf16.mxu0 %v5484_v47 }
 0x4b1   :  { %5487 = vmatpush3.bf16.msra.mxu0 %v5484_v47 }
 0x4b2   :  { %5489 = vmatprep.subr.bf16.mxu0 %v5488_v52 }
 0x4b5   :  { %5491 = vmatpush3.bf16.msra.mxu0 %v5488_v52 }
 0x4b6   :  { %5493 = vmatprep.subr.bf16.mxu0 %v5492_v55 }
 0x4b9   :  { %5495 = vmatpush3.bf16.msra.mxu0 %v5492_v55 }
 0x4ba   :  { %5497 = vmatprep.subr.bf16.mxu0 %v5496_v16 }
 0x4bd   :  { %5499 = vmatpush3.bf16.msra.mxu0 %v5496_v16 }
 0x4be   :  { %5501 = vmatprep.subr.bf16.mxu0 %v5500_v60 }
 0x4c1   :  { %5503 = vmatpush3.bf16.msra.mxu0 %v5500_v60 }
 0x57c   :  { %v4109_v1 = vpop.f32.mrb[8].mxu1 }
 0x57d   :  { %v4110_v63 = vadd.f32 %v4109_v1, %v4036_v62  ;;  %v4111_v4 = vpop.f32.mrb[9].mxu1 }
 0x57e   :  { %v4112_v15 = vadd.f32 %v4111_v4, %v4040_v3 }
 0x57f   :  { %v4328_v56 = vmul.f32 -1.442695, %v4110_v63 }
 0x580   :  { %v4115_v5 = vpop.f32.mrb[10].mxu1  ;;  %v4132_v21 = vmax.f32 %v4112_v15, 0.0 }
 0x581   :  { %5662 = vpow2.f32 %v4328_v56  ;;  %v4116_v6 = vadd.f32 %v4115_v5, %v4036_v62  ;;  %v4117_v0 = vpop.f32.mrb[11].mxu1 }
 0x582   :  { %v4118_v17 = vadd.f32 %v4117_v0, %v4040_v3 }
 0x583   :  { %v4329_v7 = vmul.f32 -1.442695, %v4116_v6 }
 0x584   :  { %v4133_v11 = vmax.f32 %v4118_v17, 0.0 }
 0x585   :  { %5664 = vpow2.f32 %v4329_v7 }
 0x58b   :  { %v5663_v8 = vpop.eup %5662 }
 0x58c   :  { %v4126_v12 = vadd.f32 1.0, %v5663_v8 }
 0x58e   :  { %5666 = vrcp.f32 %v4126_v12 }
 0x58f   :  { %v5665_v14 = vpop.eup %5664 }
 0x590   :  { %v4127_v19 = vadd.f32 1.0, %v5665_v14 }
 0x592   :  { %5668 = vrcp.f32 %v4127_v19 }
 0x598   :  { %v5667_v20 = vpop.eup %5666 }
 0x599   :  { %v4134_v2 = vmul.f32 %v5667_v20, %v4132_v21  ;;  %v4136_v24 = vsub.f32 1.0, %v5667_v20 }
 0x59b   :  { %v4138_v25 = vmul.f32 %v4136_v24, %v6425_v38 }
 0x59c   :  { %v5669_v26 = vpop.eup %5668 }
 0x59d   :  { %v4135_v28 = vmul.f32 %v5669_v26, %v4133_v11  ;;  %v4137_v29 = vsub.f32 1.0, %v5669_v26  ;;  %v4140_v31 = vadd.f32 %v4138_v25, %v4134_v2 }
 0x59f   :  { %v4139_v32 = vmul.f32 %v4137_v29, %v6430_v40  ;;  %4381 = vmatprep.mubr.f32.mxu0 %v4140_v31 }
 0x5a1   :  { %v4141_v34 = vadd.f32 %v4139_v32, %v4135_v28 }
 0x5a3   :  { %4382 = vmatmul.mubr.f32.vlgmr.msra.gmra.mrb[12].mxu0 %v4141_v34 }
 0x676   :  { %v4383_v36 = vpop.f32.mrb[12].mxu0 }
 0x677   :  { %v4237_v61 = vadd.f32 %v4383_v36, %v4330_v23  ;;  %v4231_v37 = vpop.f32.mrb[13].mxu0 }
 0x678   :  { %v4232_v48 = vadd.f32 %v4330_v23, %v4231_v37 }
 0x679   :  { %4241 = vst [vmem:[#allocation13 + $0x8] sm:$0xff] %v4237_v61 }
 0x67a   :  { %4240 = vst [vmem:[#allocation13] sm:$0xff] %v4232_v48 }
 0x67b   :  { %5815 = shalt.err (!%p5812_p10)
}
 0x67c   :  { %s5816_s15 = scalar_lea.hbm %s6459_s7, 256 }
 0x67d   :  { %p5817_p11 = scmp.ne.s32.totalorder %s6459_s7, %s5816_s15  ;;  %p5820_p12 = scmp.lt.u32.totalorder %s5816_s15, %s6459_s7 }
 0x67f   :  { %p5822_p13 = pnand %p5820_p12, %p5817_p11 }
 0x681   :  { %5825 = shalt.err (!%p5822_p13)
}
 0x682   :  { %4253 = dma.vmem_to_hbm [thread:$0]  %s4248_s12, 256, %s6459_s7, [#allocation4], %s5847_s3, %s5847_s3, %s5848_s14  }
 0x683   :  { %5834 = dma.done.wait [#allocation4], 256  }
 0x684   :  { %5835 = vsyncadd [#allocation4], 4294967040 }
 0x685   :  { %4257 = vsyncpa [#allocation3], 1 }
 0x686   :  { %4258 = vsyncpa [#allocation6], 1 }
 0x687   :  { %4259 = vsyncpa [#allocation9], 1 }
 0x688   :  { %4260 = vsyncpa [#allocation12], 1 }
 0x689   :  { %4261 = vsyncpa [#allocation4], 1 }

</bundles_post_ra>
